<compile_context>
chip_gen: v5e
topology: v5e:2x2
jax: 0.10.0
libtpu: 0.0.40
codegen_flags: <defaults>
</compile_context>

<pallas_src>
import numpy as np
import jax
import jax.numpy as jnp
from jax import lax
from jax.experimental import pallas as pl
from jax.experimental.pallas import tpu as pltpu


LANE = 128
VMEM_LIMIT_BYTES = 64 * 1024 * 1024          # explicit scoped-VMEM limit (<= v7x physical)


def _round_up(n, m):
    return ((n + m - 1) // m) * m


def _pad2d(x, rows, cols):
    return jnp.pad(x, ((0, rows - x.shape[0]), (0, cols - x.shape[1])))


def _resident_spec(block_shape, index_map):
    """BlockSpec for a grid-invariant input: request a single buffer (no double
    buffering) when this JAX exposes pipeline_mode; fall back gracefully."""
    if hasattr(pl, "Buffered"):
        try:
            return pl.BlockSpec(block_shape, index_map, pipeline_mode=pl.Buffered(1))
        except Exception:
            pass
    return pl.BlockSpec(block_shape, index_map)


# ----------------------------------------------------------------------------
# Kernel 1: backbone stand-in (1x1 conv == per-pixel channel projection)
# ----------------------------------------------------------------------------

def _make_conv1x1_kernel(cin):
    def kernel(x_ref, w_ref, b_ref, o_ref):
        # x: (TR, cin)  w: (cin, Cpad)  b: (1, Cpad)  o: (TR, Cpad) bf16
        x = x_ref[...]
        w = w_ref[...]
        # Cin is tiny (3): VPU broadcast-FMA instead of a K=3 MXU matmul.
        out = x[:, 0:1] * w[0:1, :] + b_ref[...]
        for c in range(1, cin):
            out = out + x[:, c:c + 1] * w[c:c + 1, :]
        o_ref[...] = out.astype(o_ref.dtype)
    return kernel


def conv1x1_flat(x_nhwc, w_pad, b_pad, tile_rows=1024):
    """Backbone stand-in: 1x1 conv, row-tiled, bf16 lane-dense feature map.
    Returns the flattened (rows_pad, Cpad) bf16 feature map (rows = B*H*W).
    TODO(synk): real backbone is ResNet/FPN."""
    B, H, W, Cin = x_nhwc.shape
    Cpad = w_pad.shape[1]
    rows = B * H * W
    rows_pad = _round_up(rows, tile_rows)
    x2 = x_nhwc.reshape(rows, Cin)
    if rows_pad != rows:
        x2 = jnp.pad(x2, ((0, rows_pad - rows), (0, 0)))
    out = pl.pallas_call(
        _make_conv1x1_kernel(Cin),
        out_shape=jax.ShapeDtypeStruct((rows_pad, Cpad), jnp.bfloat16),
        grid=(rows_pad // tile_rows,),
        in_specs=[
            pl.BlockSpec((tile_rows, Cin), lambda i: (i, 0)),
            _resident_spec((Cin, Cpad), lambda i: (0, 0)),
            _resident_spec((1, Cpad), lambda i: (0, 0)),
        ],
        out_specs=pl.BlockSpec((tile_rows, Cpad), lambda i: (i, 0)),
        compiler_params=pltpu.CompilerParams(
            dimension_semantics=("parallel",),
            vmem_limit_bytes=VMEM_LIMIT_BYTES),
    )(x2, w_pad, b_pad)
    return out


# ----------------------------------------------------------------------------
# Kernel 2: fused ROI gather + avgpool + (v2l @ cls) GEMM + masked softmax
# ----------------------------------------------------------------------------

def _grounding_tail(pooled_f32, w_ref, b_ref, probs_ref, num_classes):
    """Shared tail: fused projection GEMM (bf16 MXU inputs, f32 accum) and a
    masked softmax over the real classes.  Normalization is exact: one exact
    reciprocal per row then a broadcast multiply (approx=True was the source
    of the previous prob-sum failure)."""
    logit = jnp.dot(pooled_f32.astype(w_ref.dtype), w_ref[...],
                    preferred_element_type=jnp.float32) + b_ref[...]
    col = lax.broadcasted_iota(jnp.int32, logit.shape, 1)
    logit = jnp.where(col < num_classes, logit, jnp.float32(-1e30))
    m = jnp.max(logit, axis=-1, keepdims=True)
    e = jnp.exp(logit - m)
    inv = 1.0 / jnp.sum(e, axis=-1, keepdims=True)          # exact, one per row
    probs_ref[...] = e * inv
    # TODO(synk): class-block the classifier (online softmax carry) when
    # num_classes is large enough that the resident weight blows VMEM (v7x).


def _make_vmem_roi_kernel(tb, s, num_classes):
    """Feature map resident in VMEM: gather = in-kernel dynamic row loads."""
    inv_s = 1.0 / float(s)

    def kernel(idx_ref,                      # SMEM scalar-prefetch: flat row indices
               feat_ref,                     # VMEM-resident (rows_pad, cpad) bf16
               w_ref, b_ref,                 # fused projection weight/bias
               probs_ref, pooled_ref):       # outputs (tb, NCpad), (tb, Cpad)
        base = pl.program_id(0) * (tb * s)

        def pool_one_box(r, carry):
            off = base + r * s
            acc = feat_ref[pl.ds(idx_ref[off], 1), :].astype(jnp.float32)
            for smp in range(1, s):
                acc = acc + feat_ref[pl.ds(idx_ref[off + smp], 1), :].astype(jnp.float32)
            pooled_ref[pl.ds(r, 1), :] = acc * inv_s         # AdaptiveAvgPool2d(1)
            return carry

        lax.fori_loop(0, tb, pool_one_box, 0)
        _grounding_tail(pooled_ref[...], w_ref, b_ref, probs_ref, num_classes)

    return kernel


def _make_hbm_roi_kernel(tb, s, num_classes):
    """Feature map stays in HBM: manual DMA gather, 2-deep per-box ring buffer,
    accumulate-on-arrival (scratch VMEM is 2*s*cpad, independent of tb)."""
    inv_s = 1.0 / float(s)

    def kernel(idx_ref,                      # SMEM scalar-prefetch: flat row indices
               feat_hbm,                     # ANY (HBM): (rows_pad, cpad) bf16
               w_ref, b_ref,                 # fused projection weight/bias
               probs_ref, pooled_ref,        # outputs
               rowbuf, sem):                 # scratch: (2, s, cpad), DMA sems (2, s)
        base = pl.program_id(0) * (tb * s)

        def copy_desc(r, slot, smp):
            # NOTE: the wait reconstructs the *identical* descriptor (same src
            # row) as the start — never a dummy src.
            row = idx_ref[base + r * s + smp]
            return pltpu.make_async_copy(feat_hbm.at[row],
                                         rowbuf.at[slot, smp],
                                         sem.at[slot, smp])

        def issue_box(r, slot):
            for smp in range(s):
                copy_desc(r, slot, smp).start()

        def wait_and_pool_box(r, slot):
            for smp in range(s):
                copy_desc(r, slot, smp).wait()
            blk = rowbuf[slot].astype(jnp.float32)                    # (s, cpad)
            pooled_ref[pl.ds(r, 1), :] = jnp.sum(blk, axis=0, keepdims=True) * inv_s

        issue_box(0, 0)                                               # prime the pipe

        def body(r, carry):
            slot = r & 1

            # issue box r+1 before waiting on box r: its DMAs fly under the
            # current box's waits + pooling adds.
            @pl.when(r + 1 < tb)
            def _():
                issue_box(r + 1, 1 - slot)

            wait_and_pool_box(r, slot)
            return carry

        lax.fori_loop(0, tb, body, 0)
        # TODO(synk): cross-grid-step prefetch (gather tile t+1 under tile t's
        # matmul/softmax) for fully hiding the gather latency.
        _grounding_tail(pooled_ref[...], w_ref, b_ref, probs_ref, num_classes)

    return kernel


def fused_roi_grounding(feat_flat, sample_idx, w_fused_p, b_fused_p, num_classes,
                        box_tile=256, force_hbm=False,
                        vmem_feat_budget=16 * 1024 * 1024):
    """One pallas_call for: gather ROI sample rows, average-pool, fused
    (v2l_projection @ cls_score) GEMM, masked softmax.  Tiled over total boxes.
    box_tile=256 suits v6e/v7x; use 128 on v5e."""
    tot, s = sample_idx.shape
    rows_pad, cpad = feat_flat.shape
    ncpad = w_fused_p.shape[1]

    tb = min(box_tile, _round_up(tot, 8))
    tot_pad = _round_up(tot, tb)
    n_tiles = tot_pad // tb

    idx_flat = jnp.pad(sample_idx.astype(jnp.int32),
                       ((0, tot_pad - tot), (0, 0))).reshape(-1)

    feat_bytes = rows_pad * cpad * feat_flat.dtype.itemsize
    use_vmem_feat = (not force_hbm) and feat_bytes <= vmem_feat_budget

    w_spec = _resident_spec((cpad, ncpad), lambda t, idx: (0, 0))
    b_spec = _resident_spec((1, ncpad), lambda t, idx: (0, 0))
    out_specs = (pl.BlockSpec((tb, ncpad), lambda t, idx: (t, 0)),    # probs
                 pl.BlockSpec((tb, cpad), lambda t, idx: (t, 0)))     # pooled feats
    out_shape = (jax.ShapeDtypeStruct((tot_pad, ncpad), jnp.float32),
                 jax.ShapeDtypeStruct((tot_pad, cpad), jnp.float32))

    if use_vmem_feat:
        kernel = _make_vmem_roi_kernel(tb, s, num_classes)
        feat_spec = _resident_spec((rows_pad, cpad), lambda t, idx: (0, 0))
        scratch = []
    else:
        kernel = _make_hbm_roi_kernel(tb, s, num_classes)
        feat_spec = pl.BlockSpec(memory_space=pl.ANY)
        scratch = [pltpu.VMEM((2, s, cpad), feat_flat.dtype),
                   pltpu.SemaphoreType.DMA((2, s))]

    grid_spec = pltpu.PrefetchScalarGridSpec(
        num_scalar_prefetch=1,
        grid=(n_tiles,),
        in_specs=[feat_spec, w_spec, b_spec],
        out_specs=out_specs,
        scratch_shapes=scratch)

    probs_pad, pooled_pad = pl.pallas_call(
        kernel,
        out_shape=out_shape,
        grid_spec=grid_spec,
        compiler_params=pltpu.CompilerParams(
            dimension_semantics=("parallel",),
            vmem_limit_bytes=VMEM_LIMIT_BYTES),
    )(idx_flat, feat_flat, w_fused_p, b_fused_p)
    return probs_pad, pooled_pad


# ----------------------------------------------------------------------------
# Glue (plain JAX) — stand-ins for external sub-modules + metric bookkeeping
# ----------------------------------------------------------------------------

def compute_sample_indices(boxes, batch_idx, H, W, P):
    """Stand-in for bbox_feature_extractor (ROIAlign + head): nearest-point
    sampling of a PxP grid inside each box; returns flat row indices into the
    flattened (B*H*W, C) feature map.
    TODO(synk): real make_roi_box_feature_extractor is bilinear ROIAlign + FC head."""
    g = (jnp.arange(P, dtype=jnp.float32) + 0.5) / P
    x1, y1, x2, y2 = boxes[:, 0], boxes[:, 1], boxes[:, 2], boxes[:, 3]
    xs = jnp.clip(jnp.round(x1[:, None] + (x2 - x1)[:, None] * g[None, :]).astype(jnp.int32),
                  0, W - 1)
    ys = jnp.clip(jnp.round(y1[:, None] + (y2 - y1)[:, None] * g[None, :]).astype(jnp.int32),
                  0, H - 1)
    flat = (batch_idx[:, None, None] * (H * W)
            + ys[:, :, None] * W
            + xs[:, None, :])
    return flat.reshape(boxes.shape[0], P * P)


def bbox_loc_normalized(boxes, image_h, image_w):
    """bbox / (w,h) concat normalized area (BoxList.area xyxy uses TO_REMOVE=1).
    Plain JAX: a Pallas kernel on 4/5-wide rows is pure launch/layout overhead."""
    x1, y1, x2, y2 = boxes[:, 0:1], boxes[:, 1:2], boxes[:, 2:3], boxes[:, 3:4]
    area = (x2 - x1 + 1.0) * (y2 - y1 + 1.0) / float(image_h * image_w)
    return jnp.concatenate(
        [x1 / image_w, y1 / image_h, x2 / image_w, y2 / image_h, area], axis=-1)


def mmss_region_inference(images_nchw, per_image_boxes, per_image_labels, params,
                          P=4, force_hbm_gather=False):
    """Forward with cfg.INFERENCE.DO = True:
       backbone -> bbox_feature_extractor -> avgpool -> v2l -> cls -> softmax
       -> zero-shot recognition metrics (do_inference)."""
    images_nhwc = jnp.transpose(images_nchw, (0, 2, 3, 1)).astype(jnp.float32)
    B, H, W, _ = images_nhwc.shape
    C = params["out_channels"]
    NC = params["num_classes"]

    # backbone (stand-in 1x1 conv, bf16 feature map)
    feat_flat = conv1x1_flat(images_nhwc, params["w_bb_pad"], params["b_bb_pad"])

    boxes_all = jnp.concatenate(per_image_boxes, axis=0)
    batch_idx = jnp.concatenate(
        [jnp.full((b.shape[0],), i, jnp.int32) for i, b in enumerate(per_image_boxes)])
    labels_np = np.concatenate(per_image_labels).astype(np.int64)
    labels = jnp.asarray(labels_np)
    TOT = int(boxes_all.shape[0])

    sample_idx = compute_sample_indices(boxes_all, batch_idx, H, W, P)

    probs_pad, pooled_pad = fused_roi_grounding(
        feat_flat, sample_idx,
        params["w_fused_pad"], params["b_fused_pad"],
        num_classes=NC, force_hbm=force_hbm_gather)
    probs = probs_pad[:TOT, :NC]
    pooled = pooled_pad[:TOT, :C]

    # do_inference metrics
    pred = jnp.argmax(probs, axis=-1)
    correctness = (pred == labels).astype(jnp.float32)
    _, topk_class = lax.top_k(probs, 5)
    topk_correct = jnp.sum((topk_class == labels[:, None]).astype(jnp.float32), axis=-1)

    per_class_acc = []
    for cl in sorted(set(labels_np.tolist())):
        idx = np.where(labels_np == cl)[0]
        per_class_acc.append(jnp.mean(correctness[idx]))
    class_wise_accuracy = sum(per_class_acc) / len(per_class_acc)

    # TODO(synk): 'Zeroshot Recognition mAP' needs sklearn average_precision_score.
    result = {
        "Zeroshot Recognition mean class accuracy": class_wise_accuracy,
        "Zeroshot Recognition Accuracy": jnp.mean(correctness),
        "Top-5 Zeroshot Recognition Accuracy": jnp.mean(topk_correct),
    }
    return result, probs, pooled


def assemble_region_inputs(pooled, per_image_boxes, image_h, image_w,
                           spatial_dropout=100):
    """Non-inference branch: bbox loc normalization + pad_sequence + mask
    (everything up to the external language_backbone / mmss_heads)."""
    B = len(per_image_boxes)
    num_bbox_list = [int(b.shape[0]) for b in per_image_boxes]
    max_n = max(num_bbox_list)
    num_regions = min(max_n, spatial_dropout)

    boxes_all = jnp.concatenate(per_image_boxes, axis=0)
    loc_all = bbox_loc_normalized(boxes_all, float(image_h), float(image_w))

    feats, locs = [], []
    start = 0
    for n in num_bbox_list:
        pad = max_n - n
        locs.append(jnp.pad(loc_all[start:start + n], ((0, pad), (0, 0))))
        feats.append(jnp.pad(pooled[start:start + n], ((0, pad), (0, 0))))
        start += n

    flattened_features = jnp.stack(feats)[:, :num_regions]
    flattened_loc = jnp.stack(locs)[:, :num_regions]
    mask = np.zeros((B, max_n), dtype=np.uint8)
    for i, n in enumerate(num_bbox_list):
        mask[i, :n] = 1
    flattened_mask = jnp.asarray(mask[:, :num_regions])

    input_image = {
        "region_features": flattened_features,
        "region_mask": flattened_mask,
        "region_loc": flattened_loc,
        "mvm_mask": jnp.zeros((B, num_regions), jnp.float32),
        "target_region_features": flattened_features,
    }
    # TODO(synk): language_backbone(captions) and mmss_heads (TransformerHead /
    # GroundingHead training losses, scale_TH weighting) are external modules.
    return input_image


# ----------------------------------------------------------------------------
# Pure-JAX reference (for correctness check of the Pallas path)
# ----------------------------------------------------------------------------

def reference_forward(images_nhwc, sample_idx, raw):
    B, H, W, Cin = images_nhwc.shape
    w_bb, b_bb = raw["w_bb"], raw["b_bb"]
    C = w_bb.shape[1]
    # same accumulation order as the conv kernel, then the bf16 rounding the
    # kernel applies when it stores the feature map.
    feat = images_nhwc[..., 0:1] * w_bb[0].reshape(1, 1, 1, C) + b_bb.reshape(1, 1, 1, C)
    for c in range(1, Cin):
        feat = feat + images_nhwc[..., c:c + 1] * w_bb[c].reshape(1, 1, 1, C)
    feat = feat.astype(jnp.bfloat16).astype(jnp.float32)
    flat = feat.reshape(B * H * W, C)
    samples = flat[sample_idx]                        # (TOT, S, C)
    pooled = jnp.mean(samples, axis=1)
    emb = pooled @ raw["w_v2l"] + raw["b_v2l"]
    logit = emb @ raw["w_cls"] + raw["b_cls"]
    probs = jax.nn.softmax(logit, axis=-1)
    return pooled, probs


# ----------------------------------------------------------------------------
# Parameters
# ----------------------------------------------------------------------------

def make_params(key, cin, c, emb, nc):
    k_bb, k_v2l, k_cls = jax.random.split(key, 3)
    w_bb = 0.1 * jax.random.normal(k_bb, (cin, c), jnp.float32)
    b_bb = jnp.zeros((1, c), jnp.float32)
    w_v2l = 0.1 * jax.random.normal(k_v2l, (c, emb), jnp.float32)
    b_v2l = jnp.zeros((1, emb), jnp.float32)
    w_cls = 0.1 * jax.random.normal(k_cls, (emb, nc), jnp.float32)
    b_cls = jnp.zeros((1, nc), jnp.float32)

    # GroundingHead inference never exposes the intermediate embedding, so
    # v2l_projection and cls_score fold into one GEMM (exact up to bf16
    # rounding): W = w_v2l @ w_cls, b = b_v2l @ w_cls + b_cls.
    # TODO(synk): keep the two GEMMs (and stream class blocks) when
    # emb_dim << out_channels and num_classes (fusing then costs more MXU work).
    w_fused = w_v2l @ w_cls
    b_fused = b_v2l @ w_cls + b_cls

    cpad = _round_up(c, LANE)
    ncpad = _round_up(nc, LANE)
    return {
        "out_channels": c,
        "num_classes": nc,
        # lane-dense (128-padded last dim) parameters for the kernels.
        "w_bb_pad": _pad2d(w_bb, cin, cpad),
        "b_bb_pad": _pad2d(b_bb, 1, cpad),
        # bf16 MXU input weight (accumulation stays f32 in-kernel), f32 bias.
        "w_fused_pad": _pad2d(w_fused, cpad, ncpad).astype(jnp.bfloat16),
        "b_fused_pad": _pad2d(b_fused, 1, ncpad),
        # raw f32 copies for the pure-JAX reference.
        "raw": {"w_bb": w_bb, "b_bb": b_bb, "w_v2l": w_v2l, "b_v2l": b_v2l,
                "w_cls": w_cls, "b_cls": b_cls},
    }


# ----------------------------------------------------------------------------
# main
# ----------------------------------------------------------------------------

if __name__ == "__main__":
    key = jax.random.PRNGKey(0)
    k_img, k_param = jax.random.split(key, 2)

    # small synthetic dimensions
    B, Cin, H, W = 2, 3, 32, 32
    C = 32          # backbone out_channels == bbox_feature_extractor.out_channels
    EMB = 64        # language_backbone.out_channels (v2l projection output)
    NUM_CLASSES = 16
    P = 4

    images = jax.random.normal(k_img, (B, Cin, H, W), jnp.float32)   # NCHW like torch

    # GT boxes (bbox_type == 'GT'): xyxy in image coords, with integer labels
    per_image_boxes = [
        jnp.array([[2.0, 3.0, 20.0, 18.0],
                   [5.0, 5.0, 30.0, 30.0],
                   [0.0, 0.0, 15.0, 12.0]], jnp.float32),
        jnp.array([[4.0, 6.0, 28.0, 22.0],
                   [10.0, 2.0, 25.0, 19.0]], jnp.float32),
    ]
    per_image_labels = [np.array([3, 7, 1]), np.array([7, 12])]

    params = make_params(k_param, Cin, C, EMB, NUM_CLASSES)

    # Default path: feature map resident in VMEM (it is tiny here).
    result, probs, pooled = mmss_region_inference(
        images, per_image_boxes, per_image_labels, params, P=P)
    # Also exercise the manual-DMA HBM gather path (used for large feature maps).
    _, probs_hbm, pooled_hbm = mmss_region_inference(
        images, per_image_boxes, per_image_labels, params, P=P, force_hbm_gather=True)

    input_image = assemble_region_inputs(pooled, per_image_boxes, H, W)

    jax.block_until_ready(probs)
    jax.block_until_ready(pooled)
    jax.block_until_ready(probs_hbm)
    jax.block_until_ready(pooled_hbm)
    jax.block_until_ready(input_image["region_loc"])
    for v in result.values():
        jax.block_until_ready(v)

    # correctness check against a pure-JAX reference
    images_nhwc = jnp.transpose(images, (0, 2, 3, 1))
    boxes_all = jnp.concatenate(per_image_boxes, 0)
    batch_idx = jnp.concatenate(
        [jnp.full((b.shape[0],), i, jnp.int32) for i, b in enumerate(per_image_boxes)])
    sample_idx = compute_sample_indices(boxes_all, batch_idx, H, W, P)
    ref_pooled, ref_probs = reference_forward(images_nhwc, sample_idx, params["raw"])

    assert probs.shape == (5, NUM_CLASSES)
    assert np.allclose(np.asarray(jnp.sum(probs, -1)), 1.0, atol=1e-3)
    np.testing.assert_allclose(np.asarray(pooled), np.asarray(ref_pooled),
                               atol=2e-3, rtol=2e-3)
    np.testing.assert_allclose(np.asarray(probs), np.asarray(ref_probs),
                               atol=5e-3, rtol=0)
    np.testing.assert_allclose(np.asarray(pooled_hbm), np.asarray(ref_pooled),
                               atol=2e-3, rtol=2e-3)
    np.testing.assert_allclose(np.asarray(probs_hbm), np.asarray(ref_probs),
                               atol=5e-3, rtol=0)
    assert input_image["region_features"].shape == (B, 3, C)
    assert input_image["region_loc"].shape == (B, 3, 5)

    print("KERNEL_OK")
</pallas_src>

<mosaic_0001>
module attributes {stable_mosaic.version = 11 : i64} {
  func.func @kernel(%arg0: i32, %arg1: memref<1024x3xf32, #tpu.memory_space<vmem>>, %arg2: memref<3x128xf32, #tpu.memory_space<vmem>>, %arg3: memref<1x128xf32, #tpu.memory_space<vmem>>, %arg4: memref<1024x128xbf16, #tpu.memory_space<vmem>>) attributes {dimension_semantics = [#tpu.dimension_semantics<parallel>], iteration_bounds = array<i64: 2>, scalar_prefetch = 0 : i64, scratch_operands = 0 : i64, tpu.core_type = #tpu.core_type<tc>, window_params = [{transform_indices = @transform_0, window_bounds = array<i64: 1024, 3>}, {pipeline_mode = #tpu.pipeline_mode<synchronous>, transform_indices = @transform_1, window_bounds = array<i64: 3, 128>}, {pipeline_mode = #tpu.pipeline_mode<synchronous>, transform_indices = @transform_2, window_bounds = array<i64: 1, 128>}, {transform_indices = @transform_3, window_bounds = array<i64: 1024, 128>}]} {
    %c0 = arith.constant 0 : index
    %c0_0 = arith.constant 0 : index
    %0 = vector.load %arg1[%c0, %c0_0] : memref<1024x3xf32, #tpu.memory_space<vmem>>, vector<1024x3xf32>
    %c0_1 = arith.constant 0 : index
    %c0_2 = arith.constant 0 : index
    %1 = vector.load %arg2[%c0_1, %c0_2] : memref<3x128xf32, #tpu.memory_space<vmem>>, vector<3x128xf32>
    %2 = vector.extract_strided_slice %0 {offsets = [0, 0], sizes = [1024, 1], strides = [1, 1]} : vector<1024x3xf32> to vector<1024x1xf32>
    %3 = vector.extract_strided_slice %1 {offsets = [0, 0], sizes = [1, 128], strides = [1, 1]} : vector<3x128xf32> to vector<1x128xf32>
    %4 = vector.broadcast %2 : vector<1024x1xf32> to vector<1024x128xf32>
    %5 = vector.broadcast %3 : vector<1x128xf32> to vector<1024x128xf32>
    %6 = arith.mulf %4, %5 : vector<1024x128xf32>
    %c0_3 = arith.constant 0 : index
    %c0_4 = arith.constant 0 : index
    %7 = vector.load %arg3[%c0_3, %c0_4] : memref<1x128xf32, #tpu.memory_space<vmem>>, vector<1x128xf32>
    %8 = vector.broadcast %7 : vector<1x128xf32> to vector<1024x128xf32>
    %9 = arith.addf %6, %8 : vector<1024x128xf32>
    %10 = vector.extract_strided_slice %0 {offsets = [0, 1], sizes = [1024, 1], strides = [1, 1]} : vector<1024x3xf32> to vector<1024x1xf32>
    %11 = vector.extract_strided_slice %1 {offsets = [1, 0], sizes = [1, 128], strides = [1, 1]} : vector<3x128xf32> to vector<1x128xf32>
    %12 = vector.broadcast %10 : vector<1024x1xf32> to vector<1024x128xf32>
    %13 = vector.broadcast %11 : vector<1x128xf32> to vector<1024x128xf32>
    %14 = arith.mulf %12, %13 : vector<1024x128xf32>
    %15 = arith.addf %9, %14 : vector<1024x128xf32>
    %16 = vector.extract_strided_slice %0 {offsets = [0, 2], sizes = [1024, 1], strides = [1, 1]} : vector<1024x3xf32> to vector<1024x1xf32>
    %17 = vector.extract_strided_slice %1 {offsets = [2, 0], sizes = [1, 128], strides = [1, 1]} : vector<3x128xf32> to vector<1x128xf32>
    %18 = vector.broadcast %16 : vector<1024x1xf32> to vector<1024x128xf32>
    %19 = vector.broadcast %17 : vector<1x128xf32> to vector<1024x128xf32>
    %20 = arith.mulf %18, %19 : vector<1024x128xf32>
    %21 = arith.addf %15, %20 : vector<1024x128xf32>
    %22 = arith.truncf %21 : vector<1024x128xf32> to vector<1024x128xbf16>
    %c0_5 = arith.constant 0 : index
    %c0_6 = arith.constant 0 : index
    %23 = vector.load %arg4[%c0_5, %c0_6] : memref<1024x128xbf16, #tpu.memory_space<vmem>>, vector<1024x128xbf16>
    tpu.vector_store %arg4[%c0_5, %c0_6], %22 {strides = array<i32>} : memref<1024x128xbf16, #tpu.memory_space<vmem>>, vector<1024x128xbf16>,
    return
  }
  func.func @transform_0(%arg0: i32) -> (i32, i32) {
    %c0_i32 = arith.constant 0 : i32
    %c0_i32_0 = arith.constant 0 : i32
    return %arg0, %c0_i32 : i32, i32
  }
  func.func @transform_1(%arg0: i32) -> (i32, i32) {
    %c0_i32 = arith.constant 0 : i32
    %c0_i32_0 = arith.constant 0 : i32
    %c0_i32_1 = arith.constant 0 : i32
    return %c0_i32, %c0_i32_0 : i32, i32
  }
  func.func @transform_2(%arg0: i32) -> (i32, i32) {
    %c0_i32 = arith.constant 0 : i32
    %c0_i32_0 = arith.constant 0 : i32
    %c0_i32_1 = arith.constant 0 : i32
    return %c0_i32, %c0_i32_0 : i32, i32
  }
  func.func @transform_3(%arg0: i32) -> (i32, i32) {
    %c0_i32 = arith.constant 0 : i32
    %c0_i32_0 = arith.constant 0 : i32
    return %arg0, %c0_i32 : i32, i32
  }
}

</mosaic_0001>

<bundles_post_ra>
// kernel: tpu_custom_call.1
= control target key start
LH: loop header
LB: loop body
LE: loop exit
PB: predicated region body
PF: predicated region fallthrough
CT: control target
= control target key end

     0   :  { %8 = vsyncpa [#allocation3], 0  ;;  %s6011_s0 = inlined_call_operand.vmem [shape: f32[2048,3], index: 0, kind: input, shape index: {}]   ;;  %s6012_s1 = inlined_call_operand.vmem [shape: f32[3,128], index: 1, kind: input, shape index: {}]   ;;  %s6013_s2 = inlined_call_operand.vmem [shape: f32[1,128], index: 2, kind: input, shape index: {}]   ;;  %s6014_s3 = inlined_call_operand.hbm [shape: bf16[2048,128], index: 3, kind: output, shape index: {}]  }
   0x1   :  { %10 = vsyncpa [#allocation3 + $0x1], 0  ;;  %s3743_s12 = smov 0   ;;  %s3745_s13 = smov 0  }
   0x2   :  { %s3747_s14 = smov 0   ;;  %s3749_s15 = smov 0  }
   0x3 LB: > { %s3764_s16 = sadd.s32 4294967295, %s3716_s15   ;;  %s3074_s17 = sadd.s32 4294967294, %s3716_s15   ;;  %s3716_s15 = sphi %s3749_s15, %s6661_s15   ;;  %s3712_s14 = sphi %s3747_s14, %s6660_s14   ;;  %s3708_s13 = sphi %s3745_s13, %s6659_s13   ;;  %s3704_s12 = sphi %s3743_s12, %s6658_s12  }
   0x4   : > { %s3768_s18 = sadd.s32 1, %s3716_s15   ;;  %s91_s19 = sadd.s32 1, %s3712_s14 }
   0x5   : > { %s88_s20 = ssub.s32 %s3716_s15, %s3768_s18  ;;  %p101_p0 = scmp.ne.s32.totalorder %s3712_s14, %s3708_s13 }
   0x6   : > { %p89_p1 = scmp.eq.s32.totalorder %s88_s20, 0  ;;  %p102_p2 = scmp.eq.s32.totalorder %s3764_s16, 1 }
   0x7   : > { %p107_p3 = scmp.ne.s32.totalorder %s3708_s13, %s3704_s12  ;;  %p108_p4 = scmp.eq.s32.totalorder %s3074_s17, 1 }
   0x8   : > { %s3779_s21 = scalar_select %p89_p1, %s3712_s14, %s91_s19  }
   0x9   : > { %p3781_p5 = por %p102_p2, %p101_p0  ;;  %p3785_p6 = por %p108_p4, %p107_p3 }
   0xa   : > { %p3077_p7 = scmp.ge.s32.totalorder %s3716_s15, 1  ;;  %p141_p8 = scmp.lt.s32.totalorder %s3716_s15, 3 }
   0xc   : > { %p142_p9 = pnand %p3077_p7, %p141_p8 }
   0xe   : > { %145 = sbr.rel (%p142_p9) target bundleno = 1177 (0x499), region = 32 }
  0x13   : > { %s3079_s24 = sshll.u32 %s3764_s16, 7  ;;  %v3718_v0 = vmov 0   ;;  %s162_s6 = sand.u32 1, %s3708_s13  }
  0x14   : > { %3516 = vset.pattern.permute.xlu2 %v3718_v0  ;;  %3515 = vset.pattern.permute.xlu1 %v3718_v0  ;;  %p166_p10 = scmp.lt.s32.totalorder %s3079_s24, 255  ;;  %s3078_s7 = sshll.u32 %s162_s6, 9 }
  0x15   : > { %3514 = vset.pattern.permute.xlu0 %v3718_v0  ;;  %s5038_s8 = scalar_lea.vmem [#allocation2], %s3078_s7  ;;  %s3086_s19 = sshll.u32 %s3764_s16, 9 }
  0x16   : > { %s6663_s24 = smov (!%p166_p10, %s3079_s24), 255  ;;  %s3009_s16 = sshll.u32 %s5038_s8, 4  ;;  %s3010_s16 = int_to_ptr.vmem [resolvable:$true] %s3009_s16 }
  0x17   : > { %s3080_s25 = sshll.u32 %s6663_s24, 3  ;;  %s2997_s27 = scalar_lea.sflag [#allocation3], %s162_s6 }
  0x18   : > { %s3795_s28 = scalar_lea.vmem %s6011_s0, %s3080_s25  ;;  %s3008_s25 = scalar_lea.hbm %s6014_s3, %s3086_s19 }
  0x19   : > { %v3798_v1 = vld [vmem:[%s3795_s28 + $0x20] sm:$0xff]  ;;  %v3801_v2 = vld [vmem:[%s3795_s28 + $0x10] sm:$0xff]  ;;  %v3810_v4 = vld [vmem:[%s3795_s28 + $0x28] sm:$0xff]  ;;  %s3011_s26 = sshll.u32 %s3008_s25, 4  ;;  %s3674_s5 = scalar_lea.hbm %s6014_s3, 1024  ;;  %s3012_s26 = int_to_ptr.hbm [resolvable:$true] %s3011_s26 }
  0x1a   : > { %v3804_v3 = vld [vmem:[%s3795_s28] sm:$0xff]  ;;  %323 = vperm.xlu2 %3516, %v3798_v1   ;;  %313 = vperm.xlu1 %3515, %v3801_v2   ;;  %v3813_v5 = vld [vmem:[%s3795_s28 + $0x18] sm:$0xff]  ;;  %v3816_v6 = vld [vmem:[%s3795_s28 + $0x8] sm:$0xff] }
  0x1b   : > { %303 = vperm.xlu0 %3514, %v3804_v3   ;;  %v3822_v7 = vld [vmem:[%s3795_s28 + $0x40] sm:$0xff]  ;;  %v3825_v8 = vld [vmem:[%s3795_s28 + $0x38] sm:$0xff]  ;;  %v3828_v9 = vld [vmem:[%s3795_s28 + $0x30] sm:$0xff] }
  0x1c   : > { %v3834_v10 = vld [vmem:[%s3795_s28 + $0x58] sm:$0xff]  ;;  %v3837_v11 = vld [vmem:[%s3795_s28 + $0x50] sm:$0xff]  ;;  %v3840_v12 = vld [vmem:[%s3795_s28 + $0x48] sm:$0xff] }
  0x1d   : > { %v3846_v13 = vld [vmem:[%s3795_s28 + $0x70] sm:$0xff]  ;;  %v3849_v14 = vld [vmem:[%s3795_s28 + $0x68] sm:$0xff]  ;;  %v3852_v15 = vld [vmem:[%s3795_s28 + $0x60] sm:$0xff] }
  0x1e   : > { %v3858_v16 = vld [vmem:[%s3795_s28 + $0x88] sm:$0xff]  ;;  %v3861_v17 = vld [vmem:[%s3795_s28 + $0x80] sm:$0xff]  ;;  %v3864_v18 = vld [vmem:[%s3795_s28 + $0x78] sm:$0xff] }
  0x1f   : > { %v3870_v19 = vld [vmem:[%s3795_s28 + $0xa0] sm:$0xff]  ;;  %v3873_v20 = vld [vmem:[%s3795_s28 + $0x98] sm:$0xff]  ;;  %v3876_v21 = vld [vmem:[%s3795_s28 + $0x90] sm:$0xff] }
  0x20   : > { %v3882_v22 = vld [vmem:[%s3795_s28 + $0xb8] sm:$0xff]  ;;  %v3885_v23 = vld [vmem:[%s3795_s28 + $0xb0] sm:$0xff]  ;;  %v3888_v24 = vld [vmem:[%s3795_s28 + $0xa8] sm:$0xff] }
  0x21   : > { %v3894_v25 = vld [vmem:[%s3795_s28 + $0xd0] sm:$0xff]  ;;  %v3897_v26 = vld [vmem:[%s3795_s28 + $0xc8] sm:$0xff]  ;;  %v3900_v27 = vld [vmem:[%s3795_s28 + $0xc0] sm:$0xff] }
  0x22   : > { %328 = vperm.xlu2 %3516, %v3810_v4   ;;  %318 = vperm.xlu1 %3515, %v3813_v5   ;;  %v3906_v28 = vld [vmem:[%s3795_s28 + $0xe8] sm:$0xff]  ;;  %v3909_v29 = vld [vmem:[%s3795_s28 + $0xe0] sm:$0xff]  ;;  %v3912_v30 = vld [vmem:[%s3795_s28 + $0xd8] sm:$0xff] }
  0x23   : > { %308 = vperm.xlu0 %3514, %v3816_v6   ;;  %v3918_v31 = vld [vmem:[%s3795_s28 + $0x100] sm:$0xff]  ;;  %v3921_v32 = vld [vmem:[%s3795_s28 + $0xf8] sm:$0xff]  ;;  %v3924_v33 = vld [vmem:[%s3795_s28 + $0xf0] sm:$0xff] }
  0x24   : > { %v3930_v34 = vld [vmem:[%s3795_s28 + $0x118] sm:$0xff]  ;;  %v3933_v35 = vld [vmem:[%s3795_s28 + $0x110] sm:$0xff]  ;;  %v3936_v36 = vld [vmem:[%s3795_s28 + $0x108] sm:$0xff] }
  0x25   : > { %v3944_v38 = vld [vmem:[%s3795_s28 + $0x130] sm:$0xff]  ;;  %v3947_v39 = vld [vmem:[%s3795_s28 + $0x128] sm:$0xff]  ;;  %v3950_v40 = vld [vmem:[%s3795_s28 + $0x120] sm:$0xff] }
  0x26   : > { %v3958_v42 = vld [vmem:[%s3795_s28 + $0x148] sm:$0xff]  ;;  %v3961_v43 = vld [vmem:[%s3795_s28 + $0x140] sm:$0xff]  ;;  %v3964_v44 = vld [vmem:[%s3795_s28 + $0x138] sm:$0xff] }
  0x27   : > { %v3972_v46 = vld [vmem:[%s3795_s28 + $0x160] sm:$0xff]  ;;  %v3975_v47 = vld [vmem:[%s3795_s28 + $0x158] sm:$0xff]  ;;  %v3978_v48 = vld [vmem:[%s3795_s28 + $0x150] sm:$0xff] }
  0x28   : > { %v3990_v52 = vld [vmem:[%s3795_s28 + $0x178] sm:$0xff]  ;;  %v3993_v53 = vld [vmem:[%s3795_s28 + $0x170] sm:$0xff]  ;;  %v3996_v54 = vld [vmem:[%s3795_s28 + $0x168] sm:$0xff] }
  0x29   : > { %v4008_v58 = vld [vmem:[%s3795_s28 + $0x190] sm:$0xff]  ;;  %v4011_v59 = vld [vmem:[%s3795_s28 + $0x188] sm:$0xff]  ;;  %v4014_v60 = vld [vmem:[%s3795_s28 + $0x180] sm:$0xff] }
  0x2a   : > { %343 = vperm.xlu2 %3516, %v3822_v7   ;;  %338 = vperm.xlu1 %3515, %v3825_v8   ;;  %v4026_v0 = vld [vmem:[%s3795_s28 + $0x1a8] sm:$0xff] }
  0x2b   : > { %333 = vperm.xlu0 %3514, %v3828_v9  }
  0x32   : > { %358 = vperm.xlu2 %3516, %v3834_v10   ;;  %353 = vperm.xlu1 %3515, %v3837_v11  }
  0x33   : > { %348 = vperm.xlu0 %3514, %v3840_v12  }
  0x3a   : > { %373 = vperm.xlu2 %3516, %v3846_v13   ;;  %368 = vperm.xlu1 %3515, %v3849_v14  }
  0x3b   : > { %363 = vperm.xlu0 %3514, %v3852_v15  }
  0x42   : > { %388 = vperm.xlu2 %3516, %v3858_v16   ;;  %383 = vperm.xlu1 %3515, %v3861_v17  }
  0x43   : > { %378 = vperm.xlu0 %3514, %v3864_v18  }
  0x4a   : > { %403 = vperm.xlu2 %3516, %v3870_v19   ;;  %398 = vperm.xlu1 %3515, %v3873_v20  }
  0x4b   : > { %393 = vperm.xlu0 %3514, %v3876_v21  }
  0x52   : > { %418 = vperm.xlu2 %3516, %v3882_v22   ;;  %413 = vperm.xlu1 %3515, %v3885_v23  }
  0x53   : > { %408 = vperm.xlu0 %3514, %v3888_v24  }
  0x5a   : > { %433 = vperm.xlu2 %3516, %v3894_v25   ;;  %428 = vperm.xlu1 %3515, %v3897_v26  }
  0x5b   : > { %423 = vperm.xlu0 %3514, %v3900_v27  }
  0x62   : > { %448 = vperm.xlu2 %3516, %v3906_v28   ;;  %443 = vperm.xlu1 %3515, %v3909_v29  }
  0x63   : > { %438 = vperm.xlu0 %3514, %v3912_v30  }
  0x6a   : > { %463 = vperm.xlu2 %3516, %v3918_v31   ;;  %458 = vperm.xlu1 %3515, %v3921_v32  }
  0x6b   : > { %453 = vperm.xlu0 %3514, %v3924_v33  }
  0x72   : > { %478 = vperm.xlu2 %3516, %v3930_v34   ;;  %473 = vperm.xlu1 %3515, %v3933_v35  }
  0x73   : > { %468 = vperm.xlu0 %3514, %v3936_v36  }
  0x74   : > { %v3941_v37 = vpop.permute.xlu2 %323 }
  0x75   : > { %6088 = vst [vmem:[#allocation5_spill] sm:$0xff] %v3941_v37  ;;  %v4050_v37 = vld [vmem:[%s3795_s28 + $0x1b0] sm:$0xff] }
  0x7a   : > { %493 = vperm.xlu2 %3516, %v3944_v38   ;;  %488 = vperm.xlu1 %3515, %v3947_v39  }
  0x7b   : > { %483 = vperm.xlu0 %3514, %v3950_v40  }
  0x7c   : > { %v3955_v41 = vpop.permute.xlu2 %328 }
  0x7d   : > { %6089 = vst [vmem:[#allocation6_spill] sm:$0xff] %v3955_v41  ;;  %v4047_v41 = vld [vmem:[%s3795_s28 + $0x1b8] sm:$0xff] }
  0x7e   : > { %6104 = vst [vmem:[#allocation21_spill] sm:$0xff] %v4047_v41 }
  0x82   : > { %508 = vperm.xlu2 %3516, %v3958_v42   ;;  %503 = vperm.xlu1 %3515, %v3961_v43  }
  0x83   : > { %498 = vperm.xlu0 %3514, %v3964_v44  }
  0x84   : > { %v3969_v45 = vpop.permute.xlu2 %343 }
  0x85   : > { %6090 = vst [vmem:[#allocation7_spill] sm:$0xff] %v3969_v45  ;;  %v4044_v45 = vld [vmem:[%s3795_s28 + $0x1c0] sm:$0xff] }
  0x86   : > { %6103 = vst [vmem:[#allocation20_spill] sm:$0xff] %v4044_v45 }
  0x8a   : > { %523 = vperm.xlu2 %3516, %v3972_v46   ;;  %518 = vperm.xlu1 %3515, %v3975_v47  }
  0x8b   : > { %513 = vperm.xlu0 %3514, %v3978_v48  }
  0x8c   : > { %v3983_v49 = vpop.permute.xlu2 %358  ;;  %v3985_v50 = vpop.permute.xlu1 %313 }
  0x8d   : > { %6091 = vst [vmem:[#allocation8_spill] sm:$0xff] %v3983_v49  ;;  %v3987_v51 = vpop.permute.xlu0 %303  ;;  %v4032_v49 = vld [vmem:[%s3795_s28 + $0x198] sm:$0xff] }
  0x8e   : > { %6092 = vst [vmem:[#allocation9_spill] sm:$0xff] %v3985_v50  ;;  %v4065_v50 = vld [vmem:[%s3795_s28 + $0x1d0] sm:$0xff] }
  0x8f   : > { %6093 = vst [vmem:[#allocation10_spill] sm:$0xff] %v3987_v51  ;;  %v4080_v51 = vld [vmem:[%s3795_s28 + $0x1f0] sm:$0xff] }
  0x90   : > { %6109 = vst [vmem:[#allocation26_spill] sm:$0xff] %v4065_v50 }
  0x91   : > { %6114 = vst [vmem:[#allocation31_spill] sm:$0xff] %v4080_v51 }
  0x92   : > { %538 = vperm.xlu2 %3516, %v3990_v52   ;;  %533 = vperm.xlu1 %3515, %v3993_v53  }
  0x93   : > { %528 = vperm.xlu0 %3514, %v3996_v54  }
  0x94   : > { %v4001_v55 = vpop.permute.xlu2 %373  ;;  %v4003_v56 = vpop.permute.xlu1 %318 }
  0x95   : > { %6094 = vst [vmem:[#allocation11_spill] sm:$0xff] %v4001_v55  ;;  %v4005_v57 = vpop.permute.xlu0 %308  ;;  %v4029_v55 = vld [vmem:[%s3795_s28 + $0x1a0] sm:$0xff] }
  0x96   : > { %6095 = vst [vmem:[#allocation12_spill] sm:$0xff] %v4003_v56  ;;  %v4062_v56 = vld [vmem:[%s3795_s28 + $0x1d8] sm:$0xff] }
  0x97   : > { %6096 = vst [vmem:[#allocation13_spill] sm:$0xff] %v4005_v57  ;;  %v4068_v57 = vld [vmem:[%s3795_s28 + $0x1c8] sm:$0xff] }
  0x98   : > { %6108 = vst [vmem:[#allocation25_spill] sm:$0xff] %v4062_v56 }
  0x99   : > { %6110 = vst [vmem:[#allocation27_spill] sm:$0xff] %v4068_v57 }
  0x9a   : > { %553 = vperm.xlu2 %3516, %v4008_v58   ;;  %548 = vperm.xlu1 %3515, %v4011_v59  }
  0x9b   : > { %543 = vperm.xlu0 %3514, %v4014_v60  }
  0x9c   : > { %v4019_v61 = vpop.permute.xlu2 %388  ;;  %v4021_v62 = vpop.permute.xlu1 %338 }
  0x9d   : > { %6097 = vst [vmem:[#allocation14_spill] sm:$0xff] %v4019_v61  ;;  %v4023_v63 = vpop.permute.xlu0 %333 }
  0x9e   : > { %6098 = vst [vmem:[#allocation15_spill] sm:$0xff] %v4021_v62 }
  0x9f   : > { %6099 = vst [vmem:[#allocation16_spill] sm:$0xff] %v4023_v63 }
  0xa2   : > { %568 = vperm.xlu2 %3516, %v4026_v0   ;;  %563 = vperm.xlu1 %3515, %v4029_v55  }
  0xa3   : > { %558 = vperm.xlu0 %3514, %v4032_v49  }
  0xa4   : > { %v4037_v61 = vpop.permute.xlu2 %403  ;;  %v4039_v62 = vpop.permute.xlu1 %353 }
  0xa5   : > { %6100 = vst [vmem:[#allocation17_spill] sm:$0xff] %v4037_v61  ;;  %v4041_v63 = vpop.permute.xlu0 %348 }
  0xa6   : > { %6101 = vst [vmem:[#allocation18_spill] sm:$0xff] %v4039_v62 }
  0xa7   : > { %6102 = vst [vmem:[#allocation19_spill] sm:$0xff] %v4041_v63 }
  0xaa   : > { %583 = vperm.xlu2 %3516, %v4044_v45   ;;  %578 = vperm.xlu1 %3515, %v4047_v41   ;;  %v4083_v45 = vld [vmem:[%s3795_s28 + $0x1e8] sm:$0xff]  ;;  %v4086_v41 = vld [vmem:[%s3795_s28 + $0x1e0] sm:$0xff] }
  0xab   : > { %573 = vperm.xlu0 %3514, %v4050_v37   ;;  %6115 = vst [vmem:[#allocation32_spill] sm:$0xff] %v4083_v45 }
  0xac   : > { %v4055_v61 = vpop.permute.xlu2 %418  ;;  %v4057_v62 = vpop.permute.xlu1 %368  ;;  %6116 = vst [vmem:[#allocation33_spill] sm:$0xff] %v4086_v41 }
  0xad   : > { %6105 = vst [vmem:[#allocation22_spill] sm:$0xff] %v4055_v61  ;;  %v4059_v63 = vpop.permute.xlu0 %363 }
  0xae   : > { %6106 = vst [vmem:[#allocation23_spill] sm:$0xff] %v4057_v62 }
  0xaf   : > { %6107 = vst [vmem:[#allocation24_spill] sm:$0xff] %v4059_v63 }
  0xb2   : > { %598 = vperm.xlu2 %3516, %v4062_v56   ;;  %593 = vperm.xlu1 %3515, %v4065_v50   ;;  %v4098_v56 = vld [vmem:[%s3795_s28 + $0x208] sm:$0xff]  ;;  %v4101_v50 = vld [vmem:[%s3795_s28 + $0x200] sm:$0xff] }
  0xb3   : > { %588 = vperm.xlu0 %3514, %v4068_v57   ;;  %6120 = vst [vmem:[#allocation37_spill] sm:$0xff] %v4098_v56  ;;  %v4104_v57 = vld [vmem:[%s3795_s28 + $0x1f8] sm:$0xff] }
  0xb4   : > { %v4073_v61 = vpop.permute.xlu2 %433  ;;  %v4075_v62 = vpop.permute.xlu1 %383  ;;  %6121 = vst [vmem:[#allocation38_spill] sm:$0xff] %v4101_v50 }
  0xb5   : > { %6111 = vst [vmem:[#allocation28_spill] sm:$0xff] %v4073_v61  ;;  %v4077_v63 = vpop.permute.xlu0 %378 }
  0xb6   : > { %6112 = vst [vmem:[#allocation29_spill] sm:$0xff] %v4075_v62 }
  0xb7   : > { %6113 = vst [vmem:[#allocation30_spill] sm:$0xff] %v4077_v63 }
  0xb8   : > { %6122 = vst [vmem:[#allocation39_spill] sm:$0xff] %v4104_v57 }
  0xba   : > { %613 = vperm.xlu2 %3516, %v4080_v51   ;;  %608 = vperm.xlu1 %3515, %v4083_v45   ;;  %v4116_v51 = vld [vmem:[%s3795_s28 + $0x220] sm:$0xff]  ;;  %v4119_v45 = vld [vmem:[%s3795_s28 + $0x218] sm:$0xff] }
  0xbb   : > { %603 = vperm.xlu0 %3514, %v4086_v41   ;;  %6126 = vst [vmem:[#allocation43_spill] sm:$0xff] %v4116_v51  ;;  %v4122_v41 = vld [vmem:[%s3795_s28 + $0x210] sm:$0xff] }
  0xbc   : > { %v4091_v61 = vpop.permute.xlu2 %448  ;;  %v4093_v62 = vpop.permute.xlu1 %398  ;;  %6127 = vst [vmem:[#allocation44_spill] sm:$0xff] %v4119_v45 }
  0xbd   : > { %6117 = vst [vmem:[#allocation34_spill] sm:$0xff] %v4091_v61  ;;  %v4095_v63 = vpop.permute.xlu0 %393 }
  0xbe   : > { %6118 = vst [vmem:[#allocation35_spill] sm:$0xff] %v4093_v62 }
  0xbf   : > { %6119 = vst [vmem:[#allocation36_spill] sm:$0xff] %v4095_v63 }
  0xc0   : > { %6128 = vst [vmem:[#allocation45_spill] sm:$0xff] %v4122_v41 }
  0xc2   : > { %628 = vperm.xlu2 %3516, %v4098_v56   ;;  %623 = vperm.xlu1 %3515, %v4101_v50   ;;  %v4134_v56 = vld [vmem:[%s3795_s28 + $0x238] sm:$0xff]  ;;  %v4137_v50 = vld [vmem:[%s3795_s28 + $0x230] sm:$0xff] }
  0xc3   : > { %618 = vperm.xlu0 %3514, %v4104_v57   ;;  %6132 = vst [vmem:[#allocation49_spill] sm:$0xff] %v4134_v56  ;;  %v4140_v57 = vld [vmem:[%s3795_s28 + $0x228] sm:$0xff] }
  0xc4   : > { %v4109_v61 = vpop.permute.xlu2 %463  ;;  %v4111_v62 = vpop.permute.xlu1 %413  ;;  %6133 = vst [vmem:[#allocation50_spill] sm:$0xff] %v4137_v50 }
  0xc5   : > { %6123 = vst [vmem:[#allocation40_spill] sm:$0xff] %v4109_v61  ;;  %v4113_v63 = vpop.permute.xlu0 %408 }
  0xc6   : > { %6124 = vst [vmem:[#allocation41_spill] sm:$0xff] %v4111_v62 }
  0xc7   : > { %6125 = vst [vmem:[#allocation42_spill] sm:$0xff] %v4113_v63 }
  0xc8   : > { %6134 = vst [vmem:[#allocation51_spill] sm:$0xff] %v4140_v57 }
  0xca   : > { %643 = vperm.xlu2 %3516, %v4116_v51   ;;  %638 = vperm.xlu1 %3515, %v4119_v45   ;;  %v4152_v51 = vld [vmem:[%s3795_s28 + $0x250] sm:$0xff]  ;;  %v4155_v45 = vld [vmem:[%s3795_s28 + $0x248] sm:$0xff] }
  0xcb   : > { %633 = vperm.xlu0 %3514, %v4122_v41   ;;  %6138 = vst [vmem:[#allocation55_spill] sm:$0xff] %v4152_v51  ;;  %v4158_v41 = vld [vmem:[%s3795_s28 + $0x240] sm:$0xff] }
  0xcc   : > { %v4127_v61 = vpop.permute.xlu2 %478  ;;  %v4129_v62 = vpop.permute.xlu1 %428  ;;  %6139 = vst [vmem:[#allocation56_spill] sm:$0xff] %v4155_v45 }
  0xcd   : > { %6129 = vst [vmem:[#allocation46_spill] sm:$0xff] %v4127_v61  ;;  %v4131_v63 = vpop.permute.xlu0 %423 }
  0xce   : > { %6130 = vst [vmem:[#allocation47_spill] sm:$0xff] %v4129_v62 }
  0xcf   : > { %6131 = vst [vmem:[#allocation48_spill] sm:$0xff] %v4131_v63 }
  0xd0   : > { %6140 = vst [vmem:[#allocation57_spill] sm:$0xff] %v4158_v41 }
  0xd2   : > { %658 = vperm.xlu2 %3516, %v4134_v56   ;;  %653 = vperm.xlu1 %3515, %v4137_v50   ;;  %v4170_v56 = vld [vmem:[%s3795_s28 + $0x268] sm:$0xff]  ;;  %v4173_v50 = vld [vmem:[%s3795_s28 + $0x260] sm:$0xff] }
  0xd3   : > { %648 = vperm.xlu0 %3514, %v4140_v57   ;;  %6144 = vst [vmem:[#allocation61_spill] sm:$0xff] %v4170_v56  ;;  %v4176_v57 = vld [vmem:[%s3795_s28 + $0x258] sm:$0xff] }
  0xd4   : > { %v4145_v61 = vpop.permute.xlu2 %493  ;;  %v4147_v62 = vpop.permute.xlu1 %443  ;;  %6145 = vst [vmem:[#allocation62_spill] sm:$0xff] %v4173_v50 }
  0xd5   : > { %6135 = vst [vmem:[#allocation52_spill] sm:$0xff] %v4145_v61  ;;  %v4149_v63 = vpop.permute.xlu0 %438 }
  0xd6   : > { %6136 = vst [vmem:[#allocation53_spill] sm:$0xff] %v4147_v62 }
  0xd7   : > { %6137 = vst [vmem:[#allocation54_spill] sm:$0xff] %v4149_v63 }
  0xd8   : > { %6146 = vst [vmem:[#allocation63_spill] sm:$0xff] %v4176_v57 }
  0xda   : > { %673 = vperm.xlu2 %3516, %v4152_v51   ;;  %668 = vperm.xlu1 %3515, %v4155_v45   ;;  %v4188_v51 = vld [vmem:[%s3795_s28 + $0x280] sm:$0xff]  ;;  %v4191_v45 = vld [vmem:[%s3795_s28 + $0x278] sm:$0xff] }
  0xdb   : > { %663 = vperm.xlu0 %3514, %v4158_v41   ;;  %6150 = vst [vmem:[#allocation67_spill] sm:$0xff] %v4188_v51  ;;  %v4194_v41 = vld [vmem:[%s3795_s28 + $0x270] sm:$0xff] }
  0xdc   : > { %v4163_v61 = vpop.permute.xlu2 %508  ;;  %v4165_v62 = vpop.permute.xlu1 %458  ;;  %6151 = vst [vmem:[#allocation68_spill] sm:$0xff] %v4191_v45 }
  0xdd   : > { %6141 = vst [vmem:[#allocation58_spill] sm:$0xff] %v4163_v61  ;;  %v4167_v63 = vpop.permute.xlu0 %453 }
  0xde   : > { %6142 = vst [vmem:[#allocation59_spill] sm:$0xff] %v4165_v62 }
  0xdf   : > { %6143 = vst [vmem:[#allocation60_spill] sm:$0xff] %v4167_v63 }
  0xe0   : > { %6152 = vst [vmem:[#allocation69_spill] sm:$0xff] %v4194_v41 }
  0xe2   : > { %688 = vperm.xlu2 %3516, %v4170_v56   ;;  %683 = vperm.xlu1 %3515, %v4173_v50   ;;  %v4206_v56 = vld [vmem:[%s3795_s28 + $0x298] sm:$0xff]  ;;  %v4209_v50 = vld [vmem:[%s3795_s28 + $0x290] sm:$0xff] }
  0xe3   : > { %678 = vperm.xlu0 %3514, %v4176_v57   ;;  %6156 = vst [vmem:[#allocation73_spill] sm:$0xff] %v4206_v56  ;;  %v4212_v57 = vld [vmem:[%s3795_s28 + $0x288] sm:$0xff] }
  0xe4   : > { %v4181_v61 = vpop.permute.xlu2 %523  ;;  %v4183_v62 = vpop.permute.xlu1 %473  ;;  %6157 = vst [vmem:[#allocation74_spill] sm:$0xff] %v4209_v50 }
  0xe5   : > { %6147 = vst [vmem:[#allocation64_spill] sm:$0xff] %v4181_v61  ;;  %v4185_v63 = vpop.permute.xlu0 %468 }
  0xe6   : > { %6148 = vst [vmem:[#allocation65_spill] sm:$0xff] %v4183_v62 }
  0xe7   : > { %6149 = vst [vmem:[#allocation66_spill] sm:$0xff] %v4185_v63 }
  0xe8   : > { %6158 = vst [vmem:[#allocation75_spill] sm:$0xff] %v4212_v57 }
  0xea   : > { %703 = vperm.xlu2 %3516, %v4188_v51   ;;  %698 = vperm.xlu1 %3515, %v4191_v45   ;;  %v4224_v51 = vld [vmem:[%s3795_s28 + $0x2b0] sm:$0xff]  ;;  %v4227_v45 = vld [vmem:[%s3795_s28 + $0x2a8] sm:$0xff] }
  0xeb   : > { %693 = vperm.xlu0 %3514, %v4194_v41   ;;  %6162 = vst [vmem:[#allocation79_spill] sm:$0xff] %v4224_v51  ;;  %v4230_v41 = vld [vmem:[%s3795_s28 + $0x2a0] sm:$0xff] }
  0xec   : > { %v4199_v61 = vpop.permute.xlu2 %538  ;;  %v4201_v62 = vpop.permute.xlu1 %488  ;;  %6163 = vst [vmem:[#allocation80_spill] sm:$0xff] %v4227_v45 }
  0xed   : > { %6153 = vst [vmem:[#allocation70_spill] sm:$0xff] %v4199_v61  ;;  %v4203_v63 = vpop.permute.xlu0 %483 }
  0xee   : > { %6154 = vst [vmem:[#allocation71_spill] sm:$0xff] %v4201_v62 }
  0xef   : > { %6155 = vst [vmem:[#allocation72_spill] sm:$0xff] %v4203_v63 }
  0xf0   : > { %6164 = vst [vmem:[#allocation81_spill] sm:$0xff] %v4230_v41 }
  0xf2   : > { %718 = vperm.xlu2 %3516, %v4206_v56   ;;  %713 = vperm.xlu1 %3515, %v4209_v50   ;;  %v4242_v56 = vld [vmem:[%s3795_s28 + $0x2c8] sm:$0xff]  ;;  %v4245_v50 = vld [vmem:[%s3795_s28 + $0x2c0] sm:$0xff] }
  0xf3   : > { %708 = vperm.xlu0 %3514, %v4212_v57   ;;  %6168 = vst [vmem:[#allocation85_spill] sm:$0xff] %v4242_v56  ;;  %v4248_v57 = vld [vmem:[%s3795_s28 + $0x2b8] sm:$0xff] }
  0xf4   : > { %v4217_v61 = vpop.permute.xlu2 %553  ;;  %v4219_v62 = vpop.permute.xlu1 %503  ;;  %6169 = vst [vmem:[#allocation86_spill] sm:$0xff] %v4245_v50 }
  0xf5   : > { %6159 = vst [vmem:[#allocation76_spill] sm:$0xff] %v4217_v61  ;;  %v4221_v63 = vpop.permute.xlu0 %498 }
  0xf6   : > { %6160 = vst [vmem:[#allocation77_spill] sm:$0xff] %v4219_v62 }
  0xf7   : > { %6161 = vst [vmem:[#allocation78_spill] sm:$0xff] %v4221_v63 }
  0xf8   : > { %6170 = vst [vmem:[#allocation87_spill] sm:$0xff] %v4248_v57 }
  0xfa   : > { %733 = vperm.xlu2 %3516, %v4224_v51   ;;  %728 = vperm.xlu1 %3515, %v4227_v45   ;;  %v4260_v51 = vld [vmem:[%s3795_s28 + $0x2e0] sm:$0xff]  ;;  %v4263_v45 = vld [vmem:[%s3795_s28 + $0x2d8] sm:$0xff] }
  0xfb   : > { %723 = vperm.xlu0 %3514, %v4230_v41   ;;  %6174 = vst [vmem:[#allocation91_spill] sm:$0xff] %v4260_v51  ;;  %v4266_v41 = vld [vmem:[%s3795_s28 + $0x2d0] sm:$0xff] }
  0xfc   : > { %v4235_v61 = vpop.permute.xlu2 %568  ;;  %v4237_v62 = vpop.permute.xlu1 %518  ;;  %6175 = vst [vmem:[#allocation92_spill] sm:$0xff] %v4263_v45 }
  0xfd   : > { %6165 = vst [vmem:[#allocation82_spill] sm:$0xff] %v4235_v61  ;;  %v4239_v63 = vpop.permute.xlu0 %513 }
  0xfe   : > { %6166 = vst [vmem:[#allocation83_spill] sm:$0xff] %v4237_v62 }
  0xff   : > { %6167 = vst [vmem:[#allocation84_spill] sm:$0xff] %v4239_v63 }
 0x100   : > { %6176 = vst [vmem:[#allocation93_spill] sm:$0xff] %v4266_v41 }
 0x102   : > { %748 = vperm.xlu2 %3516, %v4242_v56   ;;  %743 = vperm.xlu1 %3515, %v4245_v50   ;;  %v4278_v56 = vld [vmem:[%s3795_s28 + $0x2f8] sm:$0xff]  ;;  %v4281_v50 = vld [vmem:[%s3795_s28 + $0x2f0] sm:$0xff] }
 0x103   : > { %738 = vperm.xlu0 %3514, %v4248_v57   ;;  %6180 = vst [vmem:[#allocation97_spill] sm:$0xff] %v4278_v56  ;;  %v4284_v57 = vld [vmem:[%s3795_s28 + $0x2e8] sm:$0xff] }
 0x104   : > { %v4253_v61 = vpop.permute.xlu2 %583  ;;  %v4255_v62 = vpop.permute.xlu1 %533  ;;  %6181 = vst [vmem:[#allocation98_spill] sm:$0xff] %v4281_v50 }
 0x105   : > { %6171 = vst [vmem:[#allocation88_spill] sm:$0xff] %v4253_v61  ;;  %v4257_v63 = vpop.permute.xlu0 %528 }
 0x106   : > { %6172 = vst [vmem:[#allocation89_spill] sm:$0xff] %v4255_v62 }
 0x107   : > { %6173 = vst [vmem:[#allocation90_spill] sm:$0xff] %v4257_v63 }
 0x108   : > { %6182 = vst [vmem:[#allocation99_spill] sm:$0xff] %v4284_v57 }
 0x10a   : > { %763 = vperm.xlu2 %3516, %v4260_v51   ;;  %758 = vperm.xlu1 %3515, %v4263_v45   ;;  %v4296_v51 = vld [vmem:[%s3795_s28 + $0x310] sm:$0xff]  ;;  %v4299_v45 = vld [vmem:[%s3795_s28 + $0x308] sm:$0xff] }
 0x10b   : > { %753 = vperm.xlu0 %3514, %v4266_v41   ;;  %6186 = vst [vmem:[#allocation103_spill] sm:$0xff] %v4296_v51  ;;  %v4302_v41 = vld [vmem:[%s3795_s28 + $0x300] sm:$0xff] }
 0x10c   : > { %v4271_v61 = vpop.permute.xlu2 %598  ;;  %v4273_v62 = vpop.permute.xlu1 %548  ;;  %6187 = vst [vmem:[#allocation104_spill] sm:$0xff] %v4299_v45 }
 0x10d   : > { %6177 = vst [vmem:[#allocation94_spill] sm:$0xff] %v4271_v61  ;;  %v4275_v63 = vpop.permute.xlu0 %543 }
 0x10e   : > { %6178 = vst [vmem:[#allocation95_spill] sm:$0xff] %v4273_v62 }
 0x10f   : > { %6179 = vst [vmem:[#allocation96_spill] sm:$0xff] %v4275_v63 }
 0x110   : > { %6188 = vst [vmem:[#allocation105_spill] sm:$0xff] %v4302_v41 }
 0x112   : > { %778 = vperm.xlu2 %3516, %v4278_v56   ;;  %773 = vperm.xlu1 %3515, %v4281_v50   ;;  %v4314_v56 = vld [vmem:[%s3795_s28 + $0x328] sm:$0xff]  ;;  %v4317_v50 = vld [vmem:[%s3795_s28 + $0x320] sm:$0xff] }
 0x113   : > { %768 = vperm.xlu0 %3514, %v4284_v57   ;;  %6192 = vst [vmem:[#allocation109_spill] sm:$0xff] %v4314_v56  ;;  %v4320_v57 = vld [vmem:[%s3795_s28 + $0x318] sm:$0xff] }
 0x114   : > { %v4289_v61 = vpop.permute.xlu2 %613  ;;  %v4291_v62 = vpop.permute.xlu1 %563  ;;  %6193 = vst [vmem:[#allocation110_spill] sm:$0xff] %v4317_v50 }
 0x115   : > { %6183 = vst [vmem:[#allocation100_spill] sm:$0xff] %v4289_v61  ;;  %v4293_v63 = vpop.permute.xlu0 %558 }
 0x116   : > { %6184 = vst [vmem:[#allocation101_spill] sm:$0xff] %v4291_v62 }
 0x117   : > { %6185 = vst [vmem:[#allocation102_spill] sm:$0xff] %v4293_v63 }
 0x118   : > { %6194 = vst [vmem:[#allocation111_spill] sm:$0xff] %v4320_v57 }
 0x11a   : > { %793 = vperm.xlu2 %3516, %v4296_v51   ;;  %788 = vperm.xlu1 %3515, %v4299_v45   ;;  %v4332_v51 = vld [vmem:[%s3795_s28 + $0x340] sm:$0xff]  ;;  %v4335_v45 = vld [vmem:[%s3795_s28 + $0x338] sm:$0xff] }
 0x11b   : > { %783 = vperm.xlu0 %3514, %v4302_v41   ;;  %6198 = vst [vmem:[#allocation115_spill] sm:$0xff] %v4332_v51  ;;  %v4338_v41 = vld [vmem:[%s3795_s28 + $0x330] sm:$0xff] }
 0x11c   : > { %v4307_v61 = vpop.permute.xlu2 %628  ;;  %v4309_v62 = vpop.permute.xlu1 %578  ;;  %6199 = vst [vmem:[#allocation116_spill] sm:$0xff] %v4335_v45 }
 0x11d   : > { %6189 = vst [vmem:[#allocation106_spill] sm:$0xff] %v4307_v61  ;;  %v4311_v63 = vpop.permute.xlu0 %573 }
 0x11e   : > { %6190 = vst [vmem:[#allocation107_spill] sm:$0xff] %v4309_v62 }
 0x11f   : > { %6191 = vst [vmem:[#allocation108_spill] sm:$0xff] %v4311_v63 }
 0x120   : > { %6200 = vst [vmem:[#allocation117_spill] sm:$0xff] %v4338_v41 }
 0x122   : > { %808 = vperm.xlu2 %3516, %v4314_v56   ;;  %803 = vperm.xlu1 %3515, %v4317_v50   ;;  %v4350_v56 = vld [vmem:[%s3795_s28 + $0x358] sm:$0xff]  ;;  %v4353_v50 = vld [vmem:[%s3795_s28 + $0x350] sm:$0xff] }
 0x123   : > { %798 = vperm.xlu0 %3514, %v4320_v57   ;;  %6204 = vst [vmem:[#allocation121_spill] sm:$0xff] %v4350_v56  ;;  %v4356_v57 = vld [vmem:[%s3795_s28 + $0x348] sm:$0xff] }
 0x124   : > { %v4325_v61 = vpop.permute.xlu2 %643  ;;  %v4327_v62 = vpop.permute.xlu1 %593  ;;  %6205 = vst [vmem:[#allocation122_spill] sm:$0xff] %v4353_v50 }
 0x125   : > { %6195 = vst [vmem:[#allocation112_spill] sm:$0xff] %v4325_v61  ;;  %v4329_v63 = vpop.permute.xlu0 %588 }
 0x126   : > { %6196 = vst [vmem:[#allocation113_spill] sm:$0xff] %v4327_v62 }
 0x127   : > { %6197 = vst [vmem:[#allocation114_spill] sm:$0xff] %v4329_v63 }
 0x128   : > { %6206 = vst [vmem:[#allocation123_spill] sm:$0xff] %v4356_v57 }
 0x12a   : > { %823 = vperm.xlu2 %3516, %v4332_v51   ;;  %818 = vperm.xlu1 %3515, %v4335_v45   ;;  %v4368_v51 = vld [vmem:[%s3795_s28 + $0x370] sm:$0xff]  ;;  %v4371_v45 = vld [vmem:[%s3795_s28 + $0x368] sm:$0xff] }
 0x12b   : > { %813 = vperm.xlu0 %3514, %v4338_v41   ;;  %6210 = vst [vmem:[#allocation127_spill] sm:$0xff] %v4368_v51  ;;  %v4374_v41 = vld [vmem:[%s3795_s28 + $0x360] sm:$0xff] }
 0x12c   : > { %v4343_v61 = vpop.permute.xlu2 %658  ;;  %v4345_v62 = vpop.permute.xlu1 %608  ;;  %6211 = vst [vmem:[#allocation128_spill] sm:$0xff] %v4371_v45 }
 0x12d   : > { %6201 = vst [vmem:[#allocation118_spill] sm:$0xff] %v4343_v61  ;;  %v4347_v63 = vpop.permute.xlu0 %603 }
 0x12e   : > { %6202 = vst [vmem:[#allocation119_spill] sm:$0xff] %v4345_v62 }
 0x12f   : > { %6203 = vst [vmem:[#allocation120_spill] sm:$0xff] %v4347_v63 }
 0x130   : > { %6212 = vst [vmem:[#allocation129_spill] sm:$0xff] %v4374_v41 }
 0x132   : > { %838 = vperm.xlu2 %3516, %v4350_v56   ;;  %833 = vperm.xlu1 %3515, %v4353_v50   ;;  %v4386_v56 = vld [vmem:[%s3795_s28 + $0x388] sm:$0xff]  ;;  %v4389_v50 = vld [vmem:[%s3795_s28 + $0x380] sm:$0xff] }
 0x133   : > { %828 = vperm.xlu0 %3514, %v4356_v57   ;;  %6216 = vst [vmem:[#allocation133_spill] sm:$0xff] %v4386_v56  ;;  %v4392_v57 = vld [vmem:[%s3795_s28 + $0x378] sm:$0xff] }
 0x134   : > { %v4361_v61 = vpop.permute.xlu2 %673  ;;  %v4363_v62 = vpop.permute.xlu1 %623  ;;  %6217 = vst [vmem:[#allocation134_spill] sm:$0xff] %v4389_v50 }
 0x135   : > { %6207 = vst [vmem:[#allocation124_spill] sm:$0xff] %v4361_v61  ;;  %v4365_v63 = vpop.permute.xlu0 %618 }
 0x136   : > { %6208 = vst [vmem:[#allocation125_spill] sm:$0xff] %v4363_v62 }
 0x137   : > { %6209 = vst [vmem:[#allocation126_spill] sm:$0xff] %v4365_v63 }
 0x138   : > { %6218 = vst [vmem:[#allocation135_spill] sm:$0xff] %v4392_v57 }
 0x13a   : > { %853 = vperm.xlu2 %3516, %v4368_v51   ;;  %848 = vperm.xlu1 %3515, %v4371_v45   ;;  %v4404_v51 = vld [vmem:[%s3795_s28 + $0x3a0] sm:$0xff]  ;;  %v4407_v45 = vld [vmem:[%s3795_s28 + $0x398] sm:$0xff] }
 0x13b   : > { %843 = vperm.xlu0 %3514, %v4374_v41   ;;  %6222 = vst [vmem:[#allocation139_spill] sm:$0xff] %v4404_v51  ;;  %v4410_v41 = vld [vmem:[%s3795_s28 + $0x390] sm:$0xff] }
 0x13c   : > { %v4379_v61 = vpop.permute.xlu2 %688  ;;  %v4381_v62 = vpop.permute.xlu1 %638  ;;  %6223 = vst [vmem:[#allocation140_spill] sm:$0xff] %v4407_v45 }
 0x13d   : > { %6213 = vst [vmem:[#allocation130_spill] sm:$0xff] %v4379_v61  ;;  %v4383_v63 = vpop.permute.xlu0 %633 }
 0x13e   : > { %6214 = vst [vmem:[#allocation131_spill] sm:$0xff] %v4381_v62 }
 0x13f   : > { %6215 = vst [vmem:[#allocation132_spill] sm:$0xff] %v4383_v63 }
 0x140   : > { %6224 = vst [vmem:[#allocation141_spill] sm:$0xff] %v4410_v41 }
 0x142   : > { %868 = vperm.xlu2 %3516, %v4386_v56   ;;  %863 = vperm.xlu1 %3515, %v4389_v50   ;;  %v4422_v56 = vld [vmem:[%s3795_s28 + $0x3b8] sm:$0xff]  ;;  %v4425_v50 = vld [vmem:[%s3795_s28 + $0x3b0] sm:$0xff] }
 0x143   : > { %858 = vperm.xlu0 %3514, %v4392_v57   ;;  %6228 = vst [vmem:[#allocation145_spill] sm:$0xff] %v4422_v56  ;;  %v4428_v57 = vld [vmem:[%s3795_s28 + $0x3a8] sm:$0xff] }
 0x144   : > { %v4397_v61 = vpop.permute.xlu2 %703  ;;  %v4399_v62 = vpop.permute.xlu1 %653  ;;  %6229 = vst [vmem:[#allocation146_spill] sm:$0xff] %v4425_v50 }
 0x145   : > { %6219 = vst [vmem:[#allocation136_spill] sm:$0xff] %v4397_v61  ;;  %v4401_v63 = vpop.permute.xlu0 %648 }
 0x146   : > { %6220 = vst [vmem:[#allocation137_spill] sm:$0xff] %v4399_v62 }
 0x147   : > { %6221 = vst [vmem:[#allocation138_spill] sm:$0xff] %v4401_v63 }
 0x148   : > { %6230 = vst [vmem:[#allocation147_spill] sm:$0xff] %v4428_v57 }
 0x14a   : > { %883 = vperm.xlu2 %3516, %v4404_v51   ;;  %878 = vperm.xlu1 %3515, %v4407_v45   ;;  %v4440_v51 = vld [vmem:[%s3795_s28 + $0x3d0] sm:$0xff]  ;;  %v4443_v45 = vld [vmem:[%s3795_s28 + $0x3c8] sm:$0xff] }
 0x14b   : > { %873 = vperm.xlu0 %3514, %v4410_v41   ;;  %6234 = vst [vmem:[#allocation151_spill] sm:$0xff] %v4440_v51  ;;  %v4446_v41 = vld [vmem:[%s3795_s28 + $0x3c0] sm:$0xff] }
 0x14c   : > { %v4415_v61 = vpop.permute.xlu2 %718  ;;  %v4417_v62 = vpop.permute.xlu1 %668  ;;  %6235 = vst [vmem:[#allocation152_spill] sm:$0xff] %v4443_v45 }
 0x14d   : > { %6225 = vst [vmem:[#allocation142_spill] sm:$0xff] %v4415_v61  ;;  %v4419_v63 = vpop.permute.xlu0 %663 }
 0x14e   : > { %6226 = vst [vmem:[#allocation143_spill] sm:$0xff] %v4417_v62 }
 0x14f   : > { %6227 = vst [vmem:[#allocation144_spill] sm:$0xff] %v4419_v63 }
 0x150   : > { %6236 = vst [vmem:[#allocation153_spill] sm:$0xff] %v4446_v41 }
 0x152   : > { %898 = vperm.xlu2 %3516, %v4422_v56   ;;  %893 = vperm.xlu1 %3515, %v4425_v50   ;;  %v4461_v50 = vld [vmem:[%s3795_s28 + $0x3e0] sm:$0xff] }
 0x153   : > { %888 = vperm.xlu0 %3514, %v4428_v57   ;;  %6241 = vst [vmem:[#allocation158_spill] sm:$0xff] %v4461_v50  ;;  %v4464_v57 = vld [vmem:[%s3795_s28 + $0x3d8] sm:$0xff] }
 0x154   : > { %v4433_v61 = vpop.permute.xlu2 %733  ;;  %v4435_v62 = vpop.permute.xlu1 %683 }
 0x155   : > { %6231 = vst [vmem:[#allocation148_spill] sm:$0xff] %v4433_v61  ;;  %v4437_v63 = vpop.permute.xlu0 %678 }
 0x156   : > { %6232 = vst [vmem:[#allocation149_spill] sm:$0xff] %v4435_v62 }
 0x157   : > { %6233 = vst [vmem:[#allocation150_spill] sm:$0xff] %v4437_v63  ;;  %v4458_v63 = vld [vmem:[%s3795_s28 + $0x3e8] sm:$0xff] }
 0x158   : > { %6240 = vst [vmem:[#allocation157_spill] sm:$0xff] %v4458_v63 }
 0x15a   : > { %913 = vperm.xlu2 %3516, %v4440_v51   ;;  %908 = vperm.xlu1 %3515, %v4443_v45  }
 0x15b   : > { %903 = vperm.xlu0 %3514, %v4446_v41   ;;  %v3719_v41 = vmov 1  }
 0x15c   : > { %v4451_v56 = vpop.permute.xlu2 %748  ;;  %v4453_v61 = vpop.permute.xlu1 %698 }
 0x15d   : > { %6237 = vst [vmem:[#allocation154_spill] sm:$0xff] %v4451_v56  ;;  %v4455_v62 = vpop.permute.xlu0 %693 }
 0x15e   : > { %6238 = vst [vmem:[#allocation155_spill] sm:$0xff] %v4453_v61  ;;  %v4476_v61 = vld [vmem:[%s3795_s28 + $0x3f8] sm:$0xff] }
 0x15f   : > { %6239 = vst [vmem:[#allocation156_spill] sm:$0xff] %v4455_v62  ;;  %v4479_v62 = vld [vmem:[%s3795_s28 + $0x3f0] sm:$0xff] }
 0x160   : > { %6245 = vst [vmem:[#allocation162_spill] sm:$0xff] %v4476_v61 }
 0x162   : > { %928 = vperm.xlu2 %3516, %v4458_v63   ;;  %923 = vperm.xlu1 %3515, %v4461_v50  }
 0x163   : > { %918 = vperm.xlu0 %3514, %v4464_v57  }
 0x164   : > { %v4469_v51 = vpop.permute.xlu2 %763  ;;  %v4471_v45 = vpop.permute.xlu1 %713 }
 0x165   : > { %6242 = vst [vmem:[#allocation159_spill] sm:$0xff] %v4469_v51  ;;  %v4473_v56 = vpop.permute.xlu0 %708 }
 0x166   : > { %6243 = vst [vmem:[#allocation160_spill] sm:$0xff] %v4471_v45 }
 0x167   : > { %6244 = vst [vmem:[#allocation161_spill] sm:$0xff] %v4473_v56 }
 0x16a   : > { %3517 = vset.pattern.permute.xlu2 %v3719_v41  ;;  %938 = vperm.xlu1 %3515, %v4476_v61  }
 0x16b   : > { %933 = vperm.xlu0 %3514, %v4479_v62   ;;  %1203 = vperm.xlu2 %3517, %v3804_v3  }
 0x16c   : > { %v4484_v63 = vpop.permute.xlu2 %778  ;;  %v4486_v50 = vpop.permute.xlu1 %728 }
 0x16d   : > { %6246 = vst [vmem:[#allocation163_spill] sm:$0xff] %v4484_v63  ;;  %v4488_v51 = vpop.permute.xlu0 %723  ;;  %v6329_v63 = vld [vmem:[#allocation93_spill] sm:$0xff] }
 0x16e   : > { %6247 = vst [vmem:[#allocation164_spill] sm:$0xff] %v4486_v50  ;;  %v6341_v50 = vld [vmem:[#allocation105_spill] sm:$0xff] }
 0x16f   : > { %6248 = vst [vmem:[#allocation165_spill] sm:$0xff] %v4488_v51 }
 0x172   : > { %3519 = vset.pattern.permute.xlu1 %v3719_v41 }
 0x173   : > { %3518 = vset.pattern.permute.xlu0 %v3719_v41  ;;  %1211 = vperm.xlu1 %3519, %v3801_v2  }
 0x174   : > { %1215 = vperm.xlu2 %3517, %v3813_v5   ;;  %1207 = vperm.xlu0 %3518, %v3816_v6   ;;  %v4493_v45 = vpop.permute.xlu2 %793  ;;  %v4495_v56 = vpop.permute.xlu1 %743 }
 0x175   : > { %6249 = vst [vmem:[#allocation166_spill] sm:$0xff] %v4493_v45  ;;  %v4497_v61 = vpop.permute.xlu0 %738 }
 0x176   : > { %6250 = vst [vmem:[#allocation167_spill] sm:$0xff] %v4495_v56 }
 0x177   : > { %6251 = vst [vmem:[#allocation168_spill] sm:$0xff] %v4497_v61 }
 0x17b   : > { %1219 = vperm.xlu1 %3519, %v3798_v1  }
 0x17c   : > { %1223 = vperm.xlu2 %3517, %v3810_v4   ;;  %1227 = vperm.xlu0 %3518, %v3828_v9   ;;  %v4502_v3 = vpop.permute.xlu2 %808  ;;  %v4504_v41 = vpop.permute.xlu1 %758 }
 0x17d   : > { %6252 = vst [vmem:[#allocation169_spill] sm:$0xff] %v4502_v3  ;;  %v4506_v2 = vpop.permute.xlu0 %753  ;;  %v6318_v3 = vld [vmem:[#allocation81_spill] sm:$0xff] }
 0x17e   : > { %6253 = vst [vmem:[#allocation170_spill] sm:$0xff] %v4504_v41 }
 0x17f   : > { %6254 = vst [vmem:[#allocation171_spill] sm:$0xff] %v4506_v2 }
 0x183   : > { %1231 = vperm.xlu1 %3519, %v3825_v8  }
 0x184   : > { %1235 = vperm.xlu2 %3517, %v3822_v7   ;;  %1239 = vperm.xlu0 %3518, %v3840_v12   ;;  %v4511_v5 = vpop.permute.xlu2 %823  ;;  %v4513_v6 = vpop.permute.xlu1 %773 }
 0x185   : > { %6255 = vst [vmem:[#allocation172_spill] sm:$0xff] %v4511_v5  ;;  %v4515_v1 = vpop.permute.xlu0 %768 }
 0x186   : > { %6256 = vst [vmem:[#allocation173_spill] sm:$0xff] %v4513_v6 }
 0x187   : > { %6257 = vst [vmem:[#allocation174_spill] sm:$0xff] %v4515_v1  ;;  %v6335_v1 = vld [vmem:[#allocation99_spill] sm:$0xff] }
 0x18b   : > { %1243 = vperm.xlu1 %3519, %v3837_v11  }
 0x18c   : > { %1247 = vperm.xlu2 %3517, %v3834_v10   ;;  %1251 = vperm.xlu0 %3518, %v3852_v15   ;;  %v4520_v4 = vpop.permute.xlu2 %838  ;;  %v4522_v9 = vpop.permute.xlu1 %788 }
 0x18d   : > { %6258 = vst [vmem:[#allocation175_spill] sm:$0xff] %v4520_v4  ;;  %v4524_v8 = vpop.permute.xlu0 %783  ;;  %v6310_v4 = vld [vmem:[#allocation69_spill] sm:$0xff] }
 0x18e   : > { %6259 = vst [vmem:[#allocation176_spill] sm:$0xff] %v4522_v9 }
 0x18f   : > { %6260 = vst [vmem:[#allocation177_spill] sm:$0xff] %v4524_v8 }
 0x193   : > { %1255 = vperm.xlu1 %3519, %v3849_v14  }
 0x194   : > { %1259 = vperm.xlu2 %3517, %v3846_v13   ;;  %1263 = vperm.xlu0 %3518, %v3864_v18   ;;  %v4529_v7 = vpop.permute.xlu2 %853  ;;  %v4531_v12 = vpop.permute.xlu1 %803 }
 0x195   : > { %6261 = vst [vmem:[#allocation178_spill] sm:$0xff] %v4529_v7  ;;  %v4533_v11 = vpop.permute.xlu0 %798 }
 0x196   : > { %6262 = vst [vmem:[#allocation179_spill] sm:$0xff] %v4531_v12 }
 0x197   : > { %6263 = vst [vmem:[#allocation180_spill] sm:$0xff] %v4533_v11  ;;  %v6323_v11 = vld [vmem:[#allocation87_spill] sm:$0xff] }
 0x19b   : > { %1267 = vperm.xlu1 %3519, %v3861_v17  }
 0x19c   : > { %1271 = vperm.xlu2 %3517, %v3858_v16   ;;  %1275 = vperm.xlu0 %3518, %v3876_v21   ;;  %v4538_v10 = vpop.permute.xlu2 %868  ;;  %v4540_v15 = vpop.permute.xlu1 %818 }
 0x19d   : > { %6264 = vst [vmem:[#allocation181_spill] sm:$0xff] %v4538_v10  ;;  %v4542_v14 = vpop.permute.xlu0 %813  ;;  %v6304_v10 = vld [vmem:[#allocation57_spill] sm:$0xff] }
 0x19e   : > { %6265 = vst [vmem:[#allocation182_spill] sm:$0xff] %v4540_v15 }
 0x19f   : > { %6266 = vst [vmem:[#allocation183_spill] sm:$0xff] %v4542_v14 }
 0x1a3   : > { %1279 = vperm.xlu1 %3519, %v3873_v20  }
 0x1a4   : > { %1283 = vperm.xlu2 %3517, %v3870_v19   ;;  %1287 = vperm.xlu0 %3518, %v3888_v24   ;;  %v4547_v13 = vpop.permute.xlu2 %883  ;;  %v4549_v18 = vpop.permute.xlu1 %833 }
 0x1a5   : > { %6267 = vst [vmem:[#allocation184_spill] sm:$0xff] %v4547_v13  ;;  %v4551_v17 = vpop.permute.xlu0 %828 }
 0x1a6   : > { %6268 = vst [vmem:[#allocation185_spill] sm:$0xff] %v4549_v18 }
 0x1a7   : > { %6269 = vst [vmem:[#allocation186_spill] sm:$0xff] %v4551_v17  ;;  %v6314_v17 = vld [vmem:[#allocation75_spill] sm:$0xff] }
 0x1ab   : > { %1291 = vperm.xlu1 %3519, %v3885_v23  }
 0x1ac   : > { %1295 = vperm.xlu2 %3517, %v3882_v22   ;;  %1299 = vperm.xlu0 %3518, %v3900_v27   ;;  %v4556_v16 = vpop.permute.xlu2 %898  ;;  %v4558_v21 = vpop.permute.xlu1 %848 }
 0x1ad   : > { %6270 = vst [vmem:[#allocation187_spill] sm:$0xff] %v4556_v16  ;;  %v4560_v20 = vpop.permute.xlu0 %843  ;;  %v6298_v16 = vld [vmem:[#allocation45_spill] sm:$0xff] }
 0x1ae   : > { %6271 = vst [vmem:[#allocation188_spill] sm:$0xff] %v4558_v21 }
 0x1af   : > { %6272 = vst [vmem:[#allocation189_spill] sm:$0xff] %v4560_v20 }
 0x1b3   : > { %1303 = vperm.xlu1 %3519, %v3897_v26  }
 0x1b4   : > { %1307 = vperm.xlu2 %3517, %v3894_v25   ;;  %1311 = vperm.xlu0 %3518, %v3912_v30   ;;  %v4565_v19 = vpop.permute.xlu2 %913  ;;  %v4567_v24 = vpop.permute.xlu1 %863 }
 0x1b5   : > { %6273 = vst [vmem:[#allocation190_spill] sm:$0xff] %v4565_v19  ;;  %v4569_v23 = vpop.permute.xlu0 %858 }
 0x1b6   : > { %6274 = vst [vmem:[#allocation191_spill] sm:$0xff] %v4567_v24 }
 0x1b7   : > { %6275 = vst [vmem:[#allocation192_spill] sm:$0xff] %v4569_v23  ;;  %v6307_v23 = vld [vmem:[#allocation63_spill] sm:$0xff] }
 0x1bb   : > { %1315 = vperm.xlu1 %3519, %v3909_v29  }
 0x1bc   : > { %1319 = vperm.xlu2 %3517, %v3906_v28   ;;  %1323 = vperm.xlu0 %3518, %v3924_v33   ;;  %v4574_v22 = vpop.permute.xlu2 %928  ;;  %v4576_v27 = vpop.permute.xlu1 %878 }
 0x1bd   : > { %6276 = vst [vmem:[#allocation193_spill] sm:$0xff] %v4574_v22  ;;  %v4578_v26 = vpop.permute.xlu0 %873  ;;  %v6292_v22 = vld [vmem:[#allocation33_spill] sm:$0xff] }
 0x1be   : > { %6277 = vst [vmem:[#allocation194_spill] sm:$0xff] %v4576_v27 }
 0x1bf   : > { %6278 = vst [vmem:[#allocation195_spill] sm:$0xff] %v4578_v26 }
 0x1c3   : > { %1327 = vperm.xlu1 %3519, %v3921_v32  }
 0x1c4   : > { %1331 = vperm.xlu2 %3517, %v3918_v31   ;;  %1335 = vperm.xlu0 %3518, %v3936_v36   ;;  %v4583_v25 = vpop.permute.xlu1 %893 }
 0x1c5   : > { %6279 = vst [vmem:[#allocation196_spill] sm:$0xff] %v4583_v25  ;;  %v4585_v30 = vpop.permute.xlu0 %888  ;;  %v4587_v29 = vpop.permute.xlu2 %1203 }
 0x1c6   : > { %6280 = vst [vmem:[#allocation197_spill] sm:$0xff] %v4585_v30  ;;  %v6301_v30 = vld [vmem:[#allocation51_spill] sm:$0xff] }
 0x1cb   : > { %1339 = vperm.xlu1 %3519, %v3933_v35  }
 0x1cc   : > { %1343 = vperm.xlu2 %3517, %v3930_v34   ;;  %1347 = vperm.xlu0 %3518, %v3950_v40   ;;  %v4592_v28 = vpop.permute.xlu1 %908 }
 0x1cd   : > { %6281 = vst [vmem:[#allocation198_spill] sm:$0xff] %v4592_v28  ;;  %v4594_v33 = vpop.permute.xlu0 %903 }
 0x1ce   : > { %6282 = vst [vmem:[#allocation199_spill] sm:$0xff] %v4594_v33  ;;  %v4596_v32 = vpop.permute.xlu2 %1215 }
 0x1d3   : > { %1351 = vperm.xlu1 %3519, %v3947_v39  }
 0x1d4   : > { %1355 = vperm.xlu2 %3517, %v3944_v38   ;;  %1359 = vperm.xlu0 %3518, %v3964_v44   ;;  %v4601_v31 = vpop.permute.xlu1 %923 }
 0x1d5   : > { %6283 = vst [vmem:[#allocation200_spill] sm:$0xff] %v4601_v31  ;;  %v4603_v36 = vpop.permute.xlu0 %918 }
 0x1d6   : > { %6284 = vst [vmem:[#allocation201_spill] sm:$0xff] %v4603_v36  ;;  %v4605_v35 = vpop.permute.xlu2 %1223  ;;  %v6295_v36 = vld [vmem:[#allocation39_spill] sm:$0xff] }
 0x1db   : > { %1363 = vperm.xlu1 %3519, %v3961_v43  }
 0x1dc   : > { %1367 = vperm.xlu2 %3517, %v3958_v42   ;;  %1371 = vperm.xlu0 %3518, %v3978_v48   ;;  %v4610_v34 = vpop.permute.xlu1 %938 }
 0x1dd   : > { %6285 = vst [vmem:[#allocation202_spill] sm:$0xff] %v4610_v34  ;;  %v4612_v40 = vpop.permute.xlu0 %933 }
 0x1de   : > { %6286 = vst [vmem:[#allocation203_spill] sm:$0xff] %v4612_v40  ;;  %v4614_v39 = vpop.permute.xlu2 %1235  ;;  %v6289_v40 = vld [vmem:[#allocation27_spill] sm:$0xff] }
 0x1e3   : > { %1375 = vperm.xlu1 %3519, %v3975_v47  }
 0x1e4   : > { %1379 = vperm.xlu2 %3517, %v3972_v46   ;;  %1383 = vperm.xlu0 %3518, %v3996_v54  }
 0x1e5   : > { %v4619_v38 = vpop.permute.xlu1 %1211 }
 0x1e6   : > { %v4621_v44 = vpop.permute.xlu2 %1247  ;;  %v4623_v43 = vpop.permute.xlu0 %1207 }
 0x1eb   : > { %1387 = vperm.xlu1 %3519, %v3993_v53  }
 0x1ec   : > { %1391 = vperm.xlu2 %3517, %v3990_v52   ;;  %1395 = vperm.xlu0 %3518, %v4014_v60  }
 0x1ed   : > { %v4628_v42 = vpop.permute.xlu1 %1219 }
 0x1ee   : > { %v4630_v48 = vpop.permute.xlu2 %1259  ;;  %v4632_v47 = vpop.permute.xlu0 %1227 }
 0x1f3   : > { %1399 = vperm.xlu1 %3519, %v4011_v59  }
 0x1f4   : > { %1403 = vperm.xlu2 %3517, %v4008_v58   ;;  %1407 = vperm.xlu0 %3518, %v4032_v49   ;;  %v6287_v58 = vld [vmem:[#allocation21_spill] sm:$0xff]  ;;  %v6288_v49 = vld [vmem:[#allocation20_spill] sm:$0xff] }
 0x1f5   : > { %v4637_v46 = vpop.permute.xlu1 %1231 }
 0x1f6   : > { %v4639_v54 = vpop.permute.xlu2 %1271  ;;  %v4641_v53 = vpop.permute.xlu0 %1239 }
 0x1fb   : > { %1411 = vperm.xlu1 %3519, %v4029_v55  }
 0x1fc   : > { %1415 = vperm.xlu2 %3517, %v4026_v0   ;;  %1419 = vperm.xlu0 %3518, %v4050_v37   ;;  %v6290_v0 = vld [vmem:[#allocation26_spill] sm:$0xff]  ;;  %v6291_v37 = vld [vmem:[#allocation25_spill] sm:$0xff] }
 0x1fd   : > { %v4646_v52 = vpop.permute.xlu1 %1243 }
 0x1fe   : > { %v4648_v60 = vpop.permute.xlu2 %1283  ;;  %v4650_v59 = vpop.permute.xlu0 %1251 }
 0x203   : > { %1423 = vperm.xlu1 %3519, %v6287_v58  }
 0x204   : > { %1427 = vperm.xlu2 %3517, %v6288_v49   ;;  %1431 = vperm.xlu0 %3518, %v6289_v40   ;;  %v6293_v49 = vld [vmem:[#allocation32_spill] sm:$0xff]  ;;  %v6294_v40 = vld [vmem:[#allocation31_spill] sm:$0xff] }
 0x205   : > { %v4655_v34 = vpop.permute.xlu1 %1255 }
 0x206   : > { %v4657_v31 = vpop.permute.xlu2 %1295  ;;  %v4659_v55 = vpop.permute.xlu0 %1263 }
 0x20b   : > { %1435 = vperm.xlu1 %3519, %v6290_v0  }
 0x20c   : > { %1439 = vperm.xlu2 %3517, %v6291_v37   ;;  %1443 = vperm.xlu0 %3518, %v6292_v22   ;;  %v6296_v37 = vld [vmem:[#allocation38_spill] sm:$0xff]  ;;  %v6297_v22 = vld [vmem:[#allocation37_spill] sm:$0xff] }
 0x20d   : > { %v4664_v33 = vpop.permute.xlu1 %1267 }
 0x20e   : > { %v4666_v28 = vpop.permute.xlu2 %1307  ;;  %v4668_v58 = vpop.permute.xlu0 %1275 }
 0x213   : > { %1447 = vperm.xlu1 %3519, %v6293_v49  }
 0x214   : > { %1451 = vperm.xlu2 %3517, %v6294_v40   ;;  %1455 = vperm.xlu0 %3518, %v6295_v36   ;;  %v6299_v40 = vld [vmem:[#allocation44_spill] sm:$0xff]  ;;  %v6300_v36 = vld [vmem:[#allocation43_spill] sm:$0xff] }
 0x215   : > { %v4673_v19 = vpop.permute.xlu1 %1279 }
 0x216   : > { %v4675_v25 = vpop.permute.xlu2 %1319  ;;  %v4677_v0 = vpop.permute.xlu0 %1287 }
 0x21b   : > { %1459 = vperm.xlu1 %3519, %v6296_v37  }
 0x21c   : > { %1463 = vperm.xlu2 %3517, %v6297_v22   ;;  %1467 = vperm.xlu0 %3518, %v6298_v16   ;;  %v6302_v22 = vld [vmem:[#allocation50_spill] sm:$0xff]  ;;  %v6303_v16 = vld [vmem:[#allocation49_spill] sm:$0xff] }
 0x21d   : > { %v4682_v26 = vpop.permute.xlu1 %1291 }
 0x21e   : > { %v4684_v27 = vpop.permute.xlu2 %1331  ;;  %v4686_v49 = vpop.permute.xlu0 %1299 }
 0x223   : > { %1471 = vperm.xlu1 %3519, %v6299_v40  }
 0x224   : > { %1475 = vperm.xlu2 %3517, %v6300_v36   ;;  %1479 = vperm.xlu0 %3518, %v6301_v30   ;;  %v6305_v36 = vld [vmem:[#allocation56_spill] sm:$0xff]  ;;  %v6306_v30 = vld [vmem:[#allocation55_spill] sm:$0xff] }
 0x225   : > { %v4691_v13 = vpop.permute.xlu1 %1303 }
 0x226   : > { %v4693_v24 = vpop.permute.xlu2 %1343  ;;  %v4695_v37 = vpop.permute.xlu0 %1311 }
 0x22b   : > { %1483 = vperm.xlu1 %3519, %v6302_v22  }
 0x22c   : > { %1487 = vperm.xlu2 %3517, %v6303_v16   ;;  %1491 = vperm.xlu0 %3518, %v6304_v10   ;;  %v6308_v16 = vld [vmem:[#allocation62_spill] sm:$0xff]  ;;  %v6309_v10 = vld [vmem:[#allocation61_spill] sm:$0xff] }
 0x22d   : > { %v4700_v20 = vpop.permute.xlu1 %1315 }
 0x22e   : > { %v4702_v21 = vpop.permute.xlu2 %1355  ;;  %v4704_v40 = vpop.permute.xlu0 %1323 }
 0x233   : > { %1495 = vperm.xlu1 %3519, %v6305_v36  }
 0x234   : > { %1499 = vperm.xlu2 %3517, %v6306_v30   ;;  %1503 = vperm.xlu0 %3518, %v6307_v23   ;;  %v6312_v30 = vld [vmem:[#allocation68_spill] sm:$0xff]  ;;  %v6313_v23 = vld [vmem:[#allocation67_spill] sm:$0xff] }
 0x235   : > { %v4709_v7 = vpop.permute.xlu1 %1327 }
 0x236   : > { %v4711_v18 = vpop.permute.xlu2 %1367  ;;  %v4713_v22 = vpop.permute.xlu0 %1335 }
 0x23b   : > { %1507 = vperm.xlu1 %3519, %v6308_v16  }
 0x23c   : > { %1511 = vperm.xlu2 %3517, %v6309_v10   ;;  %1515 = vperm.xlu0 %3518, %v6310_v4   ;;  %v6316_v10 = vld [vmem:[#allocation74_spill] sm:$0xff]  ;;  %v6317_v4 = vld [vmem:[#allocation73_spill] sm:$0xff] }
 0x23d   : > { %v4718_v14 = vpop.permute.xlu1 %1339 }
 0x23e   : > { %v4720_v15 = vpop.permute.xlu2 %1379  ;;  %v4722_v36 = vpop.permute.xlu0 %1347 }
 0x23f   : > { %6311 = vst [vmem:[#allocation21_spill] sm:$0xff] %v4720_v15  ;;  %v3569_v15 = vld [vmem:[%s3795_s28 + $0x160] sm:$0xff] }
 0x243   : > { %1519 = vperm.xlu1 %3519, %v6312_v30  }
 0x244   : > { %1523 = vperm.xlu2 %3517, %v6313_v23   ;;  %1527 = vperm.xlu0 %3518, %v6314_v17   ;;  %v6321_v23 = vld [vmem:[#allocation80_spill] sm:$0xff]  ;;  %v6322_v17 = vld [vmem:[#allocation79_spill] sm:$0xff] }
 0x245   : > { %v4727_v5 = vpop.permute.xlu1 %1351 }
 0x246   : > { %v4729_v12 = vpop.permute.xlu2 %1391  ;;  %v4731_v16 = vpop.permute.xlu0 %1359 }
 0x247   : > { %6315 = vst [vmem:[#allocation20_spill] sm:$0xff] %v4729_v12 }
 0x24b   : > { %1531 = vperm.xlu1 %3519, %v6316_v10  }
 0x24c   : > { %1535 = vperm.xlu2 %3517, %v6317_v4   ;;  %1539 = vperm.xlu0 %3518, %v6318_v3   ;;  %v6327_v4 = vld [vmem:[#allocation86_spill] sm:$0xff]  ;;  %v6328_v3 = vld [vmem:[#allocation85_spill] sm:$0xff] }
 0x24d   : > { %v4736_v8 = vpop.permute.xlu1 %1363 }
 0x24e   : > { %v4738_v9 = vpop.permute.xlu2 %1403  ;;  %v4740_v30 = vpop.permute.xlu0 %1371 }
 0x24f   : > { %6319 = vst [vmem:[#allocation27_spill] sm:$0xff] %v4738_v9  ;;  %v3567_v9 = vld [vmem:[%s3795_s28 + $0x168] sm:$0xff] }
 0x250   : > { %6320 = vst [vmem:[#allocation26_spill] sm:$0xff] %v4740_v30 }
 0x253   : > { %1543 = vperm.xlu1 %3519, %v6321_v23  }
 0x254   : > { %1547 = vperm.xlu2 %3517, %v6322_v17   ;;  %1551 = vperm.xlu0 %3518, %v6323_v11   ;;  %v6333_v17 = vld [vmem:[#allocation92_spill] sm:$0xff]  ;;  %v6334_v11 = vld [vmem:[#allocation91_spill] sm:$0xff] }
 0x255   : > { %v4745_v45 = vpop.permute.xlu1 %1375 }
 0x256   : > { %6324 = vst [vmem:[#allocation25_spill] sm:$0xff] %v4745_v45  ;;  %v4747_v6 = vpop.permute.xlu2 %1415  ;;  %v4749_v10 = vpop.permute.xlu0 %1383 }
 0x257   : > { %6325 = vst [vmem:[#allocation33_spill] sm:$0xff] %v4747_v6  ;;  %v6347_v6 = vld [vmem:[#allocation111_spill] sm:$0xff] }
 0x258   : > { %6326 = vst [vmem:[#allocation32_spill] sm:$0xff] %v4749_v10 }
 0x25b   : > { %1555 = vperm.xlu1 %3519, %v6327_v4  }
 0x25c   : > { %1559 = vperm.xlu2 %3517, %v6328_v3   ;;  %1563 = vperm.xlu0 %3518, %v6329_v63   ;;  %v6339_v3 = vld [vmem:[#allocation98_spill] sm:$0xff]  ;;  %v6340_v63 = vld [vmem:[#allocation97_spill] sm:$0xff] }
 0x25d   : > { %v4754_v2 = vpop.permute.xlu1 %1387 }
 0x25e   : > { %6330 = vst [vmem:[#allocation31_spill] sm:$0xff] %v4754_v2  ;;  %v4756_v41 = vpop.permute.xlu2 %1427  ;;  %v4758_v23 = vpop.permute.xlu0 %1395 }
 0x25f   : > { %6331 = vst [vmem:[#allocation39_spill] sm:$0xff] %v4756_v41 }
 0x260   : > { %6332 = vst [vmem:[#allocation38_spill] sm:$0xff] %v4758_v23 }
 0x263   : > { %1567 = vperm.xlu1 %3519, %v6333_v17  }
 0x264   : > { %1571 = vperm.xlu2 %3517, %v6334_v11   ;;  %1575 = vperm.xlu0 %3518, %v6335_v1   ;;  %v6345_v11 = vld [vmem:[#allocation104_spill] sm:$0xff]  ;;  %v6346_v1 = vld [vmem:[#allocation103_spill] sm:$0xff] }
 0x265   : > { %v4763_v56 = vpop.permute.xlu1 %1399 }
 0x266   : > { %6336 = vst [vmem:[#allocation37_spill] sm:$0xff] %v4763_v56  ;;  %v4765_v51 = vpop.permute.xlu2 %1439  ;;  %v4767_v4 = vpop.permute.xlu0 %1407 }
 0x267   : > { %6337 = vst [vmem:[#allocation45_spill] sm:$0xff] %v4765_v51 }
 0x268   : > { %6338 = vst [vmem:[#allocation44_spill] sm:$0xff] %v4767_v4  ;;  %v3565_v4 = vld [vmem:[%s3795_s28 + $0x140] sm:$0xff] }
 0x26b   : > { %1579 = vperm.xlu1 %3519, %v6339_v3  }
 0x26c   : > { %1583 = vperm.xlu2 %3517, %v6340_v63   ;;  %1587 = vperm.xlu0 %3518, %v6341_v50   ;;  %v6351_v63 = vld [vmem:[#allocation110_spill] sm:$0xff]  ;;  %v6352_v50 = vld [vmem:[#allocation109_spill] sm:$0xff] }
 0x26d   : > { %v4772_v61 = vpop.permute.xlu1 %1411 }
 0x26e   : > { %6342 = vst [vmem:[#allocation43_spill] sm:$0xff] %v4772_v61  ;;  %v4774_v41 = vpop.permute.xlu2 %1451  ;;  %v4776_v17 = vpop.permute.xlu0 %1419  ;;  %v6353_v61 = vld [vmem:[#allocation117_spill] sm:$0xff] }
 0x26f   : > { %6343 = vst [vmem:[#allocation51_spill] sm:$0xff] %v4774_v41 }
 0x270   : > { %6344 = vst [vmem:[#allocation50_spill] sm:$0xff] %v4776_v17 }
 0x273   : > { %1591 = vperm.xlu1 %3519, %v6345_v11  }
 0x274   : > { %1595 = vperm.xlu2 %3517, %v6346_v1   ;;  %1599 = vperm.xlu0 %3518, %v6347_v6   ;;  %v6357_v1 = vld [vmem:[#allocation116_spill] sm:$0xff]  ;;  %v6358_v6 = vld [vmem:[#allocation115_spill] sm:$0xff] }
 0x275   : > { %v4781_v51 = vpop.permute.xlu1 %1423 }
 0x276   : > { %6348 = vst [vmem:[#allocation49_spill] sm:$0xff] %v4781_v51  ;;  %v4783_v56 = vpop.permute.xlu2 %1463  ;;  %v4785_v3 = vpop.permute.xlu0 %1431  ;;  %v6359_v51 = vld [vmem:[#allocation123_spill] sm:$0xff] }
 0x277   : > { %6349 = vst [vmem:[#allocation57_spill] sm:$0xff] %v4783_v56 }
 0x278   : > { %6350 = vst [vmem:[#allocation56_spill] sm:$0xff] %v4785_v3 }
 0x27b   : > { %1603 = vperm.xlu1 %3519, %v6351_v63  }
 0x27c   : > { %1607 = vperm.xlu2 %3517, %v6352_v50   ;;  %1611 = vperm.xlu0 %3518, %v6353_v61   ;;  %v6363_v50 = vld [vmem:[#allocation122_spill] sm:$0xff]  ;;  %v6364_v61 = vld [vmem:[#allocation121_spill] sm:$0xff] }
 0x27d   : > { %v4790_v41 = vpop.permute.xlu1 %1435 }
 0x27e   : > { %6354 = vst [vmem:[#allocation55_spill] sm:$0xff] %v4790_v41  ;;  %v4792_v17 = vpop.permute.xlu2 %1475  ;;  %v4794_v11 = vpop.permute.xlu0 %1443  ;;  %v6365_v41 = vld [vmem:[#allocation129_spill] sm:$0xff] }
 0x27f   : > { %6355 = vst [vmem:[#allocation63_spill] sm:$0xff] %v4792_v17 }
 0x280   : > { %6356 = vst [vmem:[#allocation62_spill] sm:$0xff] %v4794_v11 }
 0x283   : > { %1615 = vperm.xlu1 %3519, %v6357_v1  }
 0x284   : > { %1619 = vperm.xlu2 %3517, %v6358_v6   ;;  %1623 = vperm.xlu0 %3518, %v6359_v51   ;;  %v6369_v6 = vld [vmem:[#allocation128_spill] sm:$0xff]  ;;  %v6370_v51 = vld [vmem:[#allocation127_spill] sm:$0xff] }
 0x285   : > { %v4799_v56 = vpop.permute.xlu1 %1447 }
 0x286   : > { %6360 = vst [vmem:[#allocation61_spill] sm:$0xff] %v4799_v56  ;;  %v4801_v3 = vpop.permute.xlu2 %1487  ;;  %v4803_v63 = vpop.permute.xlu0 %1455  ;;  %v6371_v56 = vld [vmem:[#allocation135_spill] sm:$0xff] }
 0x287   : > { %6361 = vst [vmem:[#allocation69_spill] sm:$0xff] %v4801_v3 }
 0x288   : > { %6362 = vst [vmem:[#allocation68_spill] sm:$0xff] %v4803_v63 }
 0x28b   : > { %1627 = vperm.xlu1 %3519, %v6363_v50  }
 0x28c   : > { %1631 = vperm.xlu2 %3517, %v6364_v61   ;;  %1635 = vperm.xlu0 %3518, %v6365_v41   ;;  %v6375_v61 = vld [vmem:[#allocation134_spill] sm:$0xff]  ;;  %v6376_v41 = vld [vmem:[#allocation133_spill] sm:$0xff] }
 0x28d   : > { %v4808_v17 = vpop.permute.xlu1 %1459 }
 0x28e   : > { %6366 = vst [vmem:[#allocation67_spill] sm:$0xff] %v4808_v17  ;;  %v4810_v11 = vpop.permute.xlu2 %1499  ;;  %v4812_v1 = vpop.permute.xlu0 %1467  ;;  %v6377_v17 = vld [vmem:[#allocation141_spill] sm:$0xff] }
 0x28f   : > { %6367 = vst [vmem:[#allocation75_spill] sm:$0xff] %v4810_v11 }
 0x290   : > { %6368 = vst [vmem:[#allocation74_spill] sm:$0xff] %v4812_v1 }
 0x293   : > { %1639 = vperm.xlu1 %3519, %v6369_v6  }
 0x294   : > { %1643 = vperm.xlu2 %3517, %v6370_v51   ;;  %1647 = vperm.xlu0 %3518, %v6371_v56   ;;  %v6381_v51 = vld [vmem:[#allocation140_spill] sm:$0xff]  ;;  %v6382_v56 = vld [vmem:[#allocation139_spill] sm:$0xff] }
 0x295   : > { %v4817_v3 = vpop.permute.xlu1 %1471 }
 0x296   : > { %6372 = vst [vmem:[#allocation73_spill] sm:$0xff] %v4817_v3  ;;  %v4819_v63 = vpop.permute.xlu2 %1511  ;;  %v4821_v50 = vpop.permute.xlu0 %1479  ;;  %v6383_v3 = vld [vmem:[#allocation147_spill] sm:$0xff] }
 0x297   : > { %6373 = vst [vmem:[#allocation81_spill] sm:$0xff] %v4819_v63 }
 0x298   : > { %6374 = vst [vmem:[#allocation80_spill] sm:$0xff] %v4821_v50 }
 0x29b   : > { %1651 = vperm.xlu1 %3519, %v6375_v61  }
 0x29c   : > { %1655 = vperm.xlu2 %3517, %v6376_v41   ;;  %1659 = vperm.xlu0 %3518, %v6377_v17   ;;  %v6387_v41 = vld [vmem:[#allocation146_spill] sm:$0xff]  ;;  %v6388_v17 = vld [vmem:[#allocation145_spill] sm:$0xff] }
 0x29d   : > { %v4826_v11 = vpop.permute.xlu1 %1483 }
 0x29e   : > { %6378 = vst [vmem:[#allocation79_spill] sm:$0xff] %v4826_v11  ;;  %v4828_v1 = vpop.permute.xlu2 %1523  ;;  %v4830_v6 = vpop.permute.xlu0 %1491  ;;  %v6389_v11 = vld [vmem:[#allocation153_spill] sm:$0xff] }
 0x29f   : > { %6379 = vst [vmem:[#allocation87_spill] sm:$0xff] %v4828_v1 }
 0x2a0   : > { %6380 = vst [vmem:[#allocation86_spill] sm:$0xff] %v4830_v6 }
 0x2a3   : > { %1663 = vperm.xlu1 %3519, %v6381_v51  }
 0x2a4   : > { %1667 = vperm.xlu2 %3517, %v6382_v56   ;;  %1671 = vperm.xlu0 %3518, %v6383_v3   ;;  %v6393_v56 = vld [vmem:[#allocation152_spill] sm:$0xff]  ;;  %v6394_v3 = vld [vmem:[#allocation151_spill] sm:$0xff] }
 0x2a5   : > { %v4835_v63 = vpop.permute.xlu1 %1495 }
 0x2a6   : > { %6384 = vst [vmem:[#allocation85_spill] sm:$0xff] %v4835_v63  ;;  %v4837_v50 = vpop.permute.xlu2 %1535  ;;  %v4839_v61 = vpop.permute.xlu0 %1503 }
 0x2a7   : > { %6385 = vst [vmem:[#allocation93_spill] sm:$0xff] %v4837_v50 }
 0x2a8   : > { %6386 = vst [vmem:[#allocation92_spill] sm:$0xff] %v4839_v61  ;;  %v6444_v61 = vld [vmem:[#allocation13_spill] sm:$0xff] }
 0x2ab   : > { %1675 = vperm.xlu1 %3519, %v6387_v41  }
 0x2ac   : > { %1679 = vperm.xlu2 %3517, %v6388_v17   ;;  %1683 = vperm.xlu0 %3518, %v6389_v11   ;;  %v6398_v11 = vld [vmem:[#allocation158_spill] sm:$0xff] }
 0x2ad   : > { %v4844_v1 = vpop.permute.xlu1 %1507 }
 0x2ae   : > { %6390 = vst [vmem:[#allocation91_spill] sm:$0xff] %v4844_v1  ;;  %v4846_v6 = vpop.permute.xlu2 %1547  ;;  %v4848_v51 = vpop.permute.xlu0 %1515  ;;  %v6399_v1 = vld [vmem:[#allocation157_spill] sm:$0xff] }
 0x2af   : > { %6391 = vst [vmem:[#allocation99_spill] sm:$0xff] %v4846_v6 }
 0x2b0   : > { %6392 = vst [vmem:[#allocation98_spill] sm:$0xff] %v4848_v51  ;;  %v3530_v51 = vld [vmem:[%s3795_s28 + $0x28] sm:$0xff] }
 0x2b3   : > { %1687 = vperm.xlu1 %3519, %v6393_v56  }
 0x2b4   : > { %1691 = vperm.xlu2 %3517, %v6394_v3   ;;  %1695 = vperm.xlu0 %3518, %v4464_v57   ;;  %v6403_v3 = vld [vmem:[#allocation162_spill] sm:$0xff] }
 0x2b5   : > { %v4853_v50 = vpop.permute.xlu1 %1519 }
 0x2b6   : > { %6395 = vst [vmem:[#allocation97_spill] sm:$0xff] %v4853_v50  ;;  %v4855_v41 = vpop.permute.xlu2 %1559  ;;  %v4857_v17 = vpop.permute.xlu0 %1527  ;;  %v3524_v50 = vld [vmem:[%s3795_s28] sm:$0xff] }
 0x2b7   : > { %6396 = vst [vmem:[#allocation105_spill] sm:$0xff] %v4855_v41  ;;  %v3720_v41 = vmov 2  }
 0x2b8   : > { %6397 = vst [vmem:[#allocation104_spill] sm:$0xff] %v4857_v17  ;;  %v3562_v17 = vld [vmem:[%s3795_s28 + $0x128] sm:$0xff] }
 0x2bb   : > { %1699 = vperm.xlu1 %3519, %v6398_v11  }
 0x2bc   : > { %1703 = vperm.xlu2 %3517, %v6399_v1   ;;  %1707 = vperm.xlu0 %3518, %v4479_v62   ;;  %v3525_v1 = vld [vmem:[%s3795_s28 + $0x8] sm:$0xff] }
 0x2bd   : > { %v4862_v56 = vpop.permute.xlu1 %1531 }
 0x2be   : > { %6400 = vst [vmem:[#allocation103_spill] sm:$0xff] %v4862_v56  ;;  %v4864_v6 = vpop.permute.xlu2 %1571  ;;  %v4866_v57 = vpop.permute.xlu0 %1539  ;;  %v3528_v56 = vld [vmem:[%s3795_s28 + $0x30] sm:$0xff] }
 0x2bf   : > { %6401 = vst [vmem:[#allocation111_spill] sm:$0xff] %v4864_v6 }
 0x2c0   : > { %6402 = vst [vmem:[#allocation110_spill] sm:$0xff] %v4866_v57  ;;  %v3526_v57 = vld [vmem:[%s3795_s28 + $0x10] sm:$0xff] }
 0x2c3   : > { %1711 = vperm.xlu1 %3519, %v6403_v3   ;;  %v3527_v3 = vld [vmem:[%s3795_s28 + $0x18] sm:$0xff] }
 0x2c4   : > { %3520 = vset.pattern.permute.xlu2 %v3720_v41  ;;  %3521 = vset.pattern.permute.xlu0 %v3720_v41 }
 0x2c5   : > { %1972 = vperm.xlu2 %3520, %v3524_v50   ;;  %1976 = vperm.xlu0 %3521, %v3525_v1   ;;  %v4871_v62 = vpop.permute.xlu1 %1543 }
 0x2c6   : > { %6404 = vst [vmem:[#allocation109_spill] sm:$0xff] %v4871_v62  ;;  %v4873_v11 = vpop.permute.xlu2 %1583  ;;  %v4875_v6 = vpop.permute.xlu0 %1551 }
 0x2c7   : > { %6405 = vst [vmem:[#allocation117_spill] sm:$0xff] %v4873_v11  ;;  %v3529_v11 = vld [vmem:[%s3795_s28 + $0x20] sm:$0xff] }
 0x2c8   : > { %6406 = vst [vmem:[#allocation116_spill] sm:$0xff] %v4875_v6  ;;  %v3560_v6 = vld [vmem:[%s3795_s28 + $0x118] sm:$0xff] }
 0x2cb   : > { %3522 = vset.pattern.permute.xlu1 %v3720_v41  ;;  %v3531_v41 = vld [vmem:[%s3795_s28 + $0x48] sm:$0xff] }
 0x2cc   : > { %1980 = vperm.xlu1 %3522, %v3526_v57  }
 0x2cd   : > { %1984 = vperm.xlu2 %3520, %v3527_v3   ;;  %1996 = vperm.xlu0 %3521, %v3528_v56   ;;  %v4880_v50 = vpop.permute.xlu1 %1555 }
 0x2ce   : > { %6407 = vst [vmem:[#allocation115_spill] sm:$0xff] %v4880_v50  ;;  %v4882_v1 = vpop.permute.xlu2 %1595  ;;  %v4884_v62 = vpop.permute.xlu0 %1563  ;;  %v3532_v50 = vld [vmem:[%s3795_s28 + $0x38] sm:$0xff] }
 0x2cf   : > { %6408 = vst [vmem:[#allocation123_spill] sm:$0xff] %v4882_v1  ;;  %v3533_v1 = vld [vmem:[%s3795_s28 + $0x40] sm:$0xff] }
 0x2d0   : > { %6409 = vst [vmem:[#allocation122_spill] sm:$0xff] %v4884_v62  ;;  %v3534_v62 = vld [vmem:[%s3795_s28 + $0x60] sm:$0xff] }
 0x2d4   : > { %1988 = vperm.xlu1 %3522, %v3529_v11  }
 0x2d5   : > { %1992 = vperm.xlu2 %3520, %v3530_v51   ;;  %2008 = vperm.xlu0 %3521, %v3531_v41   ;;  %v4889_v57 = vpop.permute.xlu1 %1567 }
 0x2d6   : > { %6410 = vst [vmem:[#allocation121_spill] sm:$0xff] %v4889_v57  ;;  %v4891_v3 = vpop.permute.xlu2 %1607  ;;  %v4893_v56 = vpop.permute.xlu0 %1575  ;;  %v3535_v57 = vld [vmem:[%s3795_s28 + $0x50] sm:$0xff] }
 0x2d7   : > { %6411 = vst [vmem:[#allocation129_spill] sm:$0xff] %v4891_v3  ;;  %v3536_v3 = vld [vmem:[%s3795_s28 + $0x58] sm:$0xff] }
 0x2d8   : > { %6412 = vst [vmem:[#allocation128_spill] sm:$0xff] %v4893_v56  ;;  %v3537_v56 = vld [vmem:[%s3795_s28 + $0x78] sm:$0xff] }
 0x2dc   : > { %2000 = vperm.xlu1 %3522, %v3532_v50  }
 0x2dd   : > { %2004 = vperm.xlu2 %3520, %v3533_v1   ;;  %2020 = vperm.xlu0 %3521, %v3534_v62   ;;  %v4898_v11 = vpop.permute.xlu1 %1579 }
 0x2de   : > { %6413 = vst [vmem:[#allocation127_spill] sm:$0xff] %v4898_v11  ;;  %v4900_v51 = vpop.permute.xlu2 %1619  ;;  %v4902_v41 = vpop.permute.xlu0 %1587  ;;  %v3538_v11 = vld [vmem:[%s3795_s28 + $0x68] sm:$0xff] }
 0x2df   : > { %6414 = vst [vmem:[#allocation135_spill] sm:$0xff] %v4900_v51  ;;  %v3539_v51 = vld [vmem:[%s3795_s28 + $0x70] sm:$0xff] }
 0x2e0   : > { %6415 = vst [vmem:[#allocation134_spill] sm:$0xff] %v4902_v41  ;;  %v3540_v41 = vld [vmem:[%s3795_s28 + $0x90] sm:$0xff] }
 0x2e4   : > { %2012 = vperm.xlu1 %3522, %v3535_v57  }
 0x2e5   : > { %2016 = vperm.xlu2 %3520, %v3536_v3   ;;  %2032 = vperm.xlu0 %3521, %v3537_v56   ;;  %v4907_v50 = vpop.permute.xlu1 %1591 }
 0x2e6   : > { %6416 = vst [vmem:[#allocation133_spill] sm:$0xff] %v4907_v50  ;;  %v4909_v1 = vpop.permute.xlu2 %1631  ;;  %v4911_v62 = vpop.permute.xlu0 %1599  ;;  %v3541_v50 = vld [vmem:[%s3795_s28 + $0x80] sm:$0xff] }
 0x2e7   : > { %6417 = vst [vmem:[#allocation141_spill] sm:$0xff] %v4909_v1  ;;  %v3542_v1 = vld [vmem:[%s3795_s28 + $0x88] sm:$0xff] }
 0x2e8   : > { %6418 = vst [vmem:[#allocation140_spill] sm:$0xff] %v4911_v62  ;;  %v3543_v62 = vld [vmem:[%s3795_s28 + $0xa8] sm:$0xff] }
 0x2ec   : > { %2024 = vperm.xlu1 %3522, %v3538_v11  }
 0x2ed   : > { %2028 = vperm.xlu2 %3520, %v3539_v51   ;;  %2044 = vperm.xlu0 %3521, %v3540_v41   ;;  %v4916_v57 = vpop.permute.xlu1 %1603 }
 0x2ee   : > { %6419 = vst [vmem:[#allocation139_spill] sm:$0xff] %v4916_v57  ;;  %v4918_v3 = vpop.permute.xlu2 %1643  ;;  %v4920_v56 = vpop.permute.xlu0 %1611  ;;  %v3544_v57 = vld [vmem:[%s3795_s28 + $0x98] sm:$0xff] }
 0x2ef   : > { %6420 = vst [vmem:[#allocation147_spill] sm:$0xff] %v4918_v3  ;;  %v3545_v3 = vld [vmem:[%s3795_s28 + $0xa0] sm:$0xff] }
 0x2f0   : > { %6421 = vst [vmem:[#allocation146_spill] sm:$0xff] %v4920_v56  ;;  %v3546_v56 = vld [vmem:[%s3795_s28 + $0xc0] sm:$0xff] }
 0x2f4   : > { %2036 = vperm.xlu1 %3522, %v3541_v50  }
 0x2f5   : > { %2040 = vperm.xlu2 %3520, %v3542_v1   ;;  %2056 = vperm.xlu0 %3521, %v3543_v62   ;;  %v4925_v11 = vpop.permute.xlu1 %1615 }
 0x2f6   : > { %6422 = vst [vmem:[#allocation145_spill] sm:$0xff] %v4925_v11  ;;  %v4927_v51 = vpop.permute.xlu2 %1655  ;;  %v4929_v41 = vpop.permute.xlu0 %1623  ;;  %v3547_v11 = vld [vmem:[%s3795_s28 + $0xb0] sm:$0xff] }
 0x2f7   : > { %6423 = vst [vmem:[#allocation153_spill] sm:$0xff] %v4927_v51  ;;  %v3548_v51 = vld [vmem:[%s3795_s28 + $0xb8] sm:$0xff] }
 0x2f8   : > { %6424 = vst [vmem:[#allocation152_spill] sm:$0xff] %v4929_v41  ;;  %v3549_v41 = vld [vmem:[%s3795_s28 + $0xd8] sm:$0xff] }
 0x2fc   : > { %2048 = vperm.xlu1 %3522, %v3544_v57  }
 0x2fd   : > { %2052 = vperm.xlu2 %3520, %v3545_v3   ;;  %2068 = vperm.xlu0 %3521, %v3546_v56   ;;  %v4934_v50 = vpop.permute.xlu1 %1627 }
 0x2fe   : > { %6425 = vst [vmem:[#allocation151_spill] sm:$0xff] %v4934_v50  ;;  %v4936_v1 = vpop.permute.xlu2 %1667  ;;  %v4938_v62 = vpop.permute.xlu0 %1635  ;;  %v3550_v50 = vld [vmem:[%s3795_s28 + $0xc8] sm:$0xff] }
 0x2ff   : > { %6426 = vst [vmem:[#allocation158_spill] sm:$0xff] %v4936_v1  ;;  %v3551_v1 = vld [vmem:[%s3795_s28 + $0xd0] sm:$0xff] }
 0x300   : > { %6427 = vst [vmem:[#allocation157_spill] sm:$0xff] %v4938_v62  ;;  %v3552_v62 = vld [vmem:[%s3795_s28 + $0xf0] sm:$0xff] }
 0x304   : > { %2060 = vperm.xlu1 %3522, %v3547_v11  }
 0x305   : > { %2064 = vperm.xlu2 %3520, %v3548_v51   ;;  %2080 = vperm.xlu0 %3521, %v3549_v41   ;;  %v4943_v57 = vpop.permute.xlu1 %1639 }
 0x306   : > { %6428 = vst [vmem:[#allocation162_spill] sm:$0xff] %v4943_v57  ;;  %v4945_v3 = vpop.permute.xlu2 %1679  ;;  %v4947_v56 = vpop.permute.xlu0 %1647  ;;  %v3553_v57 = vld [vmem:[%s3795_s28 + $0xe0] sm:$0xff] }
 0x307   : > { %6429 = vst [vmem:[#allocation204_spill] sm:$0xff] %v4945_v3  ;;  %v3554_v3 = vld [vmem:[%s3795_s28 + $0xe8] sm:$0xff] }
 0x308   : > { %6430 = vst [vmem:[#allocation205_spill] sm:$0xff] %v4947_v56  ;;  %v3555_v56 = vld [vmem:[%s3795_s28 + $0x108] sm:$0xff] }
 0x30c   : > { %2072 = vperm.xlu1 %3522, %v3550_v50  }
 0x30d   : > { %2076 = vperm.xlu2 %3520, %v3551_v1   ;;  %2092 = vperm.xlu0 %3521, %v3552_v62   ;;  %v4952_v11 = vpop.permute.xlu1 %1651 }
 0x30e   : > { %6431 = vst [vmem:[#allocation206_spill] sm:$0xff] %v4952_v11  ;;  %v4954_v51 = vpop.permute.xlu2 %1691  ;;  %v4956_v41 = vpop.permute.xlu0 %1659  ;;  %v3556_v11 = vld [vmem:[%s3795_s28 + $0xf8] sm:$0xff] }
 0x30f   : > { %6432 = vst [vmem:[#allocation207_spill] sm:$0xff] %v4954_v51  ;;  %v3557_v51 = vld [vmem:[%s3795_s28 + $0x100] sm:$0xff] }
 0x310   : > { %6433 = vst [vmem:[#allocation208_spill] sm:$0xff] %v4956_v41  ;;  %v3558_v41 = vld [vmem:[%s3795_s28 + $0x120] sm:$0xff] }
 0x314   : > { %2084 = vperm.xlu1 %3522, %v3553_v57  }
 0x315   : > { %2088 = vperm.xlu2 %3520, %v3554_v3   ;;  %2104 = vperm.xlu0 %3521, %v3555_v56   ;;  %v4961_v50 = vpop.permute.xlu1 %1663 }
 0x316   : > { %6434 = vst [vmem:[#allocation209_spill] sm:$0xff] %v4961_v50  ;;  %v4963_v1 = vpop.permute.xlu2 %1703  ;;  %v4965_v62 = vpop.permute.xlu0 %1671  ;;  %v3559_v50 = vld [vmem:[%s3795_s28 + $0x110] sm:$0xff] }
 0x317   : > { %6435 = vst [vmem:[#allocation210_spill] sm:$0xff] %v4963_v1  ;;  %v3561_v1 = vld [vmem:[%s3795_s28 + $0x138] sm:$0xff] }
 0x318   : > { %6436 = vst [vmem:[#allocation211_spill] sm:$0xff] %v4965_v62 }
 0x31c   : > { %2096 = vperm.xlu1 %3522, %v3556_v11  }
 0x31d   : > { %2100 = vperm.xlu2 %3520, %v3557_v51   ;;  %2116 = vperm.xlu0 %3521, %v3558_v41   ;;  %v4970_v57 = vpop.permute.xlu1 %1675  ;;  %v300_v41 = vld [vmem:[%s6012_s1] sm:$0x7] }
 0x31e   : > { %6437 = vst [vmem:[#allocation212_spill] sm:$0xff] %v4970_v57  ;;  %v4972_v3 = vpop.permute.xlu0 %1683  ;;  %v6443_v57 = vld [vmem:[#allocation10_spill] sm:$0xff]  ;;  %v5001_v23 = vperm.slane %v300_v41, 2 }
 0x31f   : > { %6438 = vst [vmem:[#allocation213_spill] sm:$0xff] %v4972_v3  ;;  %v1973_v56 = vpop.permute.xlu2 %1972  ;;  %v3563_v3 = vld [vmem:[%s3795_s28 + $0x130] sm:$0xff] }
 0x324   : > { %2108 = vperm.xlu1 %3522, %v3559_v50   ;;  %v3564_v50 = vld [vmem:[%s3795_s28 + $0x150] sm:$0xff] }
 0x325   : > { %2112 = vperm.xlu2 %3520, %v3560_v6   ;;  %2128 = vperm.xlu0 %3521, %v3561_v1   ;;  %v4977_v62 = vpop.permute.xlu1 %1687 }
 0x326   : > { %6439 = vst [vmem:[#allocation214_spill] sm:$0xff] %v4977_v62  ;;  %v4979_v11 = vpop.permute.xlu0 %1695 }
 0x327   : > { %6440 = vst [vmem:[#allocation215_spill] sm:$0xff] %v4979_v11  ;;  %v1985_v51 = vpop.permute.xlu2 %1984  ;;  %v4993_v11 = vperm.slane %v300_v41, 0 }
 0x329   : > { %v942_v63 = vmul.f32 %v4993_v11, %v6443_v57  ;;  %v3566_v57 = vld [vmem:[%s3795_s28 + $0x148] sm:$0xff] }
 0x32c   : > { %2120 = vperm.xlu1 %3522, %v3562_v17   ;;  %v4995_v17 = vperm.slane %v300_v41, 1 }
 0x32d   : > { %2124 = vperm.xlu2 %3520, %v3563_v3   ;;  %2140 = vperm.xlu0 %3521, %v3564_v50   ;;  %v4987_v6 = vpop.permute.xlu1 %1699  ;;  %v943_v3 = vmul.f32 %v4993_v11, %v6444_v61  ;;  %v5006_v50 = vld [vmem:[%s6013_s2] ss:$0 sm:$0xff] }
 0x32e   : > { %6441 = vst [vmem:[#allocation216_spill] sm:$0xff] %v4987_v6  ;;  %v4989_v1 = vpop.permute.xlu0 %1707  ;;  %v1716_v6 = vmul.f32 %v4995_v17, %v4623_v43  ;;  %v1074_v41 = vadd.f32 %v5006_v50, %v942_v63 }
 0x32f   : > { %6442 = vst [vmem:[#allocation217_spill] sm:$0xff] %v4989_v1  ;;  %v4991_v62 = vpop.permute.xlu2 %1992  ;;  %v1715_v1 = vmul.f32 %v4995_v17, %v4587_v29  ;;  %v1075_v2 = vadd.f32 %v5006_v50, %v943_v3  ;;  %v2484_v29 = vmul.f32 %v5001_v23, %v1973_v56  ;;  %v1718_v56 = vmul.f32 %v4995_v17, %v4596_v32 }
 0x331   : > { %v1843_v43 = vadd.f32 %v1715_v1, %v1074_v41  ;;  %v1844_v30 = vadd.f32 %v1716_v6, %v1075_v2  ;;  %v1717_v1 = vmul.f32 %v4995_v17, %v4619_v38  ;;  %v3568_v6 = vld [vmem:[%s3795_s28 + $0x158] sm:$0xff] }
 0x333   : > { %v2612_v10 = vadd.f32 %v2484_v29, %v1843_v43 }
 0x334   : > { %2132 = vperm.xlu1 %3522, %v3565_v4   ;;  %v6446_v4 = vld [vmem:[#allocation9_spill] sm:$0xff] }
 0x335   : > { %2136 = vperm.xlu2 %3520, %v3566_v57   ;;  %2152 = vperm.xlu0 %3521, %v3567_v9   ;;  %v5015_v61 = vpop.permute.xlu1 %1711  ;;  %v944_v57 = vmul.f32 %v4993_v11, %v6446_v4  ;;  %v2487_v4 = vmul.f32 %v5001_v23, %v1985_v51 }
 0x336   : > { %6445 = vst [vmem:[#allocation10_spill] sm:$0xff] %v5015_v61  ;;  %v6447_v61 = vld [vmem:[#allocation12_spill] sm:$0xff] }
 0x337   : > { %v2005_v12 = vpop.permute.xlu2 %2004  ;;  %v1977_v45 = vpop.permute.xlu0 %1976  ;;  %v945_v63 = vmul.f32 %v4993_v11, %v6447_v61  ;;  %v1076_v41 = vadd.f32 %v5006_v50, %v944_v57  ;;  %v3570_v61 = vld [vmem:[%s3795_s28 + $0x180] sm:$0xff]  ;;  %v6449_v57 = vld [vmem:[#allocation6_spill] sm:$0xff] }
 0x338   : > { %v2485_v9 = vmul.f32 %v5001_v23, %v1977_v45 }
 0x339   : > { %v1077_v45 = vadd.f32 %v5006_v50, %v945_v63  ;;  %v1845_v38 = vadd.f32 %v1717_v1, %v1076_v41  ;;  %v6451_v1 = vld [vmem:[#allocation19_spill] sm:$0xff]  ;;  %v1720_v41 = vmul.f32 %v4995_v17, %v4605_v35  ;;  %v3572_v35 = vld [vmem:[%s3795_s28 + $0x178] sm:$0xff] }
 0x33a   : > { %v2613_v3 = vadd.f32 %v2485_v9, %v1844_v30  ;;  %v6448_v9 = vld [vmem:[#allocation5_spill] sm:$0xff] }
 0x33b   : > { %v1846_v30 = vadd.f32 %v1718_v56, %v1077_v45  ;;  %v946_v51 = vmul.f32 %v4993_v11, %v6448_v9  ;;  %v1719_v45 = vmul.f32 %v4995_v17, %v4628_v42  ;;  %v2489_v9 = vmul.f32 %v5001_v23, %v4991_v62  ;;  %v3573_v42 = vld [vmem:[%s3795_s28 + $0x198] sm:$0xff] }
 0x33c   : > { %v3090_v2 = vpack.c.bf16 %v2613_v3, %v2612_v10  ;;  %2144 = vperm.xlu1 %3522, %v3568_v6   ;;  %v951_v6 = vmul.f32 %v4993_v11, %v6451_v1 }
 0x33d   : > { %2148 = vperm.xlu2 %3520, %v3569_v15   ;;  %2164 = vperm.xlu0 %3521, %v3570_v61   ;;  %v947_v15 = vmul.f32 %v4993_v11, %v6449_v57  ;;  %v2615_v63 = vadd.f32 %v2487_v4, %v1846_v30  ;;  %v1724_v4 = vmul.f32 %v4995_v17, %v4641_v53  ;;  %v3571_v30 = vld [vmem:[%s3795_s28 + $0x170] sm:$0xff] }
 0x33e   : > { %3091 = vst [vmem:[%s5038_s8] sm:$0xff] %v3090_v2   ;;  %v1981_v32 = vpop.permute.xlu1 %1980  ;;  %v6450_v2 = vld [vmem:[#allocation7_spill] sm:$0xff]  ;;  %v2492_v53 = vmul.f32 %v5001_v23, %v2005_v12 }
 0x33f   : > { %v2486_v10 = vmul.f32 %v5001_v23, %v1981_v32  ;;  %v5042_v29 = vpop.permute.xlu2 %2016  ;;  %v1997_v43 = vpop.permute.xlu0 %1996  ;;  %v950_v56 = vmul.f32 %v4993_v11, %v6450_v2  ;;  %v1723_v32 = vmul.f32 %v4995_v17, %v4614_v39  ;;  %v1083_v39 = vadd.f32 %v5006_v50, %v951_v6 }
 0x341   : > { %v2614_v3 = vadd.f32 %v2486_v10, %v1845_v38  ;;  %v1078_v38 = vadd.f32 %v5006_v50, %v946_v51  ;;  %v1079_v10 = vadd.f32 %v5006_v50, %v947_v15  ;;  %v1082_v57 = vadd.f32 %v5006_v50, %v950_v56 }
 0x343   : > { %v3095_v61 = vpack.c.bf16 %v2615_v63, %v2614_v3  ;;  %v1848_v3 = vadd.f32 %v1720_v41, %v1079_v10  ;;  %v1847_v2 = vadd.f32 %v1719_v45, %v1078_v38  ;;  %v1851_v62 = vadd.f32 %v1723_v32, %v1082_v57 }
 0x344   : > { %2156 = vperm.xlu1 %3522, %v3571_v30   ;;  %v1721_v32 = vmul.f32 %v4995_v17, %v4632_v47 }
 0x345   : > { %3407 = vst [vmem:[%s5038_s8 + $0x8] sm:$0xff] %v3095_v61   ;;  %2160 = vperm.xlu2 %3520, %v3572_v35   ;;  %2176 = vperm.xlu0 %3521, %v3573_v42   ;;  %v1852_v61 = vadd.f32 %v1724_v4, %v1083_v39  ;;  %v6452_v35 = vld [vmem:[#allocation15_spill] sm:$0xff]  ;;  %v6453_v42 = vld [vmem:[#allocation16_spill] sm:$0xff]  ;;  %v2617_v6 = vadd.f32 %v2489_v9, %v1848_v3  ;;  %v3574_v39 = vld [vmem:[%s3795_s28 + $0x188] sm:$0xff] }
 0x346   : > { %v1989_v63 = vpop.permute.xlu1 %1988  ;;  %v949_v56 = vmul.f32 %v4993_v11, %v6452_v35  ;;  %v948_v12 = vmul.f32 %v4993_v11, %v6453_v42  ;;  %v2620_v45 = vadd.f32 %v2492_v53, %v1851_v62  ;;  %v1722_v4 = vmul.f32 %v4995_v17, %v4637_v46  ;;  %v3575_v53 = vld [vmem:[%s3795_s28 + $0x190] sm:$0xff] }
 0x347   : > { %v2488_v51 = vmul.f32 %v5001_v23, %v1989_v63  ;;  %v2029_v15 = vpop.permute.xlu2 %2028  ;;  %v2009_v1 = vpop.permute.xlu0 %2008  ;;  %v2490_v9 = vmul.f32 %v5001_v23, %v1997_v43  ;;  %v3576_v3 = vld [vmem:[%s3795_s28 + $0x1b0] sm:$0xff] }
 0x348   : > { %v2493_v30 = vmul.f32 %v5001_v23, %v2009_v1  ;;  %v1081_v63 = vadd.f32 %v5006_v50, %v949_v56  ;;  %v1080_v1 = vadd.f32 %v5006_v50, %v948_v12  ;;  %v6455_v56 = vld [vmem:[#allocation18_spill] sm:$0xff] }
 0x349   : > { %v2616_v41 = vadd.f32 %v2488_v51, %v1847_v2  ;;  %v952_v43 = vmul.f32 %v4993_v11, %v6455_v56 }
 0x34a   : > { %v2621_v38 = vadd.f32 %v2493_v30, %v1852_v61  ;;  %v1849_v2 = vadd.f32 %v1721_v32, %v1080_v1  ;;  %v1850_v46 = vadd.f32 %v1722_v4, %v1081_v63  ;;  %v6454_v30 = vld [vmem:[#allocation8_spill] sm:$0xff]  ;;  %v1726_v32 = vmul.f32 %v4995_v17, %v4621_v44  ;;  %v3577_v63 = vld [vmem:[%s3795_s28 + $0x1a0] sm:$0xff]  ;;  %v3578_v44 = vld [vmem:[%s3795_s28 + $0x1a8] sm:$0xff] }
 0x34b   : > { %v3100_v10 = vpack.c.bf16 %v2617_v6, %v2616_v41  ;;  %v953_v35 = vmul.f32 %v4993_v11, %v6454_v30  ;;  %v6456_v6 = vld [vmem:[#allocation11_spill] sm:$0xff]  ;;  %v1725_v4 = vmul.f32 %v4995_v17, %v4646_v52  ;;  %v3579_v52 = vld [vmem:[%s3795_s28 + $0x1c8] sm:$0xff] }
 0x34c   : > { %v3110_v57 = vpack.c.bf16 %v2621_v38, %v2620_v45  ;;  %2168 = vperm.xlu1 %3522, %v3574_v39   ;;  %v2618_v42 = vadd.f32 %v2490_v9, %v1849_v2  ;;  %v956_v41 = vmul.f32 %v4993_v11, %v6456_v6  ;;  %v6457_v45 = vld [vmem:[#allocation30_spill] sm:$0xff]  ;;  %v1730_v39 = vmul.f32 %v4995_v17, %v4659_v55  ;;  %v6459_v6 = vld [vmem:[#allocation24_spill] sm:$0xff] }
 0x34d   : > { %3408 = vst [vmem:[%s5038_s8 + $0x10] sm:$0xff] %v3100_v10   ;;  %2172 = vperm.xlu2 %3520, %v3575_v53   ;;  %2188 = vperm.xlu0 %3521, %v3576_v3   ;;  %v957_v38 = vmul.f32 %v4993_v11, %v6457_v45  ;;  %v1085_v1 = vadd.f32 %v5006_v50, %v953_v35 }
 0x34e   : > { %3410 = vst [vmem:[%s5038_s8 + $0x20] sm:$0xff] %v3110_v57   ;;  %v2001_v47 = vpop.permute.xlu1 %2000  ;;  %v1729_v57 = vmul.f32 %v4995_v17, %v4630_v48  ;;  %v1084_v9 = vadd.f32 %v5006_v50, %v952_v43  ;;  %v2495_v53 = vmul.f32 %v5001_v23, %v5042_v29  ;;  %v1088_v3 = vadd.f32 %v5006_v50, %v956_v41 }
 0x34f   : > { %v2491_v51 = vmul.f32 %v5001_v23, %v2001_v47  ;;  %v5090_v62 = vpop.permute.xlu2 %2040  ;;  %v2021_v61 = vpop.permute.xlu0 %2020  ;;  %v1089_v48 = vadd.f32 %v5006_v50, %v957_v38  ;;  %v2498_v55 = vmul.f32 %v5001_v23, %v2029_v15  ;;  %v1854_v2 = vadd.f32 %v1726_v32, %v1085_v1 }
 0x350   : > { %v1857_v29 = vadd.f32 %v1729_v57, %v1088_v3  ;;  %v954_v15 = vmul.f32 %v4993_v11, %v6459_v6  ;;  %v1732_v6 = vmul.f32 %v4995_v17, %v4639_v54  ;;  %v3584_v54 = vld [vmem:[%s3795_s28 + $0x1d8] sm:$0xff] }
 0x351   : > { %v2619_v12 = vadd.f32 %v2491_v51, %v1850_v46  ;;  %v1853_v46 = vadd.f32 %v1725_v4, %v1084_v9  ;;  %v1858_v56 = vadd.f32 %v1730_v39, %v1089_v48  ;;  %v2623_v41 = vadd.f32 %v2495_v53, %v1854_v2  ;;  %v6460_v2 = vld [vmem:[#allocation14_spill] sm:$0xff] }
 0x352   : > { %v2626_v38 = vadd.f32 %v2498_v55, %v1857_v29  ;;  %v1727_v4 = vmul.f32 %v4995_v17, %v4650_v59  ;;  %v1086_v9 = vadd.f32 %v5006_v50, %v954_v15  ;;  %v2496_v53 = vmul.f32 %v5001_v23, %v2021_v61 }
 0x353   : > { %v3105_v10 = vpack.c.bf16 %v2619_v12, %v2618_v42  ;;  %v6458_v42 = vld [vmem:[#allocation23_spill] sm:$0xff]  ;;  %v1731_v15 = vmul.f32 %v4995_v17, %v4664_v33  ;;  %v3585_v33 = vld [vmem:[%s3795_s28 + $0x1f8] sm:$0xff] }
 0x354   : > { %2180 = vperm.xlu1 %3522, %v3577_v63   ;;  %v955_v12 = vmul.f32 %v4993_v11, %v6458_v42  ;;  %v3580_v63 = vld [vmem:[%s3795_s28 + $0x1b8] sm:$0xff]  ;;  %v1855_v3 = vadd.f32 %v1727_v4, %v1086_v9  ;;  %v6463_v42 = vld [vmem:[#allocation42_spill] sm:$0xff] }
 0x355   : > { %3409 = vst [vmem:[%s5038_s8 + $0x18] sm:$0xff] %v3105_v10   ;;  %2184 = vperm.xlu2 %3520, %v3578_v44   ;;  %2200 = vperm.xlu0 %3521, %v3579_v52   ;;  %v1728_v10 = vmul.f32 %v4995_v17, %v4655_v34  ;;  %v3581_v44 = vld [vmem:[%s3795_s28 + $0x1c0] sm:$0xff] }
 0x356   : > { %v2013_v47 = vpop.permute.xlu1 %2012  ;;  %v1087_v1 = vadd.f32 %v5006_v50, %v955_v12  ;;  %v3582_v52 = vld [vmem:[%s3795_s28 + $0x1e0] sm:$0xff]  ;;  %v963_v12 = vmul.f32 %v4993_v11, %v6463_v42 }
 0x357   : > { %v2494_v51 = vmul.f32 %v5001_v23, %v2013_v47  ;;  %v2053_v30 = vpop.permute.xlu2 %2052  ;;  %v2033_v35 = vpop.permute.xlu0 %2032 }
 0x358   : > { %v2499_v43 = vmul.f32 %v5001_v23, %v2033_v35  ;;  %v1856_v34 = vadd.f32 %v1728_v10, %v1087_v1  ;;  %v2624_v35 = vadd.f32 %v2496_v53, %v1855_v3 }
 0x359   : > { %v2622_v45 = vadd.f32 %v2494_v51, %v1853_v46  ;;  %v959_v46 = vmul.f32 %v4993_v11, %v6460_v2  ;;  %v6461_v51 = vld [vmem:[#allocation29_spill] sm:$0xff]  ;;  %v6465_v2 = vld [vmem:[#allocation36_spill] sm:$0xff] }
 0x35a   : > { %v2627_v32 = vadd.f32 %v2499_v43, %v1858_v56  ;;  %v958_v61 = vmul.f32 %v4993_v11, %v6461_v51  ;;  %v6462_v56 = vld [vmem:[#allocation17_spill] sm:$0xff] }
 0x35b   : > { %v3115_v57 = vpack.c.bf16 %v2623_v41, %v2622_v45  ;;  %v962_v43 = vmul.f32 %v4993_v11, %v6462_v56  ;;  %v1735_v45 = vmul.f32 %v4995_v17, %v4648_v60  ;;  %v1091_v4 = vadd.f32 %v5006_v50, %v959_v46 }
 0x35c   : > { %v3125_v39 = vpack.c.bf16 %v2627_v32, %v2626_v38  ;;  %2192 = vperm.xlu1 %3522, %v3580_v63   ;;  %v1736_v38 = vmul.f32 %v4995_v17, %v4677_v0  ;;  %v3583_v32 = vld [vmem:[%s3795_s28 + $0x1d0] sm:$0xff]  ;;  %v1090_v10 = vadd.f32 %v5006_v50, %v958_v61  ;;  %v1095_v60 = vadd.f32 %v5006_v50, %v963_v12  ;;  %v3586_v12 = vld [vmem:[%s3795_s28 + $0x1e8] sm:$0xff] }
 0x35d   : > { %3411 = vst [vmem:[%s5038_s8 + $0x28] sm:$0xff] %v3115_v57   ;;  %2196 = vperm.xlu2 %3520, %v3581_v44   ;;  %2212 = vperm.xlu0 %3521, %v3582_v52   ;;  %v2501_v57 = vmul.f32 %v5001_v23, %v5090_v62  ;;  %v2504_v0 = vmul.f32 %v5001_v23, %v2053_v30 }
 0x35e   : > { %3413 = vst [vmem:[%s5038_s8 + $0x38] sm:$0xff] %v3125_v39   ;;  %v2025_v59 = vpop.permute.xlu1 %2024  ;;  %v1094_v39 = vadd.f32 %v5006_v50, %v962_v43  ;;  %v1860_v1 = vadd.f32 %v1732_v6, %v1091_v4  ;;  %v1859_v9 = vadd.f32 %v1731_v15, %v1090_v10  ;;  %v960_v30 = vmul.f32 %v4993_v11, %v6465_v2 }
 0x35f   : > { %v2497_v48 = vmul.f32 %v5001_v23, %v2025_v59  ;;  %v5138_v55 = vpop.permute.xlu2 %2064  ;;  %v2045_v47 = vpop.permute.xlu0 %2044  ;;  %v1864_v59 = vadd.f32 %v1736_v38, %v1095_v60  ;;  %v1734_v56 = vmul.f32 %v4995_v17, %v4673_v19  ;;  %v3588_v38 = vld [vmem:[%s3795_s28 + $0x210] sm:$0xff] }
 0x360   : > { %v1863_v62 = vadd.f32 %v1735_v45, %v1094_v39  ;;  %v2629_v46 = vadd.f32 %v2501_v57, %v1860_v1  ;;  %v1092_v15 = vadd.f32 %v5006_v50, %v960_v30  ;;  %v3587_v45 = vld [vmem:[%s3795_s28 + $0x1f0] sm:$0xff]  ;;  %v6467_v39 = vld [vmem:[#allocation41_spill] sm:$0xff] }
 0x361   : > { %v2625_v29 = vadd.f32 %v2497_v48, %v1856_v34  ;;  %v6464_v34 = vld [vmem:[#allocation35_spill] sm:$0xff] }
 0x362   : > { %v961_v48 = vmul.f32 %v4993_v11, %v6464_v34  ;;  %v2632_v61 = vadd.f32 %v2504_v0, %v1863_v62  ;;  %v1737_v62 = vmul.f32 %v4995_v17, %v4682_v26  ;;  %v1742_v34 = vmul.f32 %v4995_v17, %v4695_v37  ;;  %v3591_v26 = vld [vmem:[%s3795_s28 + $0x228] sm:$0xff] }
 0x363   : > { %v3120_v41 = vpack.c.bf16 %v2625_v29, %v2624_v35  ;;  %v1733_v29 = vmul.f32 %v4995_v17, %v4668_v58 }
 0x364   : > { %2204 = vperm.xlu1 %3522, %v3583_v32   ;;  %v1093_v6 = vadd.f32 %v5006_v50, %v961_v48  ;;  %v3589_v48 = vld [vmem:[%s3795_s28 + $0x200] sm:$0xff] }
 0x365   : > { %3412 = vst [vmem:[%s5038_s8 + $0x30] sm:$0xff] %v3120_v41   ;;  %2208 = vperm.xlu2 %3520, %v3584_v54   ;;  %2224 = vperm.xlu0 %3521, %v3585_v33   ;;  %v2502_v41 = vmul.f32 %v5001_v23, %v2045_v47  ;;  %v1861_v32 = vadd.f32 %v1733_v29, %v1092_v15  ;;  %v6466_v54 = vld [vmem:[#allocation22_spill] sm:$0xff]  ;;  %v6470_v15 = vld [vmem:[#allocation47_spill] sm:$0xff] }
 0x366   : > { %v2037_v63 = vpop.permute.xlu1 %2036  ;;  %v1862_v19 = vadd.f32 %v1734_v56, %v1093_v6  ;;  %v965_v33 = vmul.f32 %v4993_v11, %v6466_v54  ;;  %v964_v47 = vmul.f32 %v4993_v11, %v6467_v39  ;;  %v1740_v54 = vmul.f32 %v4995_v17, %v4691_v13 }
 0x367   : > { %v2500_v53 = vmul.f32 %v5001_v23, %v2037_v63  ;;  %v2077_v44 = vpop.permute.xlu2 %2076  ;;  %v2057_v52 = vpop.permute.xlu0 %2056  ;;  %v2630_v60 = vadd.f32 %v2502_v41, %v1861_v32  ;;  %v6468_v63 = vld [vmem:[#allocation28_spill] sm:$0xff]  ;;  %v967_v41 = vmul.f32 %v4993_v11, %v6470_v15 }
 0x368   : > { %v2505_v3 = vmul.f32 %v5001_v23, %v2057_v52  ;;  %v968_v1 = vmul.f32 %v4993_v11, %v6468_v63  ;;  %v1738_v52 = vmul.f32 %v4995_v17, %v4657_v31  ;;  %v1097_v2 = vadd.f32 %v5006_v50, %v965_v33  ;;  %v3590_v31 = vld [vmem:[%s3795_s28 + $0x208] sm:$0xff] }
 0x369   : > { %v2628_v51 = vadd.f32 %v2500_v53, %v1859_v9  ;;  %v6469_v9 = vld [vmem:[#allocation54_spill] sm:$0xff]  ;;  %v1096_v30 = vadd.f32 %v5006_v50, %v964_v47  ;;  %v2510_v37 = vmul.f32 %v5001_v23, %v2077_v44  ;;  %v3592_v47 = vld [vmem:[%s3795_s28 + $0x218] sm:$0xff] }
 0x36a   : > { %v2633_v35 = vadd.f32 %v2505_v3, %v1864_v59  ;;  %v969_v53 = vmul.f32 %v4993_v11, %v6469_v9  ;;  %v1741_v3 = vmul.f32 %v4995_v17, %v4666_v28  ;;  %v3594_v9 = vld [vmem:[%s3795_s28 + $0x240] sm:$0xff] }
 0x36b   : > { %v3130_v43 = vpack.c.bf16 %v2629_v46, %v2628_v51  ;;  %v2507_v46 = vmul.f32 %v5001_v23, %v5138_v55  ;;  %v1100_v51 = vadd.f32 %v5006_v50, %v968_v1  ;;  %v1865_v29 = vadd.f32 %v1737_v62, %v1096_v30  ;;  %v3593_v1 = vld [vmem:[%s3795_s28 + $0x220] sm:$0xff] }
 0x36c   : > { %v3140_v42 = vpack.c.bf16 %v2633_v35, %v2632_v61  ;;  %2216 = vperm.xlu1 %3522, %v3586_v12   ;;  %v1101_v28 = vadd.f32 %v5006_v50, %v969_v53  ;;  %v1866_v35 = vadd.f32 %v1738_v52, %v1097_v2 }
 0x36d   : > { %3414 = vst [vmem:[%s5038_s8 + $0x40] sm:$0xff] %v3130_v43   ;;  %2220 = vperm.xlu2 %3520, %v3587_v45   ;;  %2236 = vperm.xlu0 %3521, %v3588_v38   ;;  %v1869_v55 = vadd.f32 %v1741_v3, %v1100_v51  ;;  %v6471_v45 = vld [vmem:[#allocation48_spill] sm:$0xff]  ;;  %v6472_v3 = vld [vmem:[#allocation34_spill] sm:$0xff] }
 0x36e   : > { %3416 = vst [vmem:[%s5038_s8 + $0x50] sm:$0xff] %v3140_v42   ;;  %v2049_v58 = vpop.permute.xlu1 %2048  ;;  %v1870_v12 = vadd.f32 %v1742_v34, %v1101_v28  ;;  %v966_v44 = vmul.f32 %v4993_v11, %v6471_v45  ;;  %v2635_v38 = vadd.f32 %v2507_v46, %v1866_v35  ;;  %v971_v34 = vmul.f32 %v4993_v11, %v6472_v3  ;;  %v6474_v46 = vld [vmem:[#allocation40_spill] sm:$0xff] }
 0x36f   : > { %v2503_v4 = vmul.f32 %v5001_v23, %v2049_v58  ;;  %v5186_v10 = vpop.permute.xlu2 %2088  ;;  %v2069_v57 = vpop.permute.xlu0 %2068  ;;  %v2638_v32 = vadd.f32 %v2510_v37, %v1869_v55  ;;  %v1744_v28 = vmul.f32 %v4995_v17, %v4675_v25  ;;  %v1743_v37 = vmul.f32 %v4995_v17, %v4700_v20  ;;  %v3596_v25 = vld [vmem:[%s3795_s28 + $0x238] sm:$0xff] }
 0x370   : > { %v2508_v63 = vmul.f32 %v5001_v23, %v2069_v57  ;;  %v1747_v35 = vmul.f32 %v4995_v17, %v4684_v27  ;;  %v3597_v20 = vld [vmem:[%s3795_s28 + $0x258] sm:$0xff] }
 0x371   : > { %v2631_v0 = vadd.f32 %v2503_v4, %v1862_v19  ;;  %v1739_v4 = vmul.f32 %v4995_v17, %v4686_v49 }
 0x373   : > { %v3135_v59 = vpack.c.bf16 %v2631_v0, %v2630_v60  ;;  %v1099_v60 = vadd.f32 %v5006_v50, %v967_v41  ;;  %v1098_v0 = vadd.f32 %v5006_v50, %v966_v44 }
 0x374   : > { %2228 = vperm.xlu1 %3522, %v3589_v48   ;;  %v6473_v48 = vld [vmem:[#allocation53_spill] sm:$0xff] }
 0x375   : > { %3415 = vst [vmem:[%s5038_s8 + $0x48] sm:$0xff] %v3135_v59   ;;  %2232 = vperm.xlu2 %3520, %v3590_v31   ;;  %2248 = vperm.xlu0 %3521, %v3591_v26   ;;  %v1867_v53 = vadd.f32 %v1739_v4, %v1098_v0  ;;  %v1868_v13 = vadd.f32 %v1740_v54, %v1099_v60  ;;  %v6475_v26 = vld [vmem:[#allocation66_spill] sm:$0xff]  ;;  %v6476_v4 = vld [vmem:[#allocation59_spill] sm:$0xff] }
 0x376   : > { %v2061_v61 = vpop.permute.xlu1 %2060  ;;  %v970_v57 = vmul.f32 %v4993_v11, %v6473_v48  ;;  %v974_v31 = vmul.f32 %v4993_v11, %v6474_v46  ;;  %v975_v51 = vmul.f32 %v4993_v11, %v6475_v26  ;;  %v973_v54 = vmul.f32 %v4993_v11, %v6476_v4  ;;  %v3600_v48 = vld [vmem:[%s3795_s28 + $0x270] sm:$0xff] }
 0x377   : > { %v2506_v56 = vmul.f32 %v5001_v23, %v2061_v61  ;;  %v2101_v43 = vpop.permute.xlu2 %2100  ;;  %v2081_v42 = vpop.permute.xlu0 %2080  ;;  %v2636_v2 = vadd.f32 %v2508_v63, %v1867_v53  ;;  %v1745_v63 = vmul.f32 %v4995_v17, %v4704_v40  ;;  %v3598_v53 = vld [vmem:[%s3795_s28 + $0x248] sm:$0xff] }
 0x378   : > { %v2511_v6 = vmul.f32 %v5001_v23, %v2081_v42  ;;  %v1103_v42 = vadd.f32 %v5006_v50, %v971_v34  ;;  %v1102_v55 = vadd.f32 %v5006_v50, %v970_v57  ;;  %v1107_v27 = vadd.f32 %v5006_v50, %v975_v51  ;;  %v3599_v34 = vld [vmem:[%s3795_s28 + $0x250] sm:$0xff]  ;;  %v6479_v51 = vld [vmem:[#allocation65_spill] sm:$0xff] }
 0x379   : > { %v2634_v58 = vadd.f32 %v2506_v56, %v1865_v29  ;;  %v1748_v29 = vmul.f32 %v4995_v17, %v4713_v22  ;;  %v3595_v56 = vld [vmem:[%s3795_s28 + $0x230] sm:$0xff]  ;;  %v2516_v22 = vmul.f32 %v5001_v23, %v2101_v43 }
 0x37a   : > { %v2639_v19 = vadd.f32 %v2511_v6, %v1870_v12  ;;  %v2513_v12 = vmul.f32 %v5001_v23, %v5186_v10  ;;  %v1106_v6 = vadd.f32 %v5006_v50, %v974_v31  ;;  %v1872_v41 = vadd.f32 %v1744_v28, %v1103_v42  ;;  %v6478_v31 = vld [vmem:[#allocation46_spill] sm:$0xff] }
 0x37b   : > { %v3145_v33 = vpack.c.bf16 %v2635_v38, %v2634_v58  ;;  %v1871_v45 = vadd.f32 %v1743_v37, %v1102_v55  ;;  %v977_v26 = vmul.f32 %v4993_v11, %v6478_v31  ;;  %v1750_v42 = vmul.f32 %v4995_v17, %v4693_v24  ;;  %v3602_v24 = vld [vmem:[%s3795_s28 + $0x268] sm:$0xff] }
 0x37c   : > { %v3155_v39 = vpack.c.bf16 %v2639_v19, %v2638_v32  ;;  %2240 = vperm.xlu1 %3522, %v3592_v47   ;;  %v1875_v10 = vadd.f32 %v1747_v35, %v1106_v6  ;;  %v1876_v32 = vadd.f32 %v1748_v29, %v1107_v27  ;;  %v6481_v29 = vld [vmem:[#allocation78_spill] sm:$0xff]  ;;  %v1749_v55 = vmul.f32 %v4995_v17, %v4718_v14  ;;  %v3601_v6 = vld [vmem:[%s3795_s28 + $0x260] sm:$0xff] }
 0x37d   : > { %3417 = vst [vmem:[%s5038_s8 + $0x58] sm:$0xff] %v3145_v33   ;;  %2244 = vperm.xlu2 %3520, %v3593_v1   ;;  %2260 = vperm.xlu0 %3521, %v3594_v9   ;;  %v6477_v33 = vld [vmem:[#allocation60_spill] sm:$0xff]  ;;  %v1746_v1 = vmul.f32 %v4995_v17, %v4709_v7  ;;  %v1109_v27 = vadd.f32 %v5006_v50, %v977_v26  ;;  %v3603_v14 = vld [vmem:[%s3795_s28 + $0x288] sm:$0xff] }
 0x37e   : > { %3419 = vst [vmem:[%s5038_s8 + $0x68] sm:$0xff] %v3155_v39   ;;  %v2073_v49 = vpop.permute.xlu1 %2072  ;;  %v972_v43 = vmul.f32 %v4993_v11, %v6477_v33  ;;  %v2641_v39 = vadd.f32 %v2513_v12, %v1872_v41  ;;  %v2644_v60 = vadd.f32 %v2516_v22, %v1875_v10  ;;  %v6482_v33 = vld [vmem:[#allocation71_spill] sm:$0xff]  ;;  %v6484_v26 = vld [vmem:[#allocation58_spill] sm:$0xff] }
 0x37f   : > { %v2509_v52 = vmul.f32 %v5001_v23, %v2073_v49  ;;  %v5234_v62 = vpop.permute.xlu2 %2112  ;;  %v2093_v59 = vpop.permute.xlu0 %2092 }
 0x380   : > { %v2514_v3 = vmul.f32 %v5001_v23, %v2093_v59  ;;  %v976_v59 = vmul.f32 %v4993_v11, %v6479_v51  ;;  %v983_v51 = vmul.f32 %v4993_v11, %v6484_v26 }
 0x381   : > { %v2637_v30 = vadd.f32 %v2509_v52, %v1868_v13  ;;  %v1105_v13 = vadd.f32 %v5006_v50, %v973_v54  ;;  %v1104_v52 = vadd.f32 %v5006_v50, %v972_v43  ;;  %v979_v43 = vmul.f32 %v4993_v11, %v6482_v33  ;;  %v6490_v33 = vld [vmem:[#allocation83_spill] sm:$0xff] }
 0x382   : > { %v1108_v22 = vadd.f32 %v5006_v50, %v976_v59  ;;  %v6485_v59 = vld [vmem:[#allocation77_spill] sm:$0xff] }
 0x383   : > { %v3150_v61 = vpack.c.bf16 %v2637_v30, %v2636_v2  ;;  %v1873_v57 = vadd.f32 %v1745_v63, %v1104_v52  ;;  %v1874_v7 = vadd.f32 %v1746_v1, %v1105_v13  ;;  %v1751_v1 = vmul.f32 %v4995_v17, %v4722_v36  ;;  %v3604_v13 = vld [vmem:[%s3795_s28 + $0x278] sm:$0xff] }
 0x384   : > { %2252 = vperm.xlu1 %3522, %v3595_v56   ;;  %v981_v56 = vmul.f32 %v4993_v11, %v6481_v29  ;;  %v1111_v52 = vadd.f32 %v5006_v50, %v979_v43  ;;  %v6487_v29 = vld [vmem:[#allocation90_spill] sm:$0xff]  ;;  %v985_v43 = vmul.f32 %v4993_v11, %v6490_v33 }
 0x385   : > { %3418 = vst [vmem:[%s5038_s8 + $0x60] sm:$0xff] %v3150_v61   ;;  %2256 = vperm.xlu2 %3520, %v3596_v25   ;;  %2272 = vperm.xlu0 %3521, %v3597_v20   ;;  %v2642_v28 = vadd.f32 %v2514_v3, %v1873_v57  ;;  %v6480_v61 = vld [vmem:[#allocation52_spill] sm:$0xff]  ;;  %v1753_v25 = vmul.f32 %v4995_v17, %v4702_v21 }
 0x386   : > { %v2085_v15 = vpop.permute.xlu1 %2084  ;;  %v980_v35 = vmul.f32 %v4993_v11, %v6480_v61  ;;  %v1754_v20 = vmul.f32 %v4995_v17, %v4731_v16  ;;  %v1113_v21 = vadd.f32 %v5006_v50, %v981_v56  ;;  %v6486_v61 = vld [vmem:[#allocation64_spill] sm:$0xff]  ;;  %v987_v56 = vmul.f32 %v4993_v11, %v6487_v29 }
 0x387   : > { %v2512_v44 = vmul.f32 %v5001_v23, %v2085_v15  ;;  %v2125_v38 = vpop.permute.xlu2 %2124  ;;  %v2105_v58 = vpop.permute.xlu0 %2104  ;;  %v2519_v15 = vmul.f32 %v5001_v23, %v5234_v62  ;;  %v6496_v29 = vld [vmem:[#allocation76_spill] sm:$0xff] }
 0x388   : > { %v2517_v19 = vmul.f32 %v5001_v23, %v2105_v58  ;;  %v1112_v41 = vadd.f32 %v5006_v50, %v980_v35  ;;  %v2522_v16 = vmul.f32 %v5001_v23, %v2125_v38  ;;  %v1877_v58 = vadd.f32 %v1749_v55, %v1108_v22  ;;  %v3607_v22 = vld [vmem:[%s3795_s28 + $0x290] sm:$0xff] }
 0x389   : > { %v2640_v47 = vadd.f32 %v2512_v44, %v1871_v45  ;;  %v1878_v44 = vadd.f32 %v1750_v42, %v1109_v27  ;;  %v1882_v4 = vadd.f32 %v1754_v20, %v1113_v21  ;;  %v986_v35 = vmul.f32 %v4993_v11, %v6486_v61 }
 0x38a   : > { %v2645_v0 = vadd.f32 %v2517_v19, %v1876_v32  ;;  %v1881_v62 = vadd.f32 %v1753_v25, %v1112_v41  ;;  %v1756_v42 = vmul.f32 %v4995_v17, %v4711_v18  ;;  %v1755_v55 = vmul.f32 %v4995_v17, %v4736_v8  ;;  %v6488_v25 = vld [vmem:[#allocation21_spill] sm:$0xff]  ;;  %v3608_v18 = vld [vmem:[%s3795_s28 + $0x298] sm:$0xff] }
 0x38b   : > { %v3160_v9 = vpack.c.bf16 %v2641_v39, %v2640_v47  ;;  %v6483_v39 = vld [vmem:[#allocation72_spill] sm:$0xff]  ;;  %v2647_v47 = vadd.f32 %v2519_v15, %v1878_v44  ;;  %v1759_v20 = vmul.f32 %v4995_v17, %v6488_v25  ;;  %v1115_v15 = vadd.f32 %v5006_v50, %v983_v51 }
 0x38c   : > { %v3170_v49 = vpack.c.bf16 %v2645_v0, %v2644_v60  ;;  %2264 = vperm.xlu1 %3522, %v3598_v53   ;;  %v978_v38 = vmul.f32 %v4993_v11, %v6483_v39  ;;  %v2650_v0 = vadd.f32 %v2522_v16, %v1881_v62  ;;  %v3609_v8 = vld [vmem:[%s3795_s28 + $0x2b8] sm:$0xff]  ;;  %v1118_v41 = vadd.f32 %v5006_v50, %v986_v35 }
 0x38d   : > { %3420 = vst [vmem:[%s5038_s8 + $0x70] sm:$0xff] %v3160_v9   ;;  %2268 = vperm.xlu2 %3520, %v3599_v34   ;;  %2284 = vperm.xlu0 %3521, %v3600_v48   ;;  %v1752_v9 = vmul.f32 %v4995_v17, %v4727_v5  ;;  %v3605_v48 = vld [vmem:[%s3795_s28 + $0x280] sm:$0xff]  ;;  %v1119_v21 = vadd.f32 %v5006_v50, %v987_v56  ;;  %v6491_v39 = vld [vmem:[#allocation84_spill] sm:$0xff] }
 0x38e   : > { %3422 = vst [vmem:[%s5038_s8 + $0x80] sm:$0xff] %v3170_v49   ;;  %v2097_v40 = vpop.permute.xlu1 %2096  ;;  %v1110_v3 = vadd.f32 %v5006_v50, %v978_v38  ;;  %v1884_v44 = vadd.f32 %v1756_v42, %v1115_v15  ;;  %v992_v56 = vmul.f32 %v4993_v11, %v6496_v29  ;;  %v6497_v42 = vld [vmem:[#allocation102_spill] sm:$0xff] }
 0x38f   : > { %v2515_v2 = vmul.f32 %v5001_v23, %v2097_v40  ;;  %v5282_v30 = vpop.permute.xlu2 %2136  ;;  %v2117_v46 = vpop.permute.xlu0 %2116  ;;  %v3606_v40 = vld [vmem:[%s3795_s28 + $0x2a0] sm:$0xff]  ;;  %v1880_v5 = vadd.f32 %v1752_v9, %v1111_v52  ;;  %v3610_v52 = vld [vmem:[%s3795_s28 + $0x2a8] sm:$0xff] }
 0x390   : > { %v2520_v34 = vmul.f32 %v5001_v23, %v2117_v46  ;;  %v1879_v57 = vadd.f32 %v1751_v1, %v1110_v3  ;;  %v982_v46 = vmul.f32 %v4993_v11, %v6485_v59  ;;  %v6493_v9 = vld [vmem:[#allocation25_spill] sm:$0xff]  ;;  %v1117_v3 = vadd.f32 %v5006_v50, %v985_v43 }
 0x391   : > { %v2643_v37 = vadd.f32 %v2515_v2, %v1874_v7 }
 0x393   : > { %v3165_v12 = vpack.c.bf16 %v2643_v37, %v2642_v28  ;;  %v2648_v28 = vadd.f32 %v2520_v34, %v1879_v57 }
 0x394   : > { %2276 = vperm.xlu1 %3522, %v3601_v6   ;;  %v6489_v6 = vld [vmem:[#allocation32_spill] sm:$0xff] }
 0x395   : > { %3421 = vst [vmem:[%s5038_s8 + $0x78] sm:$0xff] %v3165_v12   ;;  %2280 = vperm.xlu2 %3520, %v3602_v24   ;;  %2296 = vperm.xlu0 %3521, %v3603_v14   ;;  %v1760_v27 = vmul.f32 %v4995_v17, %v6489_v6  ;;  %v1114_v24 = vadd.f32 %v5006_v50, %v982_v46  ;;  %v6494_v46 = vld [vmem:[#allocation70_spill] sm:$0xff] }
 0x396   : > { %v2109_v45 = vpop.permute.xlu1 %2108  ;;  %v2525_v14 = vmul.f32 %v5001_v23, %v5282_v30  ;;  %v1887_v30 = vadd.f32 %v1759_v20, %v1118_v41  ;;  %v6499_v20 = vld [vmem:[#allocation31_spill] sm:$0xff] }
 0x397   : > { %v2518_v10 = vmul.f32 %v5001_v23, %v2109_v45  ;;  %v2149_v32 = vpop.permute.xlu2 %2148  ;;  %v2129_v19 = vpop.permute.xlu0 %2128  ;;  %v1761_v6 = vmul.f32 %v4995_v17, %v6499_v20  ;;  %v6509_v20 = vld [vmem:[#allocation114_spill] sm:$0xff] }
 0x398   : > { %v2523_v54 = vmul.f32 %v5001_v23, %v2129_v19  ;;  %v2528_v16 = vmul.f32 %v5001_v23, %v2149_v32  ;;  %v984_v32 = vmul.f32 %v4993_v11, %v6491_v39  ;;  %v2653_v38 = vadd.f32 %v2525_v14, %v1884_v44 }
 0x399   : > { %v2646_v60 = vadd.f32 %v2518_v10, %v1877_v58  ;;  %v1883_v58 = vadd.f32 %v1755_v55, %v1114_v24  ;;  %v993_v55 = vmul.f32 %v4993_v11, %v6497_v42  ;;  %v6501_v24 = vld [vmem:[#allocation44_spill] sm:$0xff]  ;;  %v1124_v44 = vadd.f32 %v5006_v50, %v992_v56  ;;  %v6507_v56 = vld [vmem:[#allocation101_spill] sm:$0xff] }
 0x39a   : > { %v2651_v63 = vadd.f32 %v2523_v54, %v1882_v4  ;;  %v1888_v4 = vadd.f32 %v1760_v27, %v1119_v21  ;;  %v1116_v34 = vadd.f32 %v5006_v50, %v984_v32  ;;  %v1766_v14 = vmul.f32 %v4995_v17, %v6501_v24 }
 0x39b   : > { %v3175_v49 = vpack.c.bf16 %v2647_v47, %v2646_v60  ;;  %v2656_v60 = vadd.f32 %v2528_v16, %v1887_v30  ;;  %v3614_v16 = vld [vmem:[%s3795_s28 + $0x2c8] sm:$0xff] }
 0x39c   : > { %v3185_v53 = vpack.c.bf16 %v2651_v63, %v2650_v0  ;;  %2288 = vperm.xlu1 %3522, %v3604_v13   ;;  %v6492_v63 = vld [vmem:[#allocation26_spill] sm:$0xff] }
 0x39d   : > { %3423 = vst [vmem:[%s5038_s8 + $0x88] sm:$0xff] %v3175_v49   ;;  %2292 = vperm.xlu2 %3520, %v3605_v48   ;;  %2308 = vperm.xlu0 %3521, %v3606_v40   ;;  %v1757_v1 = vmul.f32 %v4995_v17, %v6492_v63  ;;  %v1758_v49 = vmul.f32 %v4995_v17, %v6493_v9  ;;  %v3611_v40 = vld [vmem:[%s3795_s28 + $0x2b0] sm:$0xff] }
 0x39e   : > { %3425 = vst [vmem:[%s5038_s8 + $0x98] sm:$0xff] %v3185_v53   ;;  %v2121_v36 = vpop.permute.xlu1 %2120 }
 0x39f   : > { %v2521_v7 = vmul.f32 %v5001_v23, %v2121_v36  ;;  %v5330_v2 = vpop.permute.xlu2 %2160  ;;  %v2141_v31 = vpop.permute.xlu0 %2140  ;;  %v3612_v36 = vld [vmem:[%s3795_s28 + $0x2d0] sm:$0xff] }
 0x3a0   : > { %v2526_v48 = vmul.f32 %v5001_v23, %v2141_v31  ;;  %v2531_v21 = vmul.f32 %v5001_v23, %v5330_v2 }
 0x3a1   : > { %v2649_v37 = vadd.f32 %v2521_v7, %v1880_v5  ;;  %v1885_v5 = vadd.f32 %v1757_v1, %v1116_v34  ;;  %v1886_v7 = vadd.f32 %v1758_v49, %v1117_v3  ;;  %v6504_v49 = vld [vmem:[#allocation38_spill] sm:$0xff] }
 0x3a3   : > { %v3180_v12 = vpack.c.bf16 %v2649_v37, %v2648_v28  ;;  %v989_v28 = vmul.f32 %v4993_v11, %v6494_v46  ;;  %v6495_v37 = vld [vmem:[#allocation89_spill] sm:$0xff]  ;;  %v2654_v61 = vadd.f32 %v2526_v48, %v1885_v5  ;;  %v3616_v48 = vld [vmem:[%s3795_s28 + $0x2d8] sm:$0xff] }
 0x3a4   : > { %2300 = vperm.xlu1 %3522, %v3607_v22   ;;  %v988_v31 = vmul.f32 %v4993_v11, %v6495_v37  ;;  %v6500_v22 = vld [vmem:[#allocation27_spill] sm:$0xff]  ;;  %v3617_v5 = vld [vmem:[%s3795_s28 + $0x2e0] sm:$0xff] }
 0x3a5   : > { %3424 = vst [vmem:[%s5038_s8 + $0x90] sm:$0xff] %v3180_v12   ;;  %2304 = vperm.xlu2 %3520, %v3608_v18   ;;  %2320 = vperm.xlu0 %3521, %v3609_v8   ;;  %v6498_v12 = vld [vmem:[#allocation20_spill] sm:$0xff]  ;;  %v1765_v15 = vmul.f32 %v4995_v17, %v6500_v22  ;;  %v3613_v18 = vld [vmem:[%s3795_s28 + $0x2c0] sm:$0xff]  ;;  %v1121_v8 = vadd.f32 %v5006_v50, %v989_v28 }
 0x3a6   : > { %v2133_v45 = vpop.permute.xlu1 %2132  ;;  %v1762_v25 = vmul.f32 %v4995_v17, %v6498_v12  ;;  %v1120_v41 = vadd.f32 %v5006_v50, %v988_v31  ;;  %v6508_v12 = vld [vmem:[#allocation88_spill] sm:$0xff] }
 0x3a7   : > { %v2524_v10 = vmul.f32 %v5001_v23, %v2133_v45  ;;  %v2173_v19 = vpop.permute.xlu2 %2172  ;;  %v2153_v62 = vpop.permute.xlu0 %2152  ;;  %v3615_v45 = vld [vmem:[%s3795_s28 + $0x2e8] sm:$0xff]  ;;  %v1893_v2 = vadd.f32 %v1765_v15, %v1124_v44  ;;  %v6511_v15 = vld [vmem:[#allocation43_spill] sm:$0xff] }
 0x3a8   : > { %v2529_v54 = vmul.f32 %v5001_v23, %v2153_v62  ;;  %v1890_v30 = vadd.f32 %v1762_v25, %v1121_v8  ;;  %v998_v25 = vmul.f32 %v4993_v11, %v6508_v12  ;;  %v1767_v24 = vmul.f32 %v4995_v17, %v6511_v15  ;;  %v6521_v15 = vld [vmem:[#allocation126_spill] sm:$0xff] }
 0x3a9   : > { %v2652_v47 = vadd.f32 %v2524_v10, %v1883_v58  ;;  %v1125_v58 = vadd.f32 %v5006_v50, %v993_v55  ;;  %v2534_v10 = vmul.f32 %v5001_v23, %v2173_v19 }
 0x3aa   : > { %v2657_v0 = vadd.f32 %v2529_v54, %v1888_v4  ;;  %v1889_v4 = vadd.f32 %v1761_v6, %v1120_v41  ;;  %v999_v6 = vmul.f32 %v4993_v11, %v6509_v20  ;;  %v6513_v41 = vld [vmem:[#allocation56_spill] sm:$0xff] }
 0x3ab   : > { %v3190_v53 = vpack.c.bf16 %v2653_v38, %v2652_v47  ;;  %v1894_v39 = vadd.f32 %v1766_v14, %v1125_v58  ;;  %v6502_v38 = vld [vmem:[#allocation95_spill] sm:$0xff]  ;;  %v2662_v1 = vadd.f32 %v2534_v10, %v1893_v2  ;;  %v3620_v10 = vld [vmem:[%s3795_s28 + $0x2f8] sm:$0xff] }
 0x3ac   : > { %v3200_v13 = vpack.c.bf16 %v2657_v0, %v2656_v60  ;;  %2312 = vperm.xlu1 %3522, %v3610_v52   ;;  %v991_v47 = vmul.f32 %v4993_v11, %v6502_v38  ;;  %v6503_v60 = vld [vmem:[#allocation96_spill] sm:$0xff]  ;;  %v2659_v0 = vadd.f32 %v2531_v21, %v1890_v30  ;;  %v1772_v21 = vmul.f32 %v4995_v17, %v6513_v41 }
 0x3ad   : > { %3426 = vst [vmem:[%s5038_s8 + $0xa0] sm:$0xff] %v3190_v53   ;;  %2316 = vperm.xlu2 %3520, %v3611_v40   ;;  %2332 = vperm.xlu0 %3521, %v3612_v36   ;;  %v990_v19 = vmul.f32 %v4993_v11, %v6503_v60  ;;  %v1763_v53 = vmul.f32 %v4995_v17, %v6504_v49 }
 0x3ae   : > { %3428 = vst [vmem:[%s5038_s8 + $0xb0] sm:$0xff] %v3200_v13   ;;  %v2145_v57 = vpop.permute.xlu1 %2144  ;;  %v6505_v13 = vld [vmem:[#allocation37_spill] sm:$0xff]  ;;  %v1123_v40 = vadd.f32 %v5006_v50, %v991_v47  ;;  %v1130_v30 = vadd.f32 %v5006_v50, %v998_v25 }
 0x3af   : > { %v2527_v26 = vmul.f32 %v5001_v23, %v2145_v57  ;;  %v5378_v51 = vpop.permute.xlu2 %2184  ;;  %v2165_v59 = vpop.permute.xlu0 %2164  ;;  %v1764_v52 = vmul.f32 %v4995_v17, %v6505_v13  ;;  %v1122_v36 = vadd.f32 %v5006_v50, %v990_v19  ;;  %v6519_v25 = vld [vmem:[#allocation113_spill] sm:$0xff] }
 0x3b0   : > { %v2532_v57 = vmul.f32 %v5001_v23, %v2165_v59  ;;  %v994_v59 = vmul.f32 %v4993_v11, %v6507_v56  ;;  %v2537_v58 = vmul.f32 %v5001_v23, %v5378_v51 }
 0x3b1   : > { %v2655_v35 = vadd.f32 %v2527_v26, %v1886_v7  ;;  %v3618_v7 = vld [vmem:[%s3795_s28 + $0x300] sm:$0xff]  ;;  %v1891_v46 = vadd.f32 %v1763_v53, %v1122_v36  ;;  %v1892_v28 = vadd.f32 %v1764_v52, %v1123_v40  ;;  %v6516_v52 = vld [vmem:[#allocation50_spill] sm:$0xff] }
 0x3b2   : > { %v1126_v44 = vadd.f32 %v5006_v50, %v994_v59 }
 0x3b3   : > { %v3195_v27 = vpack.c.bf16 %v2655_v35, %v2654_v61  ;;  %v6506_v35 = vld [vmem:[#allocation82_spill] sm:$0xff]  ;;  %v2660_v42 = vadd.f32 %v2532_v57, %v1891_v46 }
 0x3b4   : > { %2324 = vperm.xlu1 %3522, %v3613_v18   ;;  %v995_v29 = vmul.f32 %v4993_v11, %v6506_v35  ;;  %v6512_v18 = vld [vmem:[#allocation39_spill] sm:$0xff]  ;;  %v3622_v57 = vld [vmem:[%s3795_s28 + $0x308] sm:$0xff] }
 0x3b5   : > { %3427 = vst [vmem:[%s5038_s8 + $0xa8] sm:$0xff] %v3195_v27   ;;  %2328 = vperm.xlu2 %3520, %v3614_v16   ;;  %2344 = vperm.xlu0 %3521, %v3615_v45   ;;  %v6510_v27 = vld [vmem:[#allocation33_spill] sm:$0xff]  ;;  %v1771_v8 = vmul.f32 %v4995_v17, %v6512_v18  ;;  %v3619_v16 = vld [vmem:[%s3795_s28 + $0x2f0] sm:$0xff] }
 0x3b6   : > { %v2157_v62 = vpop.permute.xlu1 %2156  ;;  %v1768_v22 = vmul.f32 %v4995_v17, %v6510_v27  ;;  %v1127_v45 = vadd.f32 %v5006_v50, %v995_v29  ;;  %v6520_v27 = vld [vmem:[#allocation100_spill] sm:$0xff] }
 0x3b7   : > { %v2530_v54 = vmul.f32 %v5001_v23, %v2157_v62  ;;  %v2197_v33 = vpop.permute.xlu2 %2196  ;;  %v2177_v43 = vpop.permute.xlu0 %2176  ;;  %v3621_v62 = vld [vmem:[%s3795_s28 + $0x318] sm:$0xff]  ;;  %v1899_v51 = vadd.f32 %v1771_v8, %v1130_v30  ;;  %v6523_v8 = vld [vmem:[#allocation55_spill] sm:$0xff] }
 0x3b8   : > { %v2535_v32 = vmul.f32 %v5001_v23, %v2177_v43  ;;  %v1896_v2 = vadd.f32 %v1768_v22, %v1127_v45  ;;  %v1004_v22 = vmul.f32 %v4993_v11, %v6520_v27  ;;  %v1773_v41 = vmul.f32 %v4995_v17, %v6523_v8  ;;  %v6533_v8 = vld [vmem:[#allocation138_spill] sm:$0xff] }
 0x3b9   : > { %v2658_v63 = vadd.f32 %v2530_v54, %v1889_v4  ;;  %v1131_v4 = vadd.f32 %v5006_v50, %v999_v6  ;;  %v2540_v54 = vmul.f32 %v5001_v23, %v2197_v33 }
 0x3ba   : > { %v2663_v9 = vadd.f32 %v2535_v32, %v1894_v39  ;;  %v1895_v39 = vadd.f32 %v1767_v24, %v1126_v44  ;;  %v2665_v33 = vadd.f32 %v2537_v58, %v1896_v2  ;;  %v1005_v24 = vmul.f32 %v4993_v11, %v6521_v15  ;;  %v6525_v44 = vld [vmem:[#allocation68_spill] sm:$0xff] }
 0x3bb   : > { %v3205_v3 = vpack.c.bf16 %v2659_v0, %v2658_v63  ;;  %v1900_v60 = vadd.f32 %v1772_v21, %v1131_v4  ;;  %v6514_v0 = vld [vmem:[#allocation107_spill] sm:$0xff]  ;;  %v2668_v53 = vadd.f32 %v2540_v54, %v1899_v51  ;;  %v1778_v58 = vmul.f32 %v4995_v17, %v6525_v44  ;;  %v3627_v54 = vld [vmem:[%s3795_s28 + $0x328] sm:$0xff] }
 0x3bc   : > { %v3215_v34 = vpack.c.bf16 %v2663_v9, %v2662_v1  ;;  %2336 = vperm.xlu1 %3522, %v3616_v48   ;;  %v997_v63 = vmul.f32 %v4993_v11, %v6514_v0  ;;  %v6515_v1 = vld [vmem:[#allocation108_spill] sm:$0xff] }
 0x3bd   : > { %3429 = vst [vmem:[%s5038_s8 + $0xb8] sm:$0xff] %v3205_v3   ;;  %2340 = vperm.xlu2 %3520, %v3617_v5   ;;  %2356 = vperm.xlu0 %3521, %v3618_v7   ;;  %v996_v9 = vmul.f32 %v4993_v11, %v6515_v1  ;;  %v1769_v3 = vmul.f32 %v4995_v17, %v6516_v52  ;;  %v5470_v7 = vld [vmem:[%s6013_s2] ss:$0 sm:$0xff] }
 0x3be   : > { %3431 = vst [vmem:[%s5038_s8 + $0xc8] sm:$0xff] %v3215_v34   ;;  %v2169_v26 = vpop.permute.xlu1 %2168  ;;  %v6517_v34 = vld [vmem:[#allocation49_spill] sm:$0xff]  ;;  %v1129_v5 = vadd.f32 %v5006_v50, %v997_v63  ;;  %v1136_v2 = vadd.f32 %v5470_v7, %v1004_v22 }
 0x3bf   : > { %v2533_v37 = vmul.f32 %v5001_v23, %v2169_v26  ;;  %v5426_v31 = vpop.permute.xlu2 %2208  ;;  %v2189_v61 = vpop.permute.xlu0 %2188  ;;  %v1770_v48 = vmul.f32 %v4995_v17, %v6517_v34  ;;  %v1128_v26 = vadd.f32 %v5470_v7, %v996_v9  ;;  %v6531_v22 = vld [vmem:[#allocation125_spill] sm:$0xff] }
 0x3c0   : > { %v2538_v46 = vmul.f32 %v5001_v23, %v2189_v61  ;;  %v1000_v61 = vmul.f32 %v4993_v11, %v6519_v25  ;;  %v2543_v4 = vmul.f32 %v5001_v23, %v5426_v31 }
 0x3c1   : > { %v2661_v55 = vadd.f32 %v2533_v37, %v1892_v28  ;;  %v3624_v28 = vld [vmem:[%s3795_s28 + $0x310] sm:$0xff]  ;;  %v1897_v29 = vadd.f32 %v1769_v3, %v1128_v26  ;;  %v1898_v56 = vadd.f32 %v1770_v48, %v1129_v5  ;;  %v6528_v48 = vld [vmem:[#allocation62_spill] sm:$0xff] }
 0x3c2   : > { %v3625_v37 = vld [vmem:[%s3795_s28 + $0x330] sm:$0xff]  ;;  %v1132_v30 = vadd.f32 %v5470_v7, %v1000_v61 }
 0x3c3   : > { %v3210_v14 = vpack.c.bf16 %v2661_v55, %v2660_v42  ;;  %v6518_v55 = vld [vmem:[#allocation94_spill] sm:$0xff]  ;;  %v2666_v20 = vadd.f32 %v2538_v46, %v1897_v29  ;;  %v3629_v46 = vld [vmem:[%s3795_s28 + $0x338] sm:$0xff]  ;;  %v3630_v29 = vld [vmem:[%s3795_s28 + $0x340] sm:$0xff] }
 0x3c4   : > { %2348 = vperm.xlu1 %3522, %v3619_v16   ;;  %v1001_v12 = vmul.f32 %v4993_v11, %v6518_v55  ;;  %v6524_v16 = vld [vmem:[#allocation51_spill] sm:$0xff] }
 0x3c5   : > { %3430 = vst [vmem:[%s5038_s8 + $0xc0] sm:$0xff] %v3210_v14   ;;  %2352 = vperm.xlu2 %3520, %v3620_v10   ;;  %2368 = vperm.xlu0 %3521, %v3621_v62   ;;  %v6522_v14 = vld [vmem:[#allocation45_spill] sm:$0xff]  ;;  %v1777_v45 = vmul.f32 %v4995_v17, %v6524_v16 }
 0x3c6   : > { %v2181_v43 = vpop.permute.xlu1 %2180  ;;  %v1774_v18 = vmul.f32 %v4995_v17, %v6522_v14  ;;  %v3626_v10 = vld [vmem:[%s3795_s28 + $0x320] sm:$0xff]  ;;  %v1133_v62 = vadd.f32 %v5470_v7, %v1001_v12  ;;  %v6532_v14 = vld [vmem:[#allocation112_spill] sm:$0xff] }
 0x3c7   : > { %v2536_v32 = vmul.f32 %v5001_v23, %v2181_v43  ;;  %v2221_v38 = vpop.permute.xlu2 %2220  ;;  %v2201_v47 = vpop.permute.xlu0 %2200  ;;  %v3628_v43 = vld [vmem:[%s3795_s28 + $0x348] sm:$0xff]  ;;  %v1905_v31 = vadd.f32 %v1777_v45, %v1136_v2  ;;  %v6535_v45 = vld [vmem:[#allocation67_spill] sm:$0xff] }
 0x3c8   : > { %v2541_v19 = vmul.f32 %v5001_v23, %v2201_v47  ;;  %v1902_v51 = vadd.f32 %v1774_v18, %v1133_v62  ;;  %v1010_v18 = vmul.f32 %v4993_v11, %v6532_v14  ;;  %v1779_v44 = vmul.f32 %v4995_v17, %v6535_v45  ;;  %v6545_v45 = vld [vmem:[#allocation150_spill] sm:$0xff] }
 0x3c9   : > { %v2664_v49 = vadd.f32 %v2536_v32, %v1895_v39  ;;  %v1137_v39 = vadd.f32 %v5470_v7, %v1005_v24  ;;  %v2546_v32 = vmul.f32 %v5001_v23, %v2221_v38 }
 0x3ca   : > { %v2669_v13 = vadd.f32 %v2541_v19, %v1900_v60  ;;  %v1901_v60 = vadd.f32 %v1773_v41, %v1132_v30  ;;  %v1011_v41 = vmul.f32 %v4993_v11, %v6533_v8  ;;  %v6537_v30 = vld [vmem:[#allocation80_spill] sm:$0xff] }
 0x3cb   : > { %v3220_v40 = vpack.c.bf16 %v2665_v33, %v2664_v49  ;;  %v1906_v1 = vadd.f32 %v1778_v58, %v1137_v39  ;;  %v6526_v33 = vld [vmem:[#allocation119_spill] sm:$0xff]  ;;  %v2674_v3 = vadd.f32 %v2546_v32, %v1905_v31  ;;  %v3633_v32 = vld [vmem:[%s3795_s28 + $0x358] sm:$0xff] }
 0x3cc   : > { %v3230_v36 = vpack.c.bf16 %v2669_v13, %v2668_v53  ;;  %2360 = vperm.xlu1 %3522, %v3622_v57   ;;  %v1003_v49 = vmul.f32 %v4993_v11, %v6526_v33  ;;  %v6527_v53 = vld [vmem:[#allocation120_spill] sm:$0xff]  ;;  %v2671_v13 = vadd.f32 %v2543_v4, %v1902_v51  ;;  %v1784_v4 = vmul.f32 %v4995_v17, %v6537_v30 }
 0x3cd   : > { %3432 = vst [vmem:[%s5038_s8 + $0xd0] sm:$0xff] %v3220_v40   ;;  %2364 = vperm.xlu2 %3520, %v3624_v28   ;;  %2380 = vperm.xlu0 %3521, %v3625_v37   ;;  %v1002_v38 = vmul.f32 %v4993_v11, %v6527_v53  ;;  %v1775_v40 = vmul.f32 %v4995_v17, %v6528_v48 }
 0x3ce   : > { %3434 = vst [vmem:[%s5038_s8 + $0xe0] sm:$0xff] %v3230_v36   ;;  %v2193_v35 = vpop.permute.xlu1 %2192  ;;  %v6529_v36 = vld [vmem:[#allocation61_spill] sm:$0xff]  ;;  %v1135_v28 = vadd.f32 %v5470_v7, %v1003_v49  ;;  %v1142_v51 = vadd.f32 %v5470_v7, %v1010_v18 }
 0x3cf   : > { %v2539_v50 = vmul.f32 %v5001_v23, %v2193_v35  ;;  %v5479_v59 = vpop.permute.xlu2 %2232  ;;  %v2213_v42 = vpop.permute.xlu0 %2212  ;;  %v1776_v57 = vmul.f32 %v4995_v17, %v6529_v36  ;;  %v1134_v37 = vadd.f32 %v5470_v7, %v1002_v38  ;;  %v6543_v18 = vld [vmem:[#allocation137_spill] sm:$0xff] }
 0x3d0   : > { %v2544_v35 = vmul.f32 %v5001_v23, %v2213_v42  ;;  %v1006_v42 = vmul.f32 %v4993_v11, %v6531_v22  ;;  %v2549_v39 = vmul.f32 %v5001_v23, %v5479_v59 }
 0x3d1   : > { %v2667_v6 = vadd.f32 %v2539_v50, %v1898_v56  ;;  %v3631_v56 = vld [vmem:[%s3795_s28 + $0x360] sm:$0xff]  ;;  %v1903_v55 = vadd.f32 %v1775_v40, %v1134_v37  ;;  %v1904_v12 = vadd.f32 %v1776_v57, %v1135_v28  ;;  %v6540_v57 = vld [vmem:[#allocation74_spill] sm:$0xff] }
 0x3d2   : > { %v1138_v2 = vadd.f32 %v5470_v7, %v1006_v42 }
 0x3d3   : > { %v3225_v21 = vpack.c.bf16 %v2667_v6, %v2666_v20  ;;  %v6530_v6 = vld [vmem:[#allocation106_spill] sm:$0xff]  ;;  %v2672_v15 = vadd.f32 %v2544_v35, %v1903_v55  ;;  %v3636_v55 = vld [vmem:[%s3795_s28 + $0x370] sm:$0xff] }
 0x3d4   : > { %2372 = vperm.xlu1 %3522, %v3626_v10   ;;  %v1007_v27 = vmul.f32 %v4993_v11, %v6530_v6  ;;  %v6536_v10 = vld [vmem:[#allocation63_spill] sm:$0xff]  ;;  %v3635_v35 = vld [vmem:[%s3795_s28 + $0x368] sm:$0xff] }
 0x3d5   : > { %3433 = vst [vmem:[%s5038_s8 + $0xd8] sm:$0xff] %v3225_v21   ;;  %2376 = vperm.xlu2 %3520, %v3627_v54   ;;  %2392 = vperm.xlu0 %3521, %v3628_v43   ;;  %v6534_v21 = vld [vmem:[#allocation57_spill] sm:$0xff]  ;;  %v1783_v62 = vmul.f32 %v4995_v17, %v6536_v10  ;;  %v3632_v54 = vld [vmem:[%s3795_s28 + $0x350] sm:$0xff] }
 0x3d6   : > { %v2205_v47 = vpop.permute.xlu1 %2204  ;;  %v1780_v16 = vmul.f32 %v4995_v17, %v6534_v21  ;;  %v1139_v43 = vadd.f32 %v5470_v7, %v1007_v27  ;;  %v6544_v21 = vld [vmem:[#allocation124_spill] sm:$0xff] }
 0x3d7   : > { %v2542_v19 = vmul.f32 %v5001_v23, %v2205_v47  ;;  %v2245_v0 = vpop.permute.xlu2 %2244  ;;  %v2225_v63 = vpop.permute.xlu0 %2224  ;;  %v3634_v47 = vld [vmem:[%s3795_s28 + $0x378] sm:$0xff]  ;;  %v1911_v59 = vadd.f32 %v1783_v62, %v1142_v51  ;;  %v6547_v62 = vld [vmem:[#allocation79_spill] sm:$0xff] }
 0x3d8   : > { %v2547_v9 = vmul.f32 %v5001_v23, %v2225_v63  ;;  %v1908_v31 = vadd.f32 %v1780_v16, %v1139_v43  ;;  %v1016_v16 = vmul.f32 %v4993_v11, %v6544_v21  ;;  %v1785_v30 = vmul.f32 %v4995_v17, %v6547_v62  ;;  %v6557_v62 = vld [vmem:[#allocation161_spill] sm:$0xff] }
 0x3d9   : > { %v2670_v52 = vadd.f32 %v2542_v19, %v1901_v60  ;;  %v1143_v60 = vadd.f32 %v5470_v7, %v1011_v41  ;;  %v2552_v19 = vmul.f32 %v5001_v23, %v2245_v0 }
 0x3da   : > { %v2675_v34 = vadd.f32 %v2547_v9, %v1906_v1  ;;  %v1907_v1 = vadd.f32 %v1779_v44, %v1138_v2  ;;  %v1017_v44 = vmul.f32 %v4993_v11, %v6545_v45  ;;  %v6549_v2 = vld [vmem:[#allocation92_spill] sm:$0xff] }
 0x3db   : > { %v3235_v5 = vpack.c.bf16 %v2671_v13, %v2670_v52  ;;  %v1912_v53 = vadd.f32 %v1784_v4, %v1143_v60  ;;  %v6538_v13 = vld [vmem:[#allocation131_spill] sm:$0xff]  ;;  %v2680_v40 = vadd.f32 %v2552_v19, %v1911_v59  ;;  %v3639_v19 = vld [vmem:[%s3795_s28 + $0x388] sm:$0xff] }
 0x3dc   : > { %v3245_v26 = vpack.c.bf16 %v2675_v34, %v2674_v3  ;;  %2384 = vperm.xlu1 %3522, %v3629_v46   ;;  %v1009_v52 = vmul.f32 %v4993_v11, %v6538_v13  ;;  %v6539_v3 = vld [vmem:[#allocation132_spill] sm:$0xff]  ;;  %v2677_v34 = vadd.f32 %v2549_v39, %v1908_v31  ;;  %v1790_v39 = vmul.f32 %v4995_v17, %v6549_v2 }
 0x3dd   : > { %3435 = vst [vmem:[%s5038_s8 + $0xe8] sm:$0xff] %v3235_v5   ;;  %2388 = vperm.xlu2 %3520, %v3630_v29   ;;  %2404 = vperm.xlu0 %3521, %v3631_v56   ;;  %v1008_v0 = vmul.f32 %v4993_v11, %v6539_v3  ;;  %v1781_v5 = vmul.f32 %v4995_v17, %v6540_v57 }
 0x3de   : > { %3437 = vst [vmem:[%s5038_s8 + $0xf8] sm:$0xff] %v3245_v26   ;;  %v2217_v50 = vpop.permute.xlu1 %2216  ;;  %v6541_v26 = vld [vmem:[#allocation73_spill] sm:$0xff]  ;;  %v1141_v29 = vadd.f32 %v5470_v7, %v1009_v52  ;;  %v1148_v31 = vadd.f32 %v5470_v7, %v1016_v16 }
 0x3df   : > { %v2545_v25 = vmul.f32 %v5001_v23, %v2217_v50  ;;  %v5527_v61 = vpop.permute.xlu2 %2256  ;;  %v2237_v20 = vpop.permute.xlu0 %2236  ;;  %v1782_v46 = vmul.f32 %v4995_v17, %v6541_v26  ;;  %v1140_v56 = vadd.f32 %v5470_v7, %v1008_v0  ;;  %v6555_v16 = vld [vmem:[#allocation149_spill] sm:$0xff] }
 0x3e0   : > { %v2550_v50 = vmul.f32 %v5001_v23, %v2237_v20  ;;  %v1012_v20 = vmul.f32 %v4993_v11, %v6543_v18  ;;  %v2555_v60 = vmul.f32 %v5001_v23, %v5527_v61 }
 0x3e1   : > { %v2673_v24 = vadd.f32 %v2545_v25, %v1904_v12  ;;  %v3637_v12 = vld [vmem:[%s3795_s28 + $0x390] sm:$0xff]  ;;  %v1909_v6 = vadd.f32 %v1781_v5, %v1140_v56  ;;  %v1910_v27 = vadd.f32 %v1782_v46, %v1141_v29  ;;  %v6552_v46 = vld [vmem:[#allocation86_spill] sm:$0xff] }
 0x3e2   : > { %v1144_v51 = vadd.f32 %v5470_v7, %v1012_v20 }
 0x3e3   : > { %v3240_v58 = vpack.c.bf16 %v2673_v24, %v2672_v15  ;;  %v6542_v24 = vld [vmem:[#allocation118_spill] sm:$0xff]  ;;  %v2678_v8 = vadd.f32 %v2550_v50, %v1909_v6  ;;  %v3641_v50 = vld [vmem:[%s3795_s28 + $0x398] sm:$0xff]  ;;  %v3642_v6 = vld [vmem:[%s3795_s28 + $0x3a0] sm:$0xff] }
 0x3e4   : > { %2396 = vperm.xlu1 %3522, %v3632_v54   ;;  %v1013_v14 = vmul.f32 %v4993_v11, %v6542_v24  ;;  %v6548_v54 = vld [vmem:[#allocation75_spill] sm:$0xff] }
 0x3e5   : > { %3436 = vst [vmem:[%s5038_s8 + $0xf0] sm:$0xff] %v3240_v58   ;;  %2400 = vperm.xlu2 %3520, %v3633_v32   ;;  %2416 = vperm.xlu0 %3521, %v3634_v47   ;;  %v6546_v58 = vld [vmem:[#allocation69_spill] sm:$0xff]  ;;  %v1789_v43 = vmul.f32 %v4995_v17, %v6548_v54 }
 0x3e6   : > { %v2229_v63 = vpop.permute.xlu1 %2228  ;;  %v1786_v10 = vmul.f32 %v4995_v17, %v6546_v58  ;;  %v3638_v32 = vld [vmem:[%s3795_s28 + $0x380] sm:$0xff]  ;;  %v1145_v47 = vadd.f32 %v5470_v7, %v1013_v14  ;;  %v6556_v58 = vld [vmem:[#allocation136_spill] sm:$0xff] }
 0x3e7   : > { %v2548_v9 = vmul.f32 %v5001_v23, %v2229_v63  ;;  %v2269_v33 = vpop.permute.xlu2 %2268  ;;  %v2249_v49 = vpop.permute.xlu0 %2248  ;;  %v3640_v63 = vld [vmem:[%s3795_s28 + $0x3a8] sm:$0xff]  ;;  %v1917_v61 = vadd.f32 %v1789_v43, %v1148_v31  ;;  %v6559_v43 = vld [vmem:[#allocation91_spill] sm:$0xff] }
 0x3e8   : > { %v2553_v38 = vmul.f32 %v5001_v23, %v2249_v49  ;;  %v1914_v59 = vadd.f32 %v1786_v10, %v1145_v47  ;;  %v1022_v10 = vmul.f32 %v4993_v11, %v6556_v58  ;;  %v1791_v2 = vmul.f32 %v4995_v17, %v6559_v43  ;;  %v6569_v43 = vld [vmem:[#allocation168_spill] sm:$0xff] }
 0x3e9   : > { %v2676_v48 = vadd.f32 %v2548_v9, %v1907_v1  ;;  %v1149_v1 = vadd.f32 %v5470_v7, %v1017_v44  ;;  %v2558_v9 = vmul.f32 %v5001_v23, %v2269_v33 }
 0x3ea   : > { %v2681_v36 = vadd.f32 %v2553_v38, %v1912_v53  ;;  %v1913_v53 = vadd.f32 %v1785_v30, %v1144_v51  ;;  %v1023_v30 = vmul.f32 %v4993_v11, %v6557_v62  ;;  %v6561_v51 = vld [vmem:[#allocation104_spill] sm:$0xff] }
 0x3eb   : > { %v3250_v28 = vpack.c.bf16 %v2677_v34, %v2676_v48  ;;  %v1918_v3 = vadd.f32 %v1790_v39, %v1149_v1  ;;  %v6550_v34 = vld [vmem:[#allocation143_spill] sm:$0xff]  ;;  %v2686_v5 = vadd.f32 %v2558_v9, %v1917_v61  ;;  %v3645_v9 = vld [vmem:[%s3795_s28 + $0x3b8] sm:$0xff] }
 0x3ec   : > { %v3260_v37 = vpack.c.bf16 %v2681_v36, %v2680_v40  ;;  %2408 = vperm.xlu1 %3522, %v3635_v35   ;;  %v1015_v48 = vmul.f32 %v4993_v11, %v6550_v34  ;;  %v6551_v40 = vld [vmem:[#allocation144_spill] sm:$0xff]  ;;  %v2683_v36 = vadd.f32 %v2555_v60, %v1914_v59  ;;  %v1796_v60 = vmul.f32 %v4995_v17, %v6561_v51 }
 0x3ed   : > { %3438 = vst [vmem:[%s5038_s8 + $0x100] sm:$0xff] %v3250_v28   ;;  %2412 = vperm.xlu2 %3520, %v3636_v55   ;;  %2428 = vperm.xlu0 %3521, %v3637_v12   ;;  %v1014_v33 = vmul.f32 %v4993_v11, %v6551_v40  ;;  %v1787_v28 = vmul.f32 %v4995_v17, %v6552_v46 }
 0x3ee   : > { %3440 = vst [vmem:[%s5038_s8 + $0x110] sm:$0xff] %v3260_v37   ;;  %v2241_v25 = vpop.permute.xlu1 %2240  ;;  %v6553_v37 = vld [vmem:[#allocation85_spill] sm:$0xff]  ;;  %v1147_v55 = vadd.f32 %v5470_v7, %v1015_v48  ;;  %v1154_v59 = vadd.f32 %v5470_v7, %v1022_v10  ;;  %v6567_v10 = vld [vmem:[#allocation160_spill] sm:$0xff] }
 0x3ef   : > { %v2551_v22 = vmul.f32 %v5001_v23, %v2241_v25  ;;  %v5575_v42 = vpop.permute.xlu2 %2280  ;;  %v2261_v15 = vpop.permute.xlu0 %2260  ;;  %v1788_v35 = vmul.f32 %v4995_v17, %v6553_v37  ;;  %v1146_v12 = vadd.f32 %v5470_v7, %v1014_v33 }
 0x3f0   : > { %v2556_v25 = vmul.f32 %v5001_v23, %v2261_v15  ;;  %v1018_v15 = vmul.f32 %v4993_v11, %v6555_v16  ;;  %v2561_v1 = vmul.f32 %v5001_v23, %v5575_v42 }
 0x3f1   : > { %v2679_v41 = vadd.f32 %v2551_v22, %v1910_v27  ;;  %v3643_v27 = vld [vmem:[%s3795_s28 + $0x3c0] sm:$0xff]  ;;  %v1915_v24 = vadd.f32 %v1787_v28, %v1146_v12  ;;  %v1916_v14 = vadd.f32 %v1788_v35, %v1147_v55  ;;  %v6564_v35 = vld [vmem:[#allocation98_spill] sm:$0xff] }
 0x3f2   : > { %v1150_v31 = vadd.f32 %v5470_v7, %v1018_v15 }
 0x3f3   : > { %v3255_v4 = vpack.c.bf16 %v2679_v41, %v2678_v8  ;;  %v6554_v41 = vld [vmem:[#allocation130_spill] sm:$0xff]  ;;  %v2684_v45 = vadd.f32 %v2556_v25, %v1915_v24  ;;  %v3648_v24 = vld [vmem:[%s3795_s28 + $0x3d0] sm:$0xff] }
 0x3f4   : > { %2420 = vperm.xlu1 %3522, %v3638_v32   ;;  %v1019_v21 = vmul.f32 %v4993_v11, %v6554_v41  ;;  %v6560_v32 = vld [vmem:[#allocation87_spill] sm:$0xff]  ;;  %v3647_v25 = vld [vmem:[%s3795_s28 + $0x3c8] sm:$0xff] }
 0x3f5   : > { %3439 = vst [vmem:[%s5038_s8 + $0x108] sm:$0xff] %v3255_v4   ;;  %2424 = vperm.xlu2 %3520, %v3639_v19   ;;  %2440 = vperm.xlu0 %3521, %v3640_v63   ;;  %v6558_v4 = vld [vmem:[#allocation81_spill] sm:$0xff]  ;;  %v1795_v47 = vmul.f32 %v4995_v17, %v6560_v32  ;;  %v3644_v19 = vld [vmem:[%s3795_s28 + $0x3b0] sm:$0xff] }
 0x3f6   : > { %v2253_v49 = vpop.permute.xlu1 %2252  ;;  %v1792_v54 = vmul.f32 %v4995_v17, %v6558_v4  ;;  %v1151_v63 = vadd.f32 %v5470_v7, %v1019_v21  ;;  %v6568_v4 = vld [vmem:[#allocation148_spill] sm:$0xff] }
 0x3f7   : > { %v2554_v38 = vmul.f32 %v5001_v23, %v2253_v49  ;;  %v2293_v13 = vpop.permute.xlu2 %2292  ;;  %v2273_v52 = vpop.permute.xlu0 %2272  ;;  %v3646_v49 = vld [vmem:[%s3795_s28 + $0x3d8] sm:$0xff]  ;;  %v1923_v42 = vadd.f32 %v1795_v47, %v1154_v59  ;;  %v6571_v47 = vld [vmem:[#allocation103_spill] sm:$0xff] }
 0x3f8   : > { %v2559_v0 = vmul.f32 %v5001_v23, %v2273_v52  ;;  %v1920_v61 = vadd.f32 %v1792_v54, %v1151_v63  ;;  %v1028_v54 = vmul.f32 %v4993_v11, %v6568_v4  ;;  %v1797_v51 = vmul.f32 %v4995_v17, %v6571_v47 }
 0x3f9   : > { %v2682_v57 = vadd.f32 %v2554_v38, %v1913_v53  ;;  %v1155_v53 = vadd.f32 %v5470_v7, %v1023_v30  ;;  %v2564_v38 = vmul.f32 %v5001_v23, %v2293_v13 }
 0x3fa   : > { %v2687_v26 = vadd.f32 %v2559_v0, %v1918_v3  ;;  %v1919_v3 = vadd.f32 %v1791_v2, %v1150_v31  ;;  %v1029_v2 = vmul.f32 %v4993_v11, %v6569_v43  ;;  %v6573_v31 = vld [vmem:[#allocation116_spill] sm:$0xff] }
 0x3fb   : > { %v3265_v29 = vpack.c.bf16 %v2683_v36, %v2682_v57  ;;  %v1924_v40 = vadd.f32 %v1796_v60, %v1155_v53  ;;  %v6562_v36 = vld [vmem:[#allocation155_spill] sm:$0xff]  ;;  %v2692_v28 = vadd.f32 %v2564_v38, %v1923_v42  ;;  %v3651_v38 = vld [vmem:[%s3795_s28 + $0x3e8] sm:$0xff] }
 0x3fc   : > { %v3275_v56 = vpack.c.bf16 %v2687_v26, %v2686_v5  ;;  %2432 = vperm.xlu1 %3522, %v3641_v50   ;;  %v1021_v57 = vmul.f32 %v4993_v11, %v6562_v36  ;;  %v6563_v5 = vld [vmem:[#allocation156_spill] sm:$0xff]  ;;  %v2689_v26 = vadd.f32 %v2561_v1, %v1920_v61  ;;  %v1802_v1 = vmul.f32 %v4995_v17, %v6573_v31 }
 0x3fd   : > { %3441 = vst [vmem:[%s5038_s8 + $0x118] sm:$0xff] %v3265_v29   ;;  %2436 = vperm.xlu2 %3520, %v3642_v6   ;;  %2452 = vperm.xlu0 %3521, %v3643_v27   ;;  %v1020_v13 = vmul.f32 %v4993_v11, %v6563_v5  ;;  %v1793_v29 = vmul.f32 %v4995_v17, %v6564_v35 }
 0x3fe   : > { %3443 = vst [vmem:[%s5038_s8 + $0x128] sm:$0xff] %v3275_v56   ;;  %v2265_v22 = vpop.permute.xlu1 %2264  ;;  %v6565_v56 = vld [vmem:[#allocation97_spill] sm:$0xff]  ;;  %v1153_v6 = vadd.f32 %v5470_v7, %v1021_v57  ;;  %v1161_v61 = vadd.f32 %v5470_v7, %v1029_v2  ;;  %v6581_v2 = vld [vmem:[#allocation174_spill] sm:$0xff] }
 0x3ff   : > { %v2557_v18 = vmul.f32 %v5001_v23, %v2265_v22  ;;  %v5623_v20 = vpop.permute.xlu2 %2304  ;;  %v2285_v8 = vpop.permute.xlu0 %2284  ;;  %v1794_v50 = vmul.f32 %v4995_v17, %v6565_v56  ;;  %v1152_v27 = vadd.f32 %v5470_v7, %v1020_v13  ;;  %v6574_v13 = vld [vmem:[#allocation164_spill] sm:$0xff]  ;;  %v6576_v56 = vld [vmem:[#allocation110_spill] sm:$0xff] }
 0x400   : > { %v2562_v22 = vmul.f32 %v5001_v23, %v2285_v8  ;;  %v1024_v8 = vmul.f32 %v4993_v11, %v6567_v10  ;;  %v2567_v53 = vmul.f32 %v5001_v23, %v5623_v20  ;;  %v1930_v5 = vadd.f32 %v1802_v1, %v1161_v61  ;;  %v6578_v10 = vld [vmem:[#allocation154_spill] sm:$0xff]  ;;  %v6585_v1 = vld [vmem:[#allocation128_spill] sm:$0xff] }
 0x401   : > { %v2685_v44 = vadd.f32 %v2557_v18, %v1916_v14  ;;  %v3649_v14 = vld [vmem:[%s3795_s28 + $0x3f0] sm:$0xff]  ;;  %v1921_v41 = vadd.f32 %v1793_v29, %v1152_v27  ;;  %v1922_v21 = vadd.f32 %v1794_v50, %v1153_v6  ;;  %v1799_v50 = vmul.f32 %v4995_v17, %v6576_v56  ;;  %v3652_v27 = vld [vmem:[%s3795_s28 + $0x3f8] sm:$0xff]  ;;  %v6589_v56 = vld [vmem:[#allocation121_spill] sm:$0xff] }
 0x402   : > { %v1156_v59 = vadd.f32 %v5470_v7, %v1024_v8  ;;  %v1031_v8 = vmul.f32 %v4993_v11, %v6578_v10 }
 0x403   : > { %v3270_v39 = vpack.c.bf16 %v2685_v44, %v2684_v45  ;;  %v6566_v44 = vld [vmem:[#allocation142_spill] sm:$0xff]  ;;  %v2690_v62 = vadd.f32 %v2562_v22, %v1921_v41 }
 0x404   : > { %2444 = vperm.xlu1 %3522, %v3644_v19   ;;  %v1025_v58 = vmul.f32 %v4993_v11, %v6566_v44  ;;  %v6572_v19 = vld [vmem:[#allocation99_spill] sm:$0xff]  ;;  %v1925_v42 = vadd.f32 %v1797_v51, %v1156_v59 }
 0x405   : > { %3442 = vst [vmem:[%s5038_s8 + $0x120] sm:$0xff] %v3270_v39   ;;  %2448 = vperm.xlu2 %3520, %v3645_v9   ;;  %2464 = vperm.xlu0 %3521, %v3646_v49   ;;  %v6570_v39 = vld [vmem:[#allocation93_spill] sm:$0xff]  ;;  %v1801_v63 = vmul.f32 %v4995_v17, %v6572_v19  ;;  %v6583_v51 = vld [vmem:[#allocation115_spill] sm:$0xff] }
 0x406   : > { %v2277_v52 = vpop.permute.xlu1 %2276  ;;  %v1798_v32 = vmul.f32 %v4995_v17, %v6570_v39  ;;  %v3650_v9 = vld [vmem:[%s3795_s28 + $0x3e0] sm:$0xff]  ;;  %v1157_v49 = vadd.f32 %v5470_v7, %v1025_v58  ;;  %v1035_v39 = vmul.f32 %v4993_v11, %v6581_v2  ;;  %s3668_s28 = sshra.s32 %s3012_s26, 4  ;;  %s3669_s28 = int_to_ptr.hbm [resolvable:$true] %s3668_s28 }
 0x407   : > { %v2560_v0 = vmul.f32 %v5001_v23, %v2277_v52  ;;  %v2317_v34 = vpop.permute.xlu2 %2316  ;;  %v2297_v48 = vpop.permute.xlu0 %2296  ;;  %v1160_v52 = vadd.f32 %v5470_v7, %v1028_v54  ;;  %v6594_v2 = vld [vmem:[#allocation117_spill] sm:$0xff]  ;;  %s3670_s29 = scalar_lea.hbm %s3669_s28, 512  ;;  %p3675_p0 = scmp.lt.s32.totalorder %s3669_s28, %s6014_s3 }
 0x408   : > { %v2565_v33 = vmul.f32 %v5001_v23, %v2297_v48  ;;  %v1926_v48 = vadd.f32 %v1798_v32, %v1157_v49  ;;  %v6582_v32 = vld [vmem:[#allocation105_spill] sm:$0xff]  ;;  %v1163_v49 = vadd.f32 %v5470_v7, %v1031_v8  ;;  %p3671_p11 = scmp.ne.s32.totalorder %s3669_s28, %s3670_s29  ;;  %p3676_p1 = scmp.lt.s32.totalorder %s3674_s5, %s3670_s29 }
 0x409   : > { %v2688_v46 = vadd.f32 %v2560_v0, %v1919_v3  ;;  %v2570_v3 = vmul.f32 %v5001_v23, %v2317_v34  ;;  %v1929_v57 = vadd.f32 %v1801_v63, %v1160_v52  ;;  %v1804_v47 = vmul.f32 %v4995_v17, %v6582_v32  ;;  %v6584_v63 = vld [vmem:[#allocation111_spill] sm:$0xff]  ;;  %v6591_v8 = vld [vmem:[#allocation173_spill] sm:$0xff] }
 0x40a   : > { %v2693_v37 = vadd.f32 %v2565_v33, %v1924_v40  ;;  %v1807_v31 = vmul.f32 %v4995_v17, %v6584_v63  ;;  %v1167_v52 = vadd.f32 %v5470_v7, %v1035_v39  ;;  %v1810_v39 = vmul.f32 %v4995_v17, %v6594_v2  ;;  %v6595_v32 = vld [vmem:[#allocation127_spill] sm:$0xff]  ;;  %v6597_v63 = vld [vmem:[#allocation140_spill] sm:$0xff]  ;;  %p3672_p12 = pnand %p3671_p11, %p3781_p5  ;;  %p3677_p2 = por %p3676_p1, %p3675_p0 }
 0x40b   : > { %v3280_v55 = vpack.c.bf16 %v2689_v26, %v2688_v46  ;;  %v1027_v26 = vmul.f32 %v4993_v11, %v6574_v13  ;;  %v6575_v46 = vld [vmem:[#allocation165_spill] sm:$0xff]  ;;  %v2698_v35 = vadd.f32 %v2570_v3, %v1929_v57  ;;  %v6607_v2 = vld [vmem:[#allocation139_spill] sm:$0xff] }
 0x40c   : > { %v3290_v12 = vpack.c.bf16 %v2693_v37, %v2692_v28  ;;  %2456 = vperm.xlu1 %3522, %v3647_v25   ;;  %v1026_v34 = vmul.f32 %v4993_v11, %v6575_v46  ;;  %v2695_v28 = vadd.f32 %v2567_v53, %v1926_v48  ;;  %p3673_p13 = pneg %p3672_p12 }
 0x40d   : > { %3444 = vst [vmem:[%s5038_s8 + $0x130] sm:$0xff] %v3280_v55   ;;  %2460 = vperm.xlu2 %3520, %v3648_v24   ;;  %2476 = vperm.xlu0 %3521, %v3649_v14   ;;  %v6577_v55 = vld [vmem:[#allocation109_spill] sm:$0xff]  ;;  %v1159_v22 = vadd.f32 %v5470_v7, %v1027_v26  ;;  %v6587_v26 = vld [vmem:[#allocation171_spill] sm:$0xff] }
 0x40e   : > { %3446 = vst [vmem:[%s5038_s8 + $0x140] sm:$0xff] %v3290_v12   ;;  %v2289_v18 = vpop.permute.xlu1 %2288  ;;  %v1800_v12 = vmul.f32 %v4995_v17, %v6577_v55  ;;  %v1158_v24 = vadd.f32 %v5470_v7, %v1026_v34  ;;  %v1032_v46 = vmul.f32 %v4993_v11, %v6587_v26  ;;  %p3678_p3 = pnand %p3677_p2, %p3673_p13 }
 0x40f   : > { %v2563_v16 = vmul.f32 %v5001_v23, %v2289_v18  ;;  %v5671_v15 = vpop.permute.xlu2 %2328  ;;  %v2309_v45 = vpop.permute.xlu0 %2308 }
 0x410   : > { %v2568_v14 = vmul.f32 %v5001_v23, %v2309_v45  ;;  %v1927_v41 = vadd.f32 %v1799_v50, %v1158_v24  ;;  %v6580_v45 = vld [vmem:[#allocation159_spill] sm:$0xff]  ;;  %v2573_v53 = vmul.f32 %v5001_v23, %v5671_v15  ;;  %v1806_v50 = vmul.f32 %v4995_v17, %v6589_v56 }
 0x411   : > { %v2691_v30 = vadd.f32 %v2563_v16, %v1922_v21  ;;  %v1928_v21 = vadd.f32 %v1800_v12, %v1159_v22  ;;  %v1034_v43 = vmul.f32 %v4993_v11, %v6580_v45  ;;  %v6593_v45 = vld [vmem:[#allocation180_spill] sm:$0xff] }
 0x412   : > { %v2696_v4 = vadd.f32 %v2568_v14, %v1927_v41 }
 0x413   : > { %v3285_v60 = vpack.c.bf16 %v2691_v30, %v2690_v62  ;;  %v6579_v62 = vld [vmem:[#allocation167_spill] sm:$0xff] }
 0x414   : > { %2468 = vperm.xlu1 %3522, %v3650_v9   ;;  %v1030_v30 = vmul.f32 %v4993_v11, %v6579_v62  ;;  %v1808_v9 = vmul.f32 %v4995_v17, %v6585_v1  ;;  %v1036_v62 = vmul.f32 %v4993_v11, %v6591_v8 }
 0x415   : > { %3445 = vst [vmem:[%s5038_s8 + $0x138] sm:$0xff] %v3285_v60   ;;  %2472 = vperm.xlu2 %3520, %v3651_v38   ;;  %v1803_v60 = vmul.f32 %v4995_v17, %v6583_v51  ;;  %v1166_v38 = vadd.f32 %v5470_v7, %v1034_v43  ;;  %v1041_v43 = vmul.f32 %v4993_v11, %v6593_v45  ;;  %v6606_v45 = vld [vmem:[#allocation129_spill] sm:$0xff] }
 0x416   : > { %v2301_v0 = vpop.permute.xlu1 %2300  ;;  %v1162_v59 = vadd.f32 %v5470_v7, %v1030_v30 }
 0x417   : > { %v2566_v40 = vmul.f32 %v5001_v23, %v2301_v0  ;;  %v2341_v33 = vpop.permute.xlu2 %2340  ;;  %v2321_v36 = vpop.permute.xlu0 %2320  ;;  %v1932_v0 = vadd.f32 %v1804_v47, %v1163_v49  ;;  %v1935_v57 = vadd.f32 %v1807_v31, %v1166_v38  ;;  %v1809_v47 = vmul.f32 %v4995_v17, %v6595_v32 }
 0x418   : > { %v2571_v20 = vmul.f32 %v5001_v23, %v2321_v36  ;;  %v2576_v61 = vmul.f32 %v5001_v23, %v2341_v33  ;;  %v1931_v48 = vadd.f32 %v1803_v60, %v1162_v59  ;;  %v6596_v60 = vld [vmem:[#allocation123_spill] sm:$0xff]  ;;  %v1814_v31 = vmul.f32 %v4995_v17, %v6597_v63 }
 0x419   : > { %v2694_v37 = vadd.f32 %v2566_v40, %v1925_v42  ;;  %v2701_v33 = vadd.f32 %v2573_v53, %v1932_v0  ;;  %v1173_v53 = vadd.f32 %v5470_v7, %v1041_v43  ;;  %v1816_v43 = vmul.f32 %v4995_v17, %v6606_v45 }
 0x41a   : > { %v2699_v29 = vadd.f32 %v2571_v20, %v1930_v5  ;;  %v1936_v5 = vadd.f32 %v1808_v9, %v1167_v52  ;;  %v6586_v20 = vld [vmem:[#allocation170_spill] sm:$0xff]  ;;  %v1168_v9 = vadd.f32 %v5470_v7, %v1036_v62 }
 0x41b   : > { %v3295_v25 = vpack.c.bf16 %v2695_v28, %v2694_v37  ;;  %v1033_v13 = vmul.f32 %v4993_v11, %v6586_v20  ;;  %v2704_v28 = vadd.f32 %v2576_v61, %v1935_v57  ;;  %v1942_v57 = vadd.f32 %v1814_v31, %v1173_v53  ;;  %v6599_v20 = vld [vmem:[#allocation177_spill] sm:$0xff] }
 0x41c   : > { %v3305_v6 = vpack.c.bf16 %v2699_v29, %v2698_v35  ;;  %2480 = vperm.xlu1 %3522, %v3652_v27   ;;  %v6588_v35 = vld [vmem:[#allocation122_spill] sm:$0xff] }
 0x41d   : > { %3447 = vst [vmem:[%s5038_s8 + $0x148] sm:$0xff] %v3295_v25   ;;  %v1805_v29 = vmul.f32 %v4995_v17, %v6588_v35  ;;  %v1165_v25 = vadd.f32 %v5470_v7, %v1033_v13  ;;  %v1038_v13 = vmul.f32 %v4993_v11, %v6599_v20 }
 0x41e   : > { %3449 = vst [vmem:[%s5038_s8 + $0x158] sm:$0xff] %v3305_v6   ;;  %v2313_v18 = vpop.permute.xlu1 %2312  ;;  %v1164_v6 = vadd.f32 %v5470_v7, %v1032_v46 }
 0x41f   : > { %v2569_v16 = vmul.f32 %v5001_v23, %v2313_v18  ;;  %v5716_v44 = vpop.permute.xlu2 %2352  ;;  %v2333_v58 = vpop.permute.xlu0 %2332  ;;  %v1934_v14 = vadd.f32 %v1806_v50, %v1165_v25 }
 0x420   : > { %v2574_v27 = vmul.f32 %v5001_v23, %v2333_v58  ;;  %v1933_v24 = vadd.f32 %v1805_v29, %v1164_v6  ;;  %v6592_v58 = vld [vmem:[#allocation166_spill] sm:$0xff]  ;;  %v2579_v49 = vmul.f32 %v5001_v23, %v5716_v44 }
 0x421   : > { %v2697_v54 = vadd.f32 %v2569_v16, %v1928_v21  ;;  %v6590_v16 = vld [vmem:[#allocation163_spill] sm:$0xff] }
 0x422   : > { %v1037_v10 = vmul.f32 %v4993_v11, %v6590_v16  ;;  %v2702_v30 = vadd.f32 %v2574_v27, %v1933_v24  ;;  %v6603_v16 = vld [vmem:[#allocation179_spill] sm:$0xff] }
 0x423   : > { %v3300_v19 = vpack.c.bf16 %v2697_v54, %v2696_v4  ;;  %v1040_v54 = vmul.f32 %v4993_v11, %v6592_v58  ;;  %v6605_v58 = vld [vmem:[#allocation186_spill] sm:$0xff] }
 0x424   : > { %v1169_v1 = vadd.f32 %v5470_v7, %v1037_v10  ;;  %v1042_v10 = vmul.f32 %v4993_v11, %v6603_v16 }
 0x425   : > { %3448 = vst [vmem:[%s5038_s8 + $0x150] sm:$0xff] %v3300_v19   ;;  %v1813_v19 = vmul.f32 %v4995_v17, %v6596_v60  ;;  %v1172_v59 = vadd.f32 %v5470_v7, %v1040_v54  ;;  %v1047_v54 = vmul.f32 %v4993_v11, %v6605_v58  ;;  %v6609_v60 = vld [vmem:[#allocation152_spill] sm:$0xff] }
 0x426   : > { %v2325_v3 = vpop.permute.xlu1 %2324  ;;  %v1938_v61 = vadd.f32 %v1810_v39, %v1169_v1  ;;  %v1815_v39 = vmul.f32 %v4995_v17, %v6607_v2  ;;  %v1174_v31 = vadd.f32 %v5470_v7, %v1042_v10  ;;  %v6620_v2 = vld [vmem:[#allocation147_spill] sm:$0xff] }
 0x427   : > { %v2572_v42 = vmul.f32 %v5001_v23, %v2325_v3  ;;  %v2365_v40 = vpop.permute.xlu2 %2364  ;;  %v2345_v36 = vpop.permute.xlu0 %2344  ;;  %v1937_v3 = vadd.f32 %v1809_v47, %v1168_v9  ;;  %v6608_v47 = vld [vmem:[#allocation135_spill] sm:$0xff] }
 0x428   : > { %v2577_v15 = vmul.f32 %v5001_v23, %v2345_v36  ;;  %v2582_v38 = vmul.f32 %v5001_v23, %v2365_v40  ;;  %v1941_v36 = vadd.f32 %v1813_v19, %v1172_v59  ;;  %v2707_v40 = vadd.f32 %v2579_v49, %v1938_v61 }
 0x429   : > { %v2700_v34 = vadd.f32 %v2572_v42, %v1931_v48  ;;  %v1820_v19 = vmul.f32 %v4995_v17, %v6609_v60  ;;  %v1179_v49 = vadd.f32 %v5470_v7, %v1047_v54  ;;  %v6619_v54 = vld [vmem:[#allocation151_spill] sm:$0xff] }
 0x42a   : > { %v2705_v37 = vadd.f32 %v2577_v15, %v1936_v5  ;;  %v6598_v5 = vld [vmem:[#allocation176_spill] sm:$0xff]  ;;  %v2710_v46 = vadd.f32 %v2582_v38, %v1941_v36  ;;  %v1821_v45 = vmul.f32 %v4995_v17, %v6619_v54  ;;  %v6632_v54 = vld [vmem:[#allocation158_spill] sm:$0xff] }
 0x42b   : > { %v3310_v55 = vpack.c.bf16 %v2701_v33, %v2700_v34  ;;  %v1039_v15 = vmul.f32 %v4993_v11, %v6598_v5  ;;  %v6600_v34 = vld [vmem:[#allocation134_spill] sm:$0xff] }
 0x42c   : > { %v3320_v12 = vpack.c.bf16 %v2705_v37, %v2704_v28  ;;  %v1811_v28 = vmul.f32 %v4995_v17, %v6600_v34  ;;  %v6601_v37 = vld [vmem:[#allocation133_spill] sm:$0xff] }
 0x42d   : > { %3450 = vst [vmem:[%s5038_s8 + $0x160] sm:$0xff] %v3310_v55   ;;  %v1812_v35 = vmul.f32 %v4995_v17, %v6601_v37  ;;  %v1171_v50 = vadd.f32 %v5470_v7, %v1039_v15  ;;  %v1170_v55 = vadd.f32 %v5470_v7, %v1038_v13 }
 0x42e   : > { %3452 = vst [vmem:[%s5038_s8 + $0x170] sm:$0xff] %v3320_v12   ;;  %v2337_v22 = vpop.permute.xlu1 %2336 }
 0x42f   : > { %v2575_v18 = vmul.f32 %v5001_v23, %v2337_v22  ;;  %v5758_v41 = vpop.permute.xlu2 %2376  ;;  %v2357_v21 = vpop.permute.xlu0 %2356  ;;  %v1939_v6 = vadd.f32 %v1811_v28, %v1170_v55  ;;  %v1940_v27 = vadd.f32 %v1812_v35, %v1171_v50 }
 0x430   : > { %v2580_v12 = vmul.f32 %v5001_v23, %v2357_v21  ;;  %v2585_v1 = vmul.f32 %v5001_v23, %v5758_v41 }
 0x431   : > { %v2703_v4 = vadd.f32 %v2575_v18, %v1934_v14  ;;  %v6602_v14 = vld [vmem:[#allocation169_spill] sm:$0xff] }
 0x432   : > { %v1043_v18 = vmul.f32 %v4993_v11, %v6602_v14  ;;  %v2708_v8 = vadd.f32 %v2580_v12, %v1939_v6  ;;  %v6615_v14 = vld [vmem:[#allocation185_spill] sm:$0xff] }
 0x433   : > { %v3315_v51 = vpack.c.bf16 %v2703_v4, %v2702_v30  ;;  %v6604_v4 = vld [vmem:[#allocation172_spill] sm:$0xff] }
 0x434   : > { %v1046_v21 = vmul.f32 %v4993_v11, %v6604_v4  ;;  %v1175_v63 = vadd.f32 %v5470_v7, %v1043_v18  ;;  %v1048_v18 = vmul.f32 %v4993_v11, %v6615_v14 }
 0x435   : > { %3451 = vst [vmem:[%s5038_s8 + $0x168] sm:$0xff] %v3315_v51   ;;  %v1819_v51 = vmul.f32 %v4995_v17, %v6608_v47 }
 0x436   : > { %v2349_v52 = vpop.permute.xlu1 %2348  ;;  %v1178_v9 = vadd.f32 %v5470_v7, %v1046_v21  ;;  %v1944_v38 = vadd.f32 %v1816_v43, %v1175_v63  ;;  %v6618_v21 = vld [vmem:[#allocation141_spill] sm:$0xff]  ;;  %v1180_v60 = vadd.f32 %v5470_v7, %v1048_v18 }
 0x437   : > { %v2578_v0 = vmul.f32 %v5001_v23, %v2349_v52  ;;  %v2389_v48 = vpop.permute.xlu2 %2388  ;;  %v2369_v42 = vpop.permute.xlu0 %2368  ;;  %v1943_v52 = vadd.f32 %v1815_v39, %v1174_v31  ;;  %v1822_v58 = vmul.f32 %v4995_v17, %v6618_v21  ;;  %v1825_v39 = vmul.f32 %v4995_v17, %v6620_v2 }
 0x438   : > { %v2583_v44 = vmul.f32 %v5001_v23, %v2369_v42  ;;  %v2588_v59 = vmul.f32 %v5001_v23, %v2389_v48  ;;  %v1948_v42 = vadd.f32 %v1820_v19, %v1179_v49  ;;  %v2713_v15 = vadd.f32 %v2585_v1, %v1944_v38 }
 0x439   : > { %v2706_v26 = vadd.f32 %v2578_v0, %v1937_v3  ;;  %v1947_v0 = vadd.f32 %v1819_v51, %v1178_v9 }
 0x43a   : > { %v2711_v33 = vadd.f32 %v2583_v44, %v1942_v57  ;;  %v6610_v57 = vld [vmem:[#allocation182_spill] sm:$0xff]  ;;  %v6611_v44 = vld [vmem:[#allocation183_spill] sm:$0xff] }
 0x43b   : > { %v3325_v29 = vpack.c.bf16 %v2707_v40, %v2706_v26  ;;  %v1045_v41 = vmul.f32 %v4993_v11, %v6610_v57  ;;  %v1044_v5 = vmul.f32 %v4993_v11, %v6611_v44  ;;  %v2716_v20 = vadd.f32 %v2588_v59, %v1947_v0  ;;  %v6612_v40 = vld [vmem:[#allocation146_spill] sm:$0xff]  ;;  %v6622_v0 = vld [vmem:[#allocation188_spill] sm:$0xff] }
 0x43c   : > { %v3335_v56 = vpack.c.bf16 %v2711_v33, %v2710_v46  ;;  %v1817_v26 = vmul.f32 %v4995_v17, %v6612_v40  ;;  %v6613_v46 = vld [vmem:[#allocation145_spill] sm:$0xff] }
 0x43d   : > { %3453 = vst [vmem:[%s5038_s8 + $0x178] sm:$0xff] %v3325_v29   ;;  %v1818_v33 = vmul.f32 %v4995_v17, %v6613_v46  ;;  %v1177_v35 = vadd.f32 %v5470_v7, %v1045_v41  ;;  %v1176_v29 = vadd.f32 %v5470_v7, %v1044_v5 }
 0x43e   : > { %3455 = vst [vmem:[%s5038_s8 + $0x188] sm:$0xff] %v3335_v56   ;;  %v2361_v25 = vpop.permute.xlu1 %2360 }
 0x43f   : > { %v2581_v22 = vmul.f32 %v5001_v23, %v2361_v25  ;;  %v2381_v24 = vpop.permute.xlu0 %2380  ;;  %v2401_v30 = vpop.permute.xlu2 %2400  ;;  %v1945_v55 = vadd.f32 %v1817_v26, %v1176_v29  ;;  %v1946_v12 = vadd.f32 %v1818_v33, %v1177_v35 }
 0x440   : > { %v2586_v56 = vmul.f32 %v5001_v23, %v2381_v24  ;;  %v2591_v19 = vmul.f32 %v5001_v23, %v2401_v30 }
 0x441   : > { %v2709_v62 = vadd.f32 %v2581_v22, %v1940_v27  ;;  %v6614_v27 = vld [vmem:[#allocation175_spill] sm:$0xff] }
 0x442   : > { %v1049_v22 = vmul.f32 %v4993_v11, %v6614_v27  ;;  %v2714_v16 = vadd.f32 %v2586_v56, %v1945_v55  ;;  %v6627_v27 = vld [vmem:[#allocation191_spill] sm:$0xff] }
 0x443   : > { %v3330_v32 = vpack.c.bf16 %v2709_v62, %v2708_v8  ;;  %v6616_v8 = vld [vmem:[#allocation178_spill] sm:$0xff]  ;;  %v6617_v62 = vld [vmem:[#allocation192_spill] sm:$0xff] }
 0x444   : > { %v1052_v24 = vmul.f32 %v4993_v11, %v6616_v8  ;;  %v1053_v4 = vmul.f32 %v4993_v11, %v6617_v62  ;;  %v1181_v51 = vadd.f32 %v5470_v7, %v1049_v22  ;;  %v1054_v22 = vmul.f32 %v4993_v11, %v6627_v27 }
 0x445   : > { %3454 = vst [vmem:[%s5038_s8 + $0x180] sm:$0xff] %v3330_v32   ;;  %v6621_v32 = vld [vmem:[#allocation205_spill] sm:$0xff] }
 0x446   : > { %v2373_v53 = vpop.permute.xlu1 %2372  ;;  %v1826_v47 = vmul.f32 %v4995_v17, %v6621_v32  ;;  %v1184_v31 = vadd.f32 %v5470_v7, %v1052_v24  ;;  %v1185_v1 = vadd.f32 %v5470_v7, %v1053_v4  ;;  %v1950_v59 = vadd.f32 %v1822_v58, %v1181_v51  ;;  %v6630_v24 = vld [vmem:[#allocation153_spill] sm:$0xff]  ;;  %v6631_v4 = vld [vmem:[#allocation206_spill] sm:$0xff] }
 0x447   : > { %v2584_v61 = vmul.f32 %v5001_v23, %v2373_v53  ;;  %v2393_v3 = vpop.permute.xlu0 %2392  ;;  %v2413_v28 = vpop.permute.xlu2 %2412  ;;  %v1949_v53 = vadd.f32 %v1821_v45, %v1180_v60  ;;  %v1828_v62 = vmul.f32 %v4995_v17, %v6630_v24  ;;  %v1827_v21 = vmul.f32 %v4995_v17, %v6631_v4 }
 0x448   : > { %v2589_v36 = vmul.f32 %v5001_v23, %v2393_v3  ;;  %v2594_v9 = vmul.f32 %v5001_v23, %v2413_v28  ;;  %v1954_v3 = vadd.f32 %v1826_v47, %v1185_v1  ;;  %v2719_v41 = vadd.f32 %v2591_v19, %v1950_v59 }
 0x449   : > { %v2712_v48 = vadd.f32 %v2584_v61, %v1943_v52  ;;  %v1953_v61 = vadd.f32 %v1825_v39, %v1184_v31  ;;  %v1831_v45 = vmul.f32 %v4995_v17, %v6632_v54  ;;  %v1186_v32 = vadd.f32 %v5470_v7, %v1054_v22  ;;  %v6641_v22 = vld [vmem:[#allocation201_spill] sm:$0xff] }
 0x44a   : > { %v2717_v13 = vadd.f32 %v2589_v36, %v1948_v42  ;;  %v1051_v42 = vmul.f32 %v4993_v11, %v6622_v0  ;;  %v6623_v36 = vld [vmem:[#allocation189_spill] sm:$0xff] }
 0x44b   : > { %v3340_v34 = vpack.c.bf16 %v2713_v15, %v2712_v48  ;;  %v1050_v57 = vmul.f32 %v4993_v11, %v6623_v36  ;;  %v2722_v5 = vadd.f32 %v2594_v9, %v1953_v61  ;;  %v6624_v48 = vld [vmem:[#allocation157_spill] sm:$0xff]  ;;  %v1955_v9 = vadd.f32 %v1827_v21, %v1186_v32  ;;  %v6634_v61 = vld [vmem:[#allocation194_spill] sm:$0xff]  ;;  %v6645_v21 = vld [vmem:[#allocation215_spill] sm:$0xff] }
 0x44c   : > { %v3350_v37 = vpack.c.bf16 %v2717_v13, %v2716_v20  ;;  %v1823_v20 = vmul.f32 %v4995_v17, %v6624_v48  ;;  %v6625_v13 = vld [vmem:[#allocation162_spill] sm:$0xff]  ;;  %v1183_v33 = vadd.f32 %v5470_v7, %v1051_v42  ;;  %v3653_v54 = vld [vmem:[%s6013_s2] ss:$0 sm:$0xff] }
 0x44d   : > { %3456 = vst [vmem:[%s5038_s8 + $0x190] sm:$0xff] %v3340_v34   ;;  %v1824_v40 = vmul.f32 %v4995_v17, %v6625_v13  ;;  %v1182_v34 = vadd.f32 %v5470_v7, %v1050_v57 }
 0x44e   : > { %3458 = vst [vmem:[%s5038_s8 + $0x1a0] sm:$0xff] %v3350_v37   ;;  %v2385_v50 = vpop.permute.xlu1 %2384 }
 0x44f   : > { %v2587_v25 = vmul.f32 %v5001_v23, %v2385_v50  ;;  %v2405_v6 = vpop.permute.xlu0 %2404  ;;  %v2425_v63 = vpop.permute.xlu2 %2424  ;;  %v1951_v35 = vadd.f32 %v1823_v20, %v1182_v34  ;;  %v1952_v29 = vadd.f32 %v1824_v40, %v1183_v33 }
 0x450   : > { %v2592_v28 = vmul.f32 %v5001_v23, %v2405_v6  ;;  %v2597_v47 = vmul.f32 %v5001_v23, %v2425_v63  ;;  %v1057_v63 = vmul.f32 %v4993_v11, %v6634_v61 }
 0x451   : > { %v2715_v10 = vadd.f32 %v2587_v25, %v1946_v12  ;;  %v6626_v12 = vld [vmem:[#allocation181_spill] sm:$0xff] }
 0x452   : > { %v1055_v25 = vmul.f32 %v4993_v11, %v6626_v12  ;;  %v2720_v14 = vadd.f32 %v2592_v28, %v1951_v35  ;;  %v1189_v40 = vadd.f32 %v5470_v7, %v1057_v63 }
 0x453   : > { %v3345_v43 = vpack.c.bf16 %v2715_v10, %v2714_v16  ;;  %v6628_v16 = vld [vmem:[#allocation184_spill] sm:$0xff]  ;;  %v6629_v10 = vld [vmem:[#allocation197_spill] sm:$0xff] }
 0x454   : > { %v1058_v6 = vmul.f32 %v4993_v11, %v6628_v16  ;;  %v1059_v8 = vmul.f32 %v4993_v11, %v6629_v10  ;;  %v1187_v39 = vadd.f32 %v5470_v7, %v1055_v25 }
 0x455   : > { %3457 = vst [vmem:[%s5038_s8 + $0x198] sm:$0xff] %v3345_v43   ;;  %v6633_v43 = vld [vmem:[#allocation211_spill] sm:$0xff] }
 0x456   : > { %v2397_v49 = vpop.permute.xlu1 %2396  ;;  %v1832_v2 = vmul.f32 %v4995_v17, %v6633_v43  ;;  %v1190_v51 = vadd.f32 %v5470_v7, %v1058_v6  ;;  %v1191_v60 = vadd.f32 %v5470_v7, %v1059_v8  ;;  %v1956_v1 = vadd.f32 %v1828_v62, %v1187_v39  ;;  %v6643_v6 = vld [vmem:[#allocation212_spill] sm:$0xff]  ;;  %v6644_v62 = vld [vmem:[#allocation207_spill] sm:$0xff] }
 0x457   : > { %v2590_v38 = vmul.f32 %v5001_v23, %v2397_v49  ;;  %v2417_v52 = vpop.permute.xlu0 %2416  ;;  %v2437_v56 = vpop.permute.xlu2 %2436  ;;  %v1833_v10 = vmul.f32 %v4995_v17, %v6643_v6  ;;  %v1837_v4 = vmul.f32 %v4995_v17, %v6644_v62  ;;  %v6655_v62 = vld [vmem:[#allocation203_spill] sm:$0xff] }
 0x458   : > { %v2595_v30 = vmul.f32 %v5001_v23, %v2417_v52  ;;  %v2600_v19 = vmul.f32 %v5001_v23, %v2437_v56  ;;  %v2725_v0 = vadd.f32 %v2597_v47, %v1956_v1 }
 0x459   : > { %v2718_v44 = vadd.f32 %v2590_v38, %v1949_v53  ;;  %v1959_v53 = vadd.f32 %v1831_v45, %v1190_v51  ;;  %v1960_v38 = vadd.f32 %v1832_v2, %v1191_v60 }
 0x45a   : > { %v2723_v15 = vadd.f32 %v2595_v30, %v1954_v3  ;;  %v6635_v3 = vld [vmem:[#allocation195_spill] sm:$0xff] }
 0x45b   : > { %v3355_v26 = vpack.c.bf16 %v2719_v41, %v2718_v44  ;;  %v1056_v30 = vmul.f32 %v4993_v11, %v6635_v3  ;;  %v2728_v57 = vadd.f32 %v2600_v19, %v1959_v53  ;;  %v6636_v44 = vld [vmem:[#allocation208_spill] sm:$0xff]  ;;  %v6646_v53 = vld [vmem:[#allocation198_spill] sm:$0xff] }
 0x45c   : > { %v3365_v46 = vpack.c.bf16 %v2723_v15, %v2722_v5  ;;  %v1829_v5 = vmul.f32 %v4995_v17, %v6636_v44  ;;  %v6637_v15 = vld [vmem:[#allocation209_spill] sm:$0xff] }
 0x45d   : > { %3459 = vst [vmem:[%s5038_s8 + $0x1a8] sm:$0xff] %v3355_v26   ;;  %v1830_v48 = vmul.f32 %v4995_v17, %v6637_v15  ;;  %v1188_v26 = vadd.f32 %v5470_v7, %v1056_v30  ;;  %v6640_v7 = vld [vmem:[#allocation190_spill] sm:$0xff] }
 0x45e   : > { %3461 = vst [vmem:[%s5038_s8 + $0x1b8] sm:$0xff] %v3365_v46   ;;  %v2409_v37 = vpop.permute.xlu1 %2408 }
 0x45f   : > { %v2593_v50 = vmul.f32 %v5001_v23, %v2409_v37  ;;  %v2429_v55 = vpop.permute.xlu0 %2428  ;;  %v2449_v42 = vpop.permute.xlu2 %2448  ;;  %v1957_v34 = vadd.f32 %v1829_v5, %v1188_v26  ;;  %v1958_v28 = vadd.f32 %v1830_v48, %v1189_v40 }
 0x460   : > { %v2598_v46 = vmul.f32 %v5001_v23, %v2429_v55  ;;  %v1064_v55 = vmul.f32 %v4993_v11, %v6640_v7  ;;  %v2603_v2 = vmul.f32 %v5001_v23, %v2449_v42  ;;  %v6648_v42 = vld [vmem:[#allocation213_spill] sm:$0xff] }
 0x461   : > { %v2721_v18 = vadd.f32 %v2593_v50, %v1952_v29  ;;  %v6638_v29 = vld [vmem:[#allocation187_spill] sm:$0xff]  ;;  %v6639_v50 = vld [vmem:[#allocation196_spill] sm:$0xff] }
 0x462   : > { %v1061_v56 = vmul.f32 %v4993_v11, %v6638_v29  ;;  %v1060_v12 = vmul.f32 %v4993_v11, %v6639_v50  ;;  %v2726_v25 = vadd.f32 %v2598_v46, %v1957_v34  ;;  %v1196_v39 = vadd.f32 %v3653_v54, %v1064_v55 }
 0x463   : > { %v3360_v58 = vpack.c.bf16 %v2721_v18, %v2720_v14  ;;  %v1065_v14 = vmul.f32 %v4993_v11, %v6641_v22  ;;  %v6642_v18 = vld [vmem:[#allocation204_spill] sm:$0xff] }
 0x464   : > { %v1834_v16 = vmul.f32 %v4995_v17, %v6642_v18  ;;  %v1193_v45 = vadd.f32 %v3653_v54, %v1061_v56  ;;  %v1192_v43 = vadd.f32 %v3653_v54, %v1060_v12  ;;  %v6652_v12 = vld [vmem:[#allocation210_spill] sm:$0xff] }
 0x465   : > { %3460 = vst [vmem:[%s5038_s8 + $0x1b0] sm:$0xff] %v3360_v58   ;;  %v1838_v58 = vmul.f32 %v4995_v17, %v6645_v21  ;;  %v1197_v32 = vadd.f32 %v3653_v54, %v1065_v14 }
 0x466   : > { %v2421_v31 = vpop.permute.xlu1 %2420  ;;  %v1962_v60 = vadd.f32 %v1834_v16, %v1193_v45  ;;  %v1961_v19 = vadd.f32 %v1833_v10, %v1192_v43  ;;  %v6656_v43 = vld [vmem:[#allocation217_spill] sm:$0xff] }
 0x467   : > { %v2596_v49 = vmul.f32 %v5001_v23, %v2421_v31  ;;  %v2441_v59 = vpop.permute.xlu0 %2440  ;;  %v2461_v8 = vpop.permute.xlu2 %2460 }
 0x468   : > { %v2601_v52 = vmul.f32 %v5001_v23, %v2441_v59  ;;  %v2606_v47 = vmul.f32 %v5001_v23, %v2461_v8  ;;  %v2731_v63 = vadd.f32 %v2603_v2, %v1962_v60  ;;  %v6654_v8 = vld [vmem:[#allocation202_spill] sm:$0xff]  ;;  %v1841_v2 = vmul.f32 %v4995_v17, %v6656_v43 }
 0x469   : > { %v2724_v36 = vadd.f32 %v2596_v49, %v1955_v9  ;;  %v1965_v9 = vadd.f32 %v1837_v4, %v1196_v39  ;;  %v1966_v49 = vadd.f32 %v1838_v58, %v1197_v32  ;;  %v1068_v4 = vmul.f32 %v4993_v11, %v6655_v62  ;;  %v6657_v39 = vld [vmem:[#allocation10_spill] sm:$0xff] }
 0x46a   : > { %v2729_v41 = vadd.f32 %v2601_v52, %v1960_v38  ;;  %v1063_v38 = vmul.f32 %v4993_v11, %v6646_v53  ;;  %v6647_v52 = vld [vmem:[#allocation199_spill] sm:$0xff]  ;;  %v1842_v32 = vmul.f32 %v4995_v17, %v6657_v39 }
 0x46b   : > { %v3370_v20 = vpack.c.bf16 %v2725_v0, %v2724_v36  ;;  %v1062_v61 = vmul.f32 %v4993_v11, %v6647_v52  ;;  %v2734_v30 = vadd.f32 %v2606_v47, %v1965_v9  ;;  %v1835_v36 = vmul.f32 %v4995_v17, %v6648_v42 }
 0x46c   : > { %v3380_v13 = vpack.c.bf16 %v2729_v41, %v2728_v57  ;;  %v6649_v57 = vld [vmem:[#allocation214_spill] sm:$0xff]  ;;  %v1195_v15 = vadd.f32 %v3653_v54, %v1063_v38 }
 0x46d   : > { %3462 = vst [vmem:[%s5038_s8 + $0x1c0] sm:$0xff] %v3370_v20   ;;  %v1836_v41 = vmul.f32 %v4995_v17, %v6649_v57  ;;  %v1194_v48 = vadd.f32 %v3653_v54, %v1062_v61 }
 0x46e   : > { %3464 = vst [vmem:[%s5038_s8 + $0x1d0] sm:$0xff] %v3380_v13   ;;  %v2433_v33 = vpop.permute.xlu1 %2432 }
 0x46f   : > { %v2599_v37 = vmul.f32 %v5001_v23, %v2433_v33  ;;  %v2453_v35 = vpop.permute.xlu0 %2452  ;;  %v1963_v40 = vadd.f32 %v1835_v36, %v1194_v48  ;;  %v1964_v26 = vadd.f32 %v1836_v41, %v1195_v15  ;;  %v6650_v33 = vld [vmem:[#allocation193_spill] sm:$0xff]  ;;  %v2473_v50 = vpop.permute.xlu2 %2472 }
 0x470   : > { %v2604_v20 = vmul.f32 %v5001_v23, %v2453_v35  ;;  %v1067_v34 = vmul.f32 %v4993_v11, %v6650_v33  ;;  %v1840_v35 = vmul.f32 %v4995_v17, %v6652_v12  ;;  %v2609_v14 = vmul.f32 %v5001_v23, %v2473_v50 }
 0x471   : > { %v2727_v27 = vadd.f32 %v2599_v37, %v1958_v28  ;;  %v6651_v28 = vld [vmem:[#allocation200_spill] sm:$0xff] }
 0x472   : > { %v1066_v37 = vmul.f32 %v4993_v11, %v6651_v28  ;;  %v2732_v29 = vadd.f32 %v2604_v20, %v1963_v40  ;;  %v1199_v55 = vadd.f32 %v3653_v54, %v1067_v34 }
 0x473   : > { %v3375_v24 = vpack.c.bf16 %v2727_v27, %v2726_v25  ;;  %v6653_v25 = vld [vmem:[#allocation216_spill] sm:$0xff] }
 0x474   : > { %v1839_v27 = vmul.f32 %v4995_v17, %v6653_v25  ;;  %v1198_v22 = vadd.f32 %v3653_v54, %v1066_v37  ;;  %v1968_v16 = vadd.f32 %v1840_v35, %v1199_v55 }
 0x475   : > { %3463 = vst [vmem:[%s5038_s8 + $0x1c8] sm:$0xff] %v3375_v24   ;;  %v1069_v24 = vmul.f32 %v4993_v11, %v6654_v8  ;;  %v1200_v11 = vadd.f32 %v3653_v54, %v1068_v4 }
 0x476   : > { %v2445_v51 = vpop.permute.xlu1 %2444  ;;  %v1967_v6 = vadd.f32 %v1839_v27, %v1198_v22  ;;  %v2737_v21 = vadd.f32 %v2609_v14, %v1968_v16 }
 0x477   : > { %v2602_v31 = vmul.f32 %v5001_v23, %v2445_v51  ;;  %v2465_v1 = vpop.permute.xlu0 %2464  ;;  %v1201_v51 = vadd.f32 %v3653_v54, %v1069_v24 }
 0x478   : > { %v2607_v59 = vmul.f32 %v5001_v23, %v2465_v1 }
 0x479   : > { %v2730_v3 = vadd.f32 %v2602_v31, %v1961_v19  ;;  %v1969_v31 = vadd.f32 %v1841_v2, %v1200_v11  ;;  %v1970_v1 = vadd.f32 %v1842_v32, %v1201_v51 }
 0x47a   : > { %v2735_v0 = vadd.f32 %v2607_v59, %v1966_v49 }
 0x47b   : > { %v3385_v44 = vpack.c.bf16 %v2731_v63, %v2730_v3 }
 0x47c   : > { %v3395_v5 = vpack.c.bf16 %v2735_v0, %v2734_v30 }
 0x47d   : > { %3465 = vst [vmem:[%s5038_s8 + $0x1d8] sm:$0xff] %v3385_v44  }
 0x47e   : > { %3467 = vst [vmem:[%s5038_s8 + $0x1e8] sm:$0xff] %v3395_v5   ;;  %v2457_v13 = vpop.permute.xlu1 %2456 }
 0x47f   : > { %v2605_v46 = vmul.f32 %v5001_v23, %v2457_v13  ;;  %v2477_v45 = vpop.permute.xlu0 %2476 }
 0x480   : > { %v2610_v60 = vmul.f32 %v5001_v23, %v2477_v45 }
 0x481   : > { %v2733_v56 = vadd.f32 %v2605_v46, %v1964_v26 }
 0x482   : > { %v2738_v17 = vadd.f32 %v2610_v60, %v1969_v31 }
 0x483   : > { %v3390_v7 = vpack.c.bf16 %v2733_v56, %v2732_v29 }
 0x485   : > { %3466 = vst [vmem:[%s5038_s8 + $0x1e0] sm:$0xff] %v3390_v7  }
 0x486   : > { %v2469_v18 = vpop.permute.xlu1 %2468 }
 0x487   : > { %v2608_v10 = vmul.f32 %v5001_v23, %v2469_v18 }
 0x489   : > { %v2736_v58 = vadd.f32 %v2608_v10, %v1967_v6 }
 0x48b   : > { %v3400_v47 = vpack.c.bf16 %v2737_v21, %v2736_v58 }
 0x48d   : > { %3468 = vst [vmem:[%s5038_s8 + $0x1f0] sm:$0xff] %v3400_v47  }
 0x48e   : > { %v2481_v19 = vpop.permute.xlu1 %2480 }
 0x48f   : > { %v2611_v9 = vmul.f32 %v5001_v23, %v2481_v19 }
 0x491   : > { %v2739_v49 = vadd.f32 %v2611_v9, %v1970_v1 }
 0x493   : > { %v3405_v59 = vpack.c.bf16 %v2739_v49, %v2738_v17 }
 0x495   : > { %3469 = vst [vmem:[%s5038_s8 + $0x1f8] sm:$0xff] %v3405_v59  }
 0x496   : > { %3681 = shalt.err (!%p3678_p3)
}
 0x497   : > { %s3721_s6 = smov 64   ;;  %s3722_s8 = smov 4  }
 0x498   : > { %3470 = dma.vmem_to_hbm [thread:$0]  (%p3781_p5), %s3010_s16, 8192, %s3012_s26, %s2997_s27, %s3721_s6, %s3721_s6, %s3722_s8  }
 0x499 PF: > { %p3476_p4 = scmp.ge.s32.totalorder %s3716_s15, 2  ;;  %s3026_s10 = sand.u32 1, %s3704_s12  }
 0x49a   : > { %s3027_s11 = scalar_lea.sflag [#allocation3], %s3026_s10 }
 0x49b   : > { %p3473_p7 = pnand %p3476_p4, %p3785_p6 }
 0x49d   : > { %p3474_p8 = pneg %p3473_p7 }
 0x49f   : > { %3699 = dma.done.wait (%p3474_p8), %s3027_s11, 8192  }
 0x4a0   : > { %3701 = vsyncadd (%p3474_p8), %s3027_s11, 4294959104  ;;  %p13_p9 = scmp.ge.s32.totalorder %s3768_s18, 4   ;;  %s6658_s12 = smov %s3708_s13 }
 0x4a1   : > { %s6659_s13 = smov %s3712_s14  ;;  %s6660_s14 = smov %s3779_s21 }
 0x4a2   : > { %s6661_s15 = smov %s3768_s18  ;;  %15 = sbr.rel (!%p13_p9) target bundleno = 3 (0x3), region = 67 }
 0x4a7   :  { %3033 = vsyncpa [#allocation3], 1 }
 0x4a8   :  { %3035 = vsyncpa [#allocation3 + $0x1], 1 }

</bundles_post_ra>
